<compile_context>
chip_gen: v5e
topology: v5e:2x2
jax: 0.10.0
libtpu: 0.0.40
codegen_flags: <defaults>
</compile_context>

<pallas_src>
import numpy as np
import jax
import jax.numpy as jnp
from jax.experimental import pallas as pl
from jax.experimental.pallas import tpu as pltpu

LEAKY_SLOPE = 0.01   # nn.LeakyReLU default
BN_EPS = 1e-5        # nn.BatchNorm2d default


def _leaky(x):
    return jnp.where(x >= 0, x, LEAKY_SLOPE * x)


# --------------------------------------------------------------------------
# Host-side constant / parameter packing (runs ONCE, outside jit)
# --------------------------------------------------------------------------
def _avgpool_matrix(n_in, pool):
    """(n_in, n_in//pool) floor-mode AvgPool1d(pool, stride=pool) matrix."""
    n_out = n_in // pool
    m = np.zeros((n_in, n_out), np.float32)
    for w in range(n_out):
        m[w * pool:(w + 1) * pool, w] = 1.0 / pool
    return m


def _block_diag(blocks):
    rows = sum(b.shape[0] for b in blocks)
    cols = sum(b.shape[1] for b in blocks)
    out = np.zeros((rows, cols), np.float32)
    r = c = 0
    for b in blocks:
        out[r:r + b.shape[0], c:c + b.shape[1]] = b
        r += b.shape[0]
        c += b.shape[1]
    return out


def _toeplitz(w_tap, T, Lp):
    """(T, Lp) matrix M with M[t, l] = w_tap[t-l] (valid cross-correlation)."""
    K = w_tap.shape[0]
    d = np.arange(T)[:, None] - np.arange(Lp)[None, :]
    mask = jnp.asarray((d >= 0) & (d < K))
    vals = w_tap[jnp.asarray(np.clip(d, 0, K - 1))]
    return jnp.where(mask, vals, 0.0).astype(jnp.float32)


def pack_params(params, cfg):
    """Fold BNs, build the Toeplitz conv matrix and the (batch-independent,
    shared) pooling matrices.  Nothing here depends on the batch size."""
    C, T = cfg["C"], cfg["T"]
    F, S = cfg["num_T"], cfg["num_S"]
    kernels = cfg["t_kernels"]
    pool_t, pool_s, pool_f = 8, 2, 4

    Wp = [(T - k + 1) // pool_t for k in kernels]   # pooled width per T-branch
    Lp = [w * pool_t for w in Wp]                   # conv outputs actually pooled
    Ltot = sum(Lp)
    Tt = sum(Wp)                                    # width after Tception concat
    Tp = Tt // pool_s                               # width after Sception pool
    Tf = Tp // pool_f                               # width after fusion pool

    half = C // 2
    hout2 = (C - half) // half + 1                  # Sception2 output height
    n_h = 1 + hout2                                 # height after Sception concat
    assert n_h == 3, "fusion layer kernel (3,1) expects 3 stacked Sception rows"
    S3 = n_h * S

    scale_t, shift_t = params["bn_t_scale"], params["bn_t_shift"]
    scale_s, shift_s = params["bn_s_scale"], params["bn_s_shift"]
    scale_f, shift_f = params["bn_f_scale"], params["bn_f_shift"]

    # ---- Tception: one Toeplitz conv matrix, columns ordered (f, branch, l) ----
    toe_cols, bias_cols = [], []
    for f in range(F):
        for i, _k in enumerate(kernels):
            toe_cols.append(_toeplitz(params[f"t{i}_w"][f], T, Lp[i]))
            bias_cols.append(jnp.full((Lp[i],), params[f"t{i}_b"][f], jnp.float32))
    W_toe = jnp.concatenate(toe_cols, axis=1).astype(jnp.bfloat16)   # (T, F*Ltot) bf16
    bias_t = jnp.concatenate(bias_cols)[None, :].astype(jnp.float32)  # (1, F*Ltot)

    # ---- shared per-filter AvgPool(8): block-diag over the 3 branches only ----
    P_pool_t = jnp.asarray(_block_diag(
        [_avgpool_matrix(Lp[i], pool_t) for i in range(len(kernels))]))  # (Ltot, Tt)

    # ---- Sception1/2 with BN_t folded in; laid out per Tception filter ----
    w1 = params["s1_w"] * scale_t[None, :, None]            # (S, F, C)
    w2 = params["s2_w"] * scale_t[None, :, None]            # (S, F, C//2)
    row_blocks = [w1]
    for h in range(hout2):
        blk = jnp.zeros((S, F, C), jnp.float32)
        blk = blk.at[:, :, h * half:(h + 1) * half].set(w2)
        row_blocks.append(blk)
    W_sc = jnp.concatenate(row_blocks, axis=0)              # (3S, F, C)  rows: (h, s)
    W_sc = jnp.transpose(W_sc, (1, 0, 2)).astype(jnp.float32)  # (F, 3S, C)
    b_s1 = params["s1_b"] + jnp.sum(params["s1_w"] * shift_t[None, :, None], axis=(1, 2))
    b_s2 = params["s2_b"] + jnp.sum(params["s2_w"] * shift_t[None, :, None], axis=(1, 2))
    bias_sc = jnp.concatenate([b_s1] + [b_s2] * hout2)[:, None]      # (3S, 1)

    # ---- shared AvgPool(2) over the concatenated Tception time axis ----
    P_pool_s = jnp.asarray(_avgpool_matrix(Tt, pool_s))              # (Tt, Tp)

    # ---- fusion conv with BN_s folded in; columns ordered (h, s_in) ----
    W_fus = jnp.transpose(params["fus_w"] * scale_s[None, :, None],
                          (0, 2, 1)).reshape(S, n_h * S)             # (S, 3S)
    bias_fus = (params["fus_b"]
                + jnp.sum(params["fus_w"] * shift_s[None, :, None],
                          axis=(1, 2)))[:, None]                     # (S, 1)

    # ---- shared pool(4)+time-sum vector (floor mode: drop the tail) ----
    pfs = np.zeros((Tp, 1), np.float32)
    pfs[:Tf * pool_f, 0] = 1.0 / pool_f
    P_fsum = jnp.asarray(pfs)                                        # (Tp, 1)

    # ---- head: BN_f and 1/Tf folded into fc1 (column-vector layout) ----
    W1T = (params["fc1_wT"] * (scale_f / float(Tf))[:, None]).T      # (hidden, S)
    b1 = (params["fc1_b"]
          + jnp.sum(shift_f[:, None] * params["fc1_wT"], axis=0))[:, None]   # (hidden, 1)
    W2T = params["fc2_wT"].T                                         # (ncls, hidden)
    b2 = params["fc2_b"][:, None]                                    # (ncls, 1)

    ops = (W_toe, bias_t, P_pool_t, W_sc, bias_sc, P_pool_s,
           W_fus, bias_fus, P_fsum, W1T, b1, W2T, b2)
    dims = dict(Tt=Tt, Tp=Tp, Tf=Tf, Ltot=Ltot, S3=S3)
    return ops, dims


# --------------------------------------------------------------------------
# The single fused kernel: plain 2-D MXU matmuls + VPU elementwise, per sample
# --------------------------------------------------------------------------
def _make_fused_kernel(B, F, Ltot, Tt, S3):
    def kernel(x_ref, wtoe_ref, bt_ref, ppt_ref, wsc_ref, bsc_ref, pps_ref,
               wfus_ref, bfus_ref, pfs_ref, w1_ref, b1_ref, w2_ref, b2_ref,
               o_ref):
        f32 = jnp.float32
        for b in range(B):                        # static unroll over the small batch
            # --- Tception: all 3 branches / all filters as one bf16 Toeplitz matmul
            u = jnp.dot(x_ref[b], wtoe_ref[...],
                        preferred_element_type=f32)                    # (C, F*Ltot)
            u = _leaky(u + bt_ref[...])
            # --- per filter: AvgPool(8) via one shared pooling matrix, then the
            #     (BN_t-folded) Sception1/2 channel contraction, accumulated.
            z = jnp.zeros((S3, Tt), f32)
            for f in range(F):
                pooled = jnp.dot(u[:, f * Ltot:(f + 1) * Ltot], ppt_ref[...],
                                 preferred_element_type=f32)           # (C, Tt)
                z = z + jnp.dot(wsc_ref[f], pooled,
                                preferred_element_type=f32)            # (3S, Tt)
            z = _leaky(z + bsc_ref[...])
            zp = jnp.dot(z, pps_ref[...], preferred_element_type=f32)  # (3S, Tp)
            # --- fusion conv (BN_s folded), LeakyReLU, pool(4)+time-mean
            g = _leaky(jnp.dot(wfus_ref[...], zp, preferred_element_type=f32)
                       + bfus_ref[...])                                 # (S, Tp)
            feat = jnp.dot(g, pfs_ref[...], preferred_element_type=f32)  # (S, 1)
            # --- FC head (BN_f and 1/Tf folded into fc1)
            hid = jnp.maximum(
                jnp.dot(w1_ref[...], feat, preferred_element_type=f32) + b1_ref[...],
                0.0)                                                    # (hidden, 1)
            o_ref[:, b:b + 1] = (jnp.dot(w2_ref[...], hid, preferred_element_type=f32)
                                 + b2_ref[...])                         # (ncls, 1)
    return kernel


def make_tsception_forward(cfg, dims):
    C, T = cfg["C"], cfg["T"]
    F, S = cfg["num_T"], cfg["num_S"]
    hidden, ncls = cfg["hidden"], cfg["num_classes"]
    Tt, Tp, Ltot, S3 = dims["Tt"], dims["Tp"], dims["Ltot"], dims["S3"]

    def forward(x, ops):
        B = x.shape[0]
        x3 = x[:, 0, :, :].astype(jnp.bfloat16)                         # (B, C, T)
        operands = (x3,) + tuple(ops)

        flops = 2 * B * (C * T * F * Ltot
                         + F * (C * Ltot * Tt + S3 * C * Tt)
                         + S3 * Tt * Tp + S * S3 * Tp + S * Tp
                         + hidden * S + ncls * hidden)
        bytes_accessed = (sum(int(np.prod(o.shape)) * o.dtype.itemsize
                              for o in operands) + ncls * B * 4)

        vmem = pltpu.MemorySpace.VMEM
        out = pl.pallas_call(
            _make_fused_kernel(B, F, Ltot, Tt, S3),
            out_shape=jax.ShapeDtypeStruct((ncls, B), jnp.float32),
            in_specs=[pl.BlockSpec(memory_space=vmem) for _ in operands],
            out_specs=pl.BlockSpec(memory_space=vmem),
            cost_estimate=pl.CostEstimate(flops=flops, transcendentals=0,
                                          bytes_accessed=bytes_accessed),
        )(*operands)
        return out.T                                                     # (B, num_classes)

    return jax.jit(forward)


# --------------------------------------------------------------------------
# Deterministic parameter initialization (PyTorch-like raw layouts)
# --------------------------------------------------------------------------
def init_params(key, cfg):
    C, F, S = cfg["C"], cfg["num_T"], cfg["num_S"]
    hidden, ncls = cfg["hidden"], cfg["num_classes"]
    keys = iter(jax.random.split(key, 64))

    def rnd(shape, scale=0.1):
        return (scale * jax.random.normal(next(keys), shape)).astype(jnp.float32)

    def bn_affine(ch):
        gamma = 1.0 + 0.1 * jax.random.normal(next(keys), (ch,))
        beta = 0.1 * jax.random.normal(next(keys), (ch,))
        mean = 0.1 * jax.random.normal(next(keys), (ch,))
        var = 1.0 + 0.5 * jax.random.uniform(next(keys), (ch,))
        scale = gamma / jnp.sqrt(var + BN_EPS)
        shift = beta - mean * scale
        return scale.astype(jnp.float32), shift.astype(jnp.float32)

    p = {}
    for i, K in enumerate(cfg["t_kernels"]):
        p[f"t{i}_w"] = rnd((F, K))                # Conv2d(1,F,(1,K)) weight
        p[f"t{i}_b"] = rnd((F,))
    p["bn_t_scale"], p["bn_t_shift"] = bn_affine(F)
    p["s1_w"] = rnd((S, F, C))                    # Conv2d(F,S,(C,1))  (out,in,kh)
    p["s1_b"] = rnd((S,))
    p["s2_w"] = rnd((S, F, C // 2))               # Conv2d(F,S,(C/2,1))
    p["s2_b"] = rnd((S,))
    p["bn_s_scale"], p["bn_s_shift"] = bn_affine(S)
    p["fus_w"] = rnd((S, S, 3))                   # Conv2d(S,S,(3,1))  (out,in,kh)
    p["fus_b"] = rnd((S,))
    p["bn_f_scale"], p["bn_f_shift"] = bn_affine(S)
    p["fc1_wT"] = rnd((S, hidden))                # Linear(S,hidden) weight^T
    p["fc1_b"] = rnd((hidden,))
    p["fc2_wT"] = rnd((hidden, ncls))             # Linear(hidden,ncls) weight^T
    p["fc2_b"] = rnd((ncls,))
    return p


# --------------------------------------------------------------------------
# Pure-JAX reference of the PyTorch eval-mode forward (for verification)
# --------------------------------------------------------------------------
def reference_forward(x, p, cfg):
    C, T = cfg["C"], cfg["T"]
    P = jax.lax.Precision.HIGHEST

    def avgpool_last(v, k):
        n = v.shape[-1] // k
        return v[..., :n * k].reshape(v.shape[:-1] + (n, k)).mean(-1)

    x0 = x[:, 0].astype(jnp.float32)                               # (B, C, T)
    touts = []
    for i, K in enumerate(cfg["t_kernels"]):
        L = T - K + 1
        idx = jnp.arange(L)[:, None] + jnp.arange(K)[None, :]
        patches = x0[:, :, idx]                                    # (B, C, L, K)
        y = jnp.einsum("bclk,fk->bfcl", patches, p[f"t{i}_w"], precision=P) \
            + p[f"t{i}_b"][None, :, None, None]
        touts.append(avgpool_last(_leaky(y), 8))
    out = jnp.concatenate(touts, axis=-1)                          # (B, F, C, Tt)
    out = out * p["bn_t_scale"][None, :, None, None] + p["bn_t_shift"][None, :, None, None]

    z1 = jnp.einsum("bfct,sfc->bst", out, p["s1_w"], precision=P) + p["s1_b"][None, :, None]
    z1 = avgpool_last(_leaky(z1), 2)[:, :, None, :]
    half = C // 2
    hout2 = (C - half) // half + 1
    z2s = []
    for h in range(hout2):
        z2 = jnp.einsum("bfct,sfc->bst", out[:, :, h * half:(h + 1) * half, :],
                        p["s2_w"], precision=P) + p["s2_b"][None, :, None]
        z2s.append(avgpool_last(_leaky(z2), 2)[:, :, None, :])
    z = jnp.concatenate([z1] + z2s, axis=2)                        # (B, S, 3, Tp)
    z = z * p["bn_s_scale"][None, :, None, None] + p["bn_s_shift"][None, :, None, None]

    g = jnp.einsum("biht,oih->bot", z, p["fus_w"], precision=P) + p["fus_b"][None, :, None]
    g = avgpool_last(_leaky(g), 4)                                 # (B, S, Tf)
    g = g * p["bn_f_scale"][None, :, None] + p["bn_f_shift"][None, :, None]

    feat = g.mean(-1)                                              # (B, S)
    hid = jnp.maximum(jnp.dot(feat, p["fc1_wT"], precision=P) + p["fc1_b"], 0.0)
    return jnp.dot(hid, p["fc2_wT"], precision=P) + p["fc2_b"]


if __name__ == "__main__":
    # TSception(num_classes=3, input_size=(1, 4, 128), sampling_rate=64,
    #           num_T=4, num_S=4, hidden=32, dropout_rate=0.5), batch=2, eval mode.
    cfg = dict(num_classes=3, C=4, T=128, sampling_rate=64,
               num_T=4, num_S=4, hidden=32, dropout_rate=0.5)
    sr = cfg["sampling_rate"]
    cfg["t_kernels"] = [int(0.5 * sr), int(0.25 * sr), int(0.125 * sr)]   # 32, 16, 8

    key = jax.random.PRNGKey(0)
    kx, kp = jax.random.split(key)
    x = jax.random.normal(kx, (2, 1, cfg["C"], cfg["T"]), dtype=jnp.float32)
    params = init_params(kp, cfg)

    ops, dims = pack_params(params, cfg)          # packed ONCE, outside the jitted path
    fwd = make_tsception_forward(cfg, dims)
    out = jax.block_until_ready(fwd(x, ops))

    assert out.shape == (2, cfg["num_classes"]), out.shape
    assert bool(jnp.all(jnp.isfinite(out)))
    ref = reference_forward(x, params, cfg)
    # bf16 Toeplitz weights / bf16 input (f32 accumulate) -> slightly relaxed tol.
    assert bool(jnp.allclose(out, ref, rtol=1e-2, atol=1e-2)), (out, ref)
    print("KERNEL_OK")
</pallas_src>

<mosaic_0001>
module attributes {stable_mosaic.version = 11 : i64} {
  func.func @kernel(%arg0: memref<2x4x128xbf16, #tpu.memory_space<vmem>>, %arg1: memref<128x1312xbf16, #tpu.memory_space<vmem>>, %arg2: memref<1x1312xf32, #tpu.memory_space<vmem>>, %arg3: memref<328x41xf32, #tpu.memory_space<vmem>>, %arg4: memref<4x12x4xf32, #tpu.memory_space<vmem>>, %arg5: memref<12x1xf32, #tpu.memory_space<vmem>>, %arg6: memref<41x20xf32, #tpu.memory_space<vmem>>, %arg7: memref<4x12xf32, #tpu.memory_space<vmem>>, %arg8: memref<4x1xf32, #tpu.memory_space<vmem>>, %arg9: memref<20x1xf32, #tpu.memory_space<vmem>>, %arg10: memref<32x4xf32, #tpu.memory_space<vmem>>, %arg11: memref<32x1xf32, #tpu.memory_space<vmem>>, %arg12: memref<3x32xf32, #tpu.memory_space<vmem>>, %arg13: memref<3x1xf32, #tpu.memory_space<vmem>>, %arg14: memref<3x2xf32, #tpu.memory_space<vmem>>) attributes {dimension_semantics = [], scalar_prefetch = 0 : i64, scratch_operands = 0 : i64, tpu.core_type = #tpu.core_type<tc>} {
    %c0 = arith.constant 0 : index
    %c0_0 = arith.constant 0 : index
    %c0_1 = arith.constant 0 : index
    %0 = vector.load %arg0[%c0, %c0_0, %c0_1] : memref<2x4x128xbf16, #tpu.memory_space<vmem>>, vector<1x4x128xbf16>
    %1 = vector.shape_cast %0 : vector<1x4x128xbf16> to vector<4x128xbf16>
    %c0_2 = arith.constant 0 : index
    %c0_3 = arith.constant 0 : index
    %2 = vector.load %arg1[%c0_2, %c0_3] : memref<128x1312xbf16, #tpu.memory_space<vmem>>, vector<128x1312xbf16>
    %cst = arith.constant dense<0.000000e+00> : vector<4x1312xf32>
    %3 = tpu.matmul %1, %2, %cst {dimension_numbers = #tpu.dot_dimension_numbers<[1], [0], [0], [1], [0, 0, 1, 1], [], []>} : vector<4x128xbf16>, vector<128x1312xbf16>, vector<4x1312xf32> -> vector<4x1312xf32>
    %c0_4 = arith.constant 0 : index
    %c0_5 = arith.constant 0 : index
    %4 = vector.load %arg2[%c0_4, %c0_5] : memref<1x1312xf32, #tpu.memory_space<vmem>>, vector<1x1312xf32>
    %5 = vector.broadcast %4 : vector<1x1312xf32> to vector<4x1312xf32>
    %6 = arith.addf %3, %5 : vector<4x1312xf32>
    %cst_6 = arith.constant 0.000000e+00 : f32
    %7 = vector.broadcast %cst_6 : f32 to vector<4x1312xf32>
    %8 = arith.cmpf oge, %6, %7 : vector<4x1312xf32>
    %cst_7 = arith.constant 0.00999999977 : f32
    %9 = vector.broadcast %cst_7 : f32 to vector<4x1312xf32>
    %10 = arith.mulf %9, %6 : vector<4x1312xf32>
    %11 = arith.select %8, %6, %10 : vector<4x1312xi1>, vector<4x1312xf32>
    %cst_8 = arith.constant 0.000000e+00 : f32
    %12 = vector.broadcast %cst_8 : f32 to vector<12x41xf32>
    %13 = vector.extract_strided_slice %11 {offsets = [0, 0], sizes = [4, 328], strides = [1, 1]} : vector<4x1312xf32> to vector<4x328xf32>
    %c0_9 = arith.constant 0 : index
    %c0_10 = arith.constant 0 : index
    %14 = vector.load %arg3[%c0_9, %c0_10] : memref<328x41xf32, #tpu.memory_space<vmem>>, vector<328x41xf32>
    %cst_11 = arith.constant dense<0.000000e+00> : vector<4x41xf32>
    %15 = tpu.matmul %13, %14, %cst_11 {dimension_numbers = #tpu.dot_dimension_numbers<[1], [0], [0], [1], [0, 0, 1, 1], [], []>} : vector<4x328xf32>, vector<328x41xf32>, vector<4x41xf32> -> vector<4x41xf32>
    %c0_12 = arith.constant 0 : index
    %c0_13 = arith.constant 0 : index
    %c0_14 = arith.constant 0 : index
    %16 = vector.load %arg4[%c0_12, %c0_13, %c0_14] : memref<4x12x4xf32, #tpu.memory_space<vmem>>, vector<1x12x4xf32>
    %17 = vector.shape_cast %16 : vector<1x12x4xf32> to vector<12x4xf32>
    %cst_15 = arith.constant dense<0.000000e+00> : vector<12x41xf32>
    %18 = tpu.matmul %17, %15, %cst_15 {dimension_numbers = #tpu.dot_dimension_numbers<[1], [0], [0], [1], [0, 0, 1, 1], [], []>} : vector<12x4xf32>, vector<4x41xf32>, vector<12x41xf32> -> vector<12x41xf32>
    %19 = arith.addf %12, %18 : vector<12x41xf32>
    %20 = vector.extract_strided_slice %11 {offsets = [0, 328], sizes = [4, 328], strides = [1, 1]} : vector<4x1312xf32> to vector<4x328xf32>
    %c0_16 = arith.constant 0 : index
    %c0_17 = arith.constant 0 : index
    %21 = vector.load %arg3[%c0_16, %c0_17] : memref<328x41xf32, #tpu.memory_space<vmem>>, vector<328x41xf32>
    %cst_18 = arith.constant dense<0.000000e+00> : vector<4x41xf32>
    %22 = tpu.matmul %20, %21, %cst_18 {dimension_numbers = #tpu.dot_dimension_numbers<[1], [0], [0], [1], [0, 0, 1, 1], [], []>} : vector<4x328xf32>, vector<328x41xf32>, vector<4x41xf32> -> vector<4x41xf32>
    %c1 = arith.constant 1 : index
    %c0_19 = arith.constant 0 : index
    %c0_20 = arith.constant 0 : index
    %23 = vector.load %arg4[%c1, %c0_19, %c0_20] : memref<4x12x4xf32, #tpu.memory_space<vmem>>, vector<1x12x4xf32>
    %24 = vector.shape_cast %23 : vector<1x12x4xf32> to vector<12x4xf32>
    %cst_21 = arith.constant dense<0.000000e+00> : vector<12x41xf32>
    %25 = tpu.matmul %24, %22, %cst_21 {dimension_numbers = #tpu.dot_dimension_numbers<[1], [0], [0], [1], [0, 0, 1, 1], [], []>} : vector<12x4xf32>, vector<4x41xf32>, vector<12x41xf32> -> vector<12x41xf32>
    %26 = arith.addf %19, %25 : vector<12x41xf32>
    %27 = vector.extract_strided_slice %11 {offsets = [0, 656], sizes = [4, 328], strides = [1, 1]} : vector<4x1312xf32> to vector<4x328xf32>
    %c0_22 = arith.constant 0 : index
    %c0_23 = arith.constant 0 : index
    %28 = vector.load %arg3[%c0_22, %c0_23] : memref<328x41xf32, #tpu.memory_space<vmem>>, vector<328x41xf32>
    %cst_24 = arith.constant dense<0.000000e+00> : vector<4x41xf32>
    %29 = tpu.matmul %27, %28, %cst_24 {dimension_numbers = #tpu.dot_dimension_numbers<[1], [0], [0], [1], [0, 0, 1, 1], [], []>} : vector<4x328xf32>, vector<328x41xf32>, vector<4x41xf32> -> vector<4x41xf32>
    %c2 = arith.constant 2 : index
    %c0_25 = arith.constant 0 : index
    %c0_26 = arith.constant 0 : index
    %30 = vector.load %arg4[%c2, %c0_25, %c0_26] : memref<4x12x4xf32, #tpu.memory_space<vmem>>, vector<1x12x4xf32>
    %31 = vector.shape_cast %30 : vector<1x12x4xf32> to vector<12x4xf32>
    %cst_27 = arith.constant dense<0.000000e+00> : vector<12x41xf32>
    %32 = tpu.matmul %31, %29, %cst_27 {dimension_numbers = #tpu.dot_dimension_numbers<[1], [0], [0], [1], [0, 0, 1, 1], [], []>} : vector<12x4xf32>, vector<4x41xf32>, vector<12x41xf32> -> vector<12x41xf32>
    %33 = arith.addf %26, %32 : vector<12x41xf32>
    %34 = vector.extract_strided_slice %11 {offsets = [0, 984], sizes = [4, 328], strides = [1, 1]} : vector<4x1312xf32> to vector<4x328xf32>
    %c0_28 = arith.constant 0 : index
    %c0_29 = arith.constant 0 : index
    %35 = vector.load %arg3[%c0_28, %c0_29] : memref<328x41xf32, #tpu.memory_space<vmem>>, vector<328x41xf32>
    %cst_30 = arith.constant dense<0.000000e+00> : vector<4x41xf32>
    %36 = tpu.matmul %34, %35, %cst_30 {dimension_numbers = #tpu.dot_dimension_numbers<[1], [0], [0], [1], [0, 0, 1, 1], [], []>} : vector<4x328xf32>, vector<328x41xf32>, vector<4x41xf32> -> vector<4x41xf32>
    %c3 = arith.constant 3 : index
    %c0_31 = arith.constant 0 : index
    %c0_32 = arith.constant 0 : index
    %37 = vector.load %arg4[%c3, %c0_31, %c0_32] : memref<4x12x4xf32, #tpu.memory_space<vmem>>, vector<1x12x4xf32>
    %38 = vector.shape_cast %37 : vector<1x12x4xf32> to vector<12x4xf32>
    %cst_33 = arith.constant dense<0.000000e+00> : vector<12x41xf32>
    %39 = tpu.matmul %38, %36, %cst_33 {dimension_numbers = #tpu.dot_dimension_numbers<[1], [0], [0], [1], [0, 0, 1, 1], [], []>} : vector<12x4xf32>, vector<4x41xf32>, vector<12x41xf32> -> vector<12x41xf32>
    %40 = arith.addf %33, %39 : vector<12x41xf32>
    %c0_34 = arith.constant 0 : index
    %c0_35 = arith.constant 0 : index
    %41 = vector.load %arg5[%c0_34, %c0_35] : memref<12x1xf32, #tpu.memory_space<vmem>>, vector<12x1xf32>
    %42 = vector.broadcast %41 : vector<12x1xf32> to vector<12x41xf32>
    %43 = arith.addf %40, %42 : vector<12x41xf32>
    %cst_36 = arith.constant 0.000000e+00 : f32
    %44 = vector.broadcast %cst_36 : f32 to vector<12x41xf32>
    %45 = arith.cmpf oge, %43, %44 : vector<12x41xf32>
    %cst_37 = arith.constant 0.00999999977 : f32
    %46 = vector.broadcast %cst_37 : f32 to vector<12x41xf32>
    %47 = arith.mulf %46, %43 : vector<12x41xf32>
    %48 = arith.select %45, %43, %47 : vector<12x41xi1>, vector<12x41xf32>
    %c0_38 = arith.constant 0 : index
    %c0_39 = arith.constant 0 : index
    %49 = vector.load %arg6[%c0_38, %c0_39] : memref<41x20xf32, #tpu.memory_space<vmem>>, vector<41x20xf32>
    %cst_40 = arith.constant dense<0.000000e+00> : vector<12x20xf32>
    %50 = tpu.matmul %48, %49, %cst_40 {dimension_numbers = #tpu.dot_dimension_numbers<[1], [0], [0], [1], [0, 0, 1, 1], [], []>} : vector<12x41xf32>, vector<41x20xf32>, vector<12x20xf32> -> vector<12x20xf32>
    %c0_41 = arith.constant 0 : index
    %c0_42 = arith.constant 0 : index
    %51 = vector.load %arg7[%c0_41, %c0_42] : memref<4x12xf32, #tpu.memory_space<vmem>>, vector<4x12xf32>
    %cst_43 = arith.constant dense<0.000000e+00> : vector<4x20xf32>
    %52 = tpu.matmul %51, %50, %cst_43 {dimension_numbers = #tpu.dot_dimension_numbers<[1], [0], [0], [1], [0, 0, 1, 1], [], []>} : vector<4x12xf32>, vector<12x20xf32>, vector<4x20xf32> -> vector<4x20xf32>
    %c0_44 = arith.constant 0 : index
    %c0_45 = arith.constant 0 : index
    %53 = vector.load %arg8[%c0_44, %c0_45] : memref<4x1xf32, #tpu.memory_space<vmem>>, vector<4x1xf32>
    %54 = vector.broadcast %53 : vector<4x1xf32> to vector<4x20xf32>
    %55 = arith.addf %52, %54 : vector<4x20xf32>
    %cst_46 = arith.constant 0.000000e+00 : f32
    %56 = vector.broadcast %cst_46 : f32 to vector<4x20xf32>
    %57 = arith.cmpf oge, %55, %56 : vector<4x20xf32>
    %cst_47 = arith.constant 0.00999999977 : f32
    %58 = vector.broadcast %cst_47 : f32 to vector<4x20xf32>
    %59 = arith.mulf %58, %55 : vector<4x20xf32>
    %60 = arith.select %57, %55, %59 : vector<4x20xi1>, vector<4x20xf32>
    %c0_48 = arith.constant 0 : index
    %c0_49 = arith.constant 0 : index
    %61 = vector.load %arg9[%c0_48, %c0_49] : memref<20x1xf32, #tpu.memory_space<vmem>>, vector<20x1xf32>
    %cst_50 = arith.constant dense<0.000000e+00> : vector<4x1xf32>
    %62 = tpu.matmul %60, %61, %cst_50 {dimension_numbers = #tpu.dot_dimension_numbers<[1], [0], [0], [1], [0, 0, 1, 1], [], []>} : vector<4x20xf32>, vector<20x1xf32>, vector<4x1xf32> -> vector<4x1xf32>
    %c0_51 = arith.constant 0 : index
    %c0_52 = arith.constant 0 : index
    %63 = vector.load %arg10[%c0_51, %c0_52] : memref<32x4xf32, #tpu.memory_space<vmem>>, vector<32x4xf32>
    %cst_53 = arith.constant dense<0.000000e+00> : vector<32x1xf32>
    %64 = tpu.matmul %63, %62, %cst_53 {dimension_numbers = #tpu.dot_dimension_numbers<[1], [0], [0], [1], [0, 0, 1, 1], [], []>} : vector<32x4xf32>, vector<4x1xf32>, vector<32x1xf32> -> vector<32x1xf32>
    %c0_54 = arith.constant 0 : index
    %c0_55 = arith.constant 0 : index
    %65 = vector.load %arg11[%c0_54, %c0_55] : memref<32x1xf32, #tpu.memory_space<vmem>>, vector<32x1xf32>
    %66 = arith.addf %64, %65 : vector<32x1xf32>
    %cst_56 = arith.constant 0.000000e+00 : f32
    %67 = vector.broadcast %cst_56 : f32 to vector<32x1xf32>
    %68 = arith.maximumf %66, %67 : vector<32x1xf32>
    %c0_57 = arith.constant 0 : index
    %c0_58 = arith.constant 0 : index
    %69 = vector.load %arg12[%c0_57, %c0_58] : memref<3x32xf32, #tpu.memory_space<vmem>>, vector<3x32xf32>
    %cst_59 = arith.constant dense<0.000000e+00> : vector<3x1xf32>
    %70 = tpu.matmul %69, %68, %cst_59 {dimension_numbers = #tpu.dot_dimension_numbers<[1], [0], [0], [1], [0, 0, 1, 1], [], []>} : vector<3x32xf32>, vector<32x1xf32>, vector<3x1xf32> -> vector<3x1xf32>
    %c0_60 = arith.constant 0 : index
    %c0_61 = arith.constant 0 : index
    %71 = vector.load %arg13[%c0_60, %c0_61] : memref<3x1xf32, #tpu.memory_space<vmem>>, vector<3x1xf32>
    %72 = arith.addf %70, %71 : vector<3x1xf32>
    %c0_62 = arith.constant 0 : index
    %c0_63 = arith.constant 0 : index
    %73 = vector.load %arg14[%c0_62, %c0_63] : memref<3x2xf32, #tpu.memory_space<vmem>>, vector<3x1xf32>
    tpu.vector_store %arg14[%c0_62, %c0_63], %72 {strides = array<i32>} : memref<3x2xf32, #tpu.memory_space<vmem>>, vector<3x1xf32>,
    %c1_64 = arith.constant 1 : index
    %c0_65 = arith.constant 0 : index
    %c0_66 = arith.constant 0 : index
    %74 = vector.load %arg0[%c1_64, %c0_65, %c0_66] : memref<2x4x128xbf16, #tpu.memory_space<vmem>>, vector<1x4x128xbf16>
    %75 = vector.shape_cast %74 : vector<1x4x128xbf16> to vector<4x128xbf16>
    %c0_67 = arith.constant 0 : index
    %c0_68 = arith.constant 0 : index
    %76 = vector.load %arg1[%c0_67, %c0_68] : memref<128x1312xbf16, #tpu.memory_space<vmem>>, vector<128x1312xbf16>
    %cst_69 = arith.constant dense<0.000000e+00> : vector<4x1312xf32>
    %77 = tpu.matmul %75, %76, %cst_69 {dimension_numbers = #tpu.dot_dimension_numbers<[1], [0], [0], [1], [0, 0, 1, 1], [], []>} : vector<4x128xbf16>, vector<128x1312xbf16>, vector<4x1312xf32> -> vector<4x1312xf32>
    %c0_70 = arith.constant 0 : index
    %c0_71 = arith.constant 0 : index
    %78 = vector.load %arg2[%c0_70, %c0_71] : memref<1x1312xf32, #tpu.memory_space<vmem>>, vector<1x1312xf32>
    %79 = vector.broadcast %78 : vector<1x1312xf32> to vector<4x1312xf32>
    %80 = arith.addf %77, %79 : vector<4x1312xf32>
    %cst_72 = arith.constant 0.000000e+00 : f32
    %81 = vector.broadcast %cst_72 : f32 to vector<4x1312xf32>
    %82 = arith.cmpf oge, %80, %81 : vector<4x1312xf32>
    %cst_73 = arith.constant 0.00999999977 : f32
    %83 = vector.broadcast %cst_73 : f32 to vector<4x1312xf32>
    %84 = arith.mulf %83, %80 : vector<4x1312xf32>
    %85 = arith.select %82, %80, %84 : vector<4x1312xi1>, vector<4x1312xf32>
    %cst_74 = arith.constant 0.000000e+00 : f32
    %86 = vector.broadcast %cst_74 : f32 to vector<12x41xf32>
    %87 = vector.extract_strided_slice %85 {offsets = [0, 0], sizes = [4, 328], strides = [1, 1]} : vector<4x1312xf32> to vector<4x328xf32>
    %c0_75 = arith.constant 0 : index
    %c0_76 = arith.constant 0 : index
    %88 = vector.load %arg3[%c0_75, %c0_76] : memref<328x41xf32, #tpu.memory_space<vmem>>, vector<328x41xf32>
    %cst_77 = arith.constant dense<0.000000e+00> : vector<4x41xf32>
    %89 = tpu.matmul %87, %88, %cst_77 {dimension_numbers = #tpu.dot_dimension_numbers<[1], [0], [0], [1], [0, 0, 1, 1], [], []>} : vector<4x328xf32>, vector<328x41xf32>, vector<4x41xf32> -> vector<4x41xf32>
    %c0_78 = arith.constant 0 : index
    %c0_79 = arith.constant 0 : index
    %c0_80 = arith.constant 0 : index
    %90 = vector.load %arg4[%c0_78, %c0_79, %c0_80] : memref<4x12x4xf32, #tpu.memory_space<vmem>>, vector<1x12x4xf32>
    %91 = vector.shape_cast %90 : vector<1x12x4xf32> to vector<12x4xf32>
    %cst_81 = arith.constant dense<0.000000e+00> : vector<12x41xf32>
    %92 = tpu.matmul %91, %89, %cst_81 {dimension_numbers = #tpu.dot_dimension_numbers<[1], [0], [0], [1], [0, 0, 1, 1], [], []>} : vector<12x4xf32>, vector<4x41xf32>, vector<12x41xf32> -> vector<12x41xf32>
    %93 = arith.addf %86, %92 : vector<12x41xf32>
    %94 = vector.extract_strided_slice %85 {offsets = [0, 328], sizes = [4, 328], strides = [1, 1]} : vector<4x1312xf32> to vector<4x328xf32>
    %c0_82 = arith.constant 0 : index
    %c0_83 = arith.constant 0 : index
    %95 = vector.load %arg3[%c0_82, %c0_83] : memref<328x41xf32, #tpu.memory_space<vmem>>, vector<328x41xf32>
    %cst_84 = arith.constant dense<0.000000e+00> : vector<4x41xf32>
    %96 = tpu.matmul %94, %95, %cst_84 {dimension_numbers = #tpu.dot_dimension_numbers<[1], [0], [0], [1], [0, 0, 1, 1], [], []>} : vector<4x328xf32>, vector<328x41xf32>, vector<4x41xf32> -> vector<4x41xf32>
    %c1_85 = arith.constant 1 : index
    %c0_86 = arith.constant 0 : index
    %c0_87 = arith.constant 0 : index
    %97 = vector.load %arg4[%c1_85, %c0_86, %c0_87] : memref<4x12x4xf32, #tpu.memory_space<vmem>>, vector<1x12x4xf32>
    %98 = vector.shape_cast %97 : vector<1x12x4xf32> to vector<12x4xf32>
    %cst_88 = arith.constant dense<0.000000e+00> : vector<12x41xf32>
    %99 = tpu.matmul %98, %96, %cst_88 {dimension_numbers = #tpu.dot_dimension_numbers<[1], [0], [0], [1], [0, 0, 1, 1], [], []>} : vector<12x4xf32>, vector<4x41xf32>, vector<12x41xf32> -> vector<12x41xf32>
    %100 = arith.addf %93, %99 : vector<12x41xf32>
    %101 = vector.extract_strided_slice %85 {offsets = [0, 656], sizes = [4, 328], strides = [1, 1]} : vector<4x1312xf32> to vector<4x328xf32>
    %c0_89 = arith.constant 0 : index
    %c0_90 = arith.constant 0 : index
    %102 = vector.load %arg3[%c0_89, %c0_90] : memref<328x41xf32, #tpu.memory_space<vmem>>, vector<328x41xf32>
    %cst_91 = arith.constant dense<0.000000e+00> : vector<4x41xf32>
    %103 = tpu.matmul %101, %102, %cst_91 {dimension_numbers = #tpu.dot_dimension_numbers<[1], [0], [0], [1], [0, 0, 1, 1], [], []>} : vector<4x328xf32>, vector<328x41xf32>, vector<4x41xf32> -> vector<4x41xf32>
    %c2_92 = arith.constant 2 : index
    %c0_93 = arith.constant 0 : index
    %c0_94 = arith.constant 0 : index
    %104 = vector.load %arg4[%c2_92, %c0_93, %c0_94] : memref<4x12x4xf32, #tpu.memory_space<vmem>>, vector<1x12x4xf32>
    %105 = vector.shape_cast %104 : vector<1x12x4xf32> to vector<12x4xf32>
    %cst_95 = arith.constant dense<0.000000e+00> : vector<12x41xf32>
    %106 = tpu.matmul %105, %103, %cst_95 {dimension_numbers = #tpu.dot_dimension_numbers<[1], [0], [0], [1], [0, 0, 1, 1], [], []>} : vector<12x4xf32>, vector<4x41xf32>, vector<12x41xf32> -> vector<12x41xf32>
    %107 = arith.addf %100, %106 : vector<12x41xf32>
    %108 = vector.extract_strided_slice %85 {offsets = [0, 984], sizes = [4, 328], strides = [1, 1]} : vector<4x1312xf32> to vector<4x328xf32>
    %c0_96 = arith.constant 0 : index
    %c0_97 = arith.constant 0 : index
    %109 = vector.load %arg3[%c0_96, %c0_97] : memref<328x41xf32, #tpu.memory_space<vmem>>, vector<328x41xf32>
    %cst_98 = arith.constant dense<0.000000e+00> : vector<4x41xf32>
    %110 = tpu.matmul %108, %109, %cst_98 {dimension_numbers = #tpu.dot_dimension_numbers<[1], [0], [0], [1], [0, 0, 1, 1], [], []>} : vector<4x328xf32>, vector<328x41xf32>, vector<4x41xf32> -> vector<4x41xf32>
    %c3_99 = arith.constant 3 : index
    %c0_100 = arith.constant 0 : index
    %c0_101 = arith.constant 0 : index
    %111 = vector.load %arg4[%c3_99, %c0_100, %c0_101] : memref<4x12x4xf32, #tpu.memory_space<vmem>>, vector<1x12x4xf32>
    %112 = vector.shape_cast %111 : vector<1x12x4xf32> to vector<12x4xf32>
    %cst_102 = arith.constant dense<0.000000e+00> : vector<12x41xf32>
    %113 = tpu.matmul %112, %110, %cst_102 {dimension_numbers = #tpu.dot_dimension_numbers<[1], [0], [0], [1], [0, 0, 1, 1], [], []>} : vector<12x4xf32>, vector<4x41xf32>, vector<12x41xf32> -> vector<12x41xf32>
    %114 = arith.addf %107, %113 : vector<12x41xf32>
    %c0_103 = arith.constant 0 : index
    %c0_104 = arith.constant 0 : index
    %115 = vector.load %arg5[%c0_103, %c0_104] : memref<12x1xf32, #tpu.memory_space<vmem>>, vector<12x1xf32>
    %116 = vector.broadcast %115 : vector<12x1xf32> to vector<12x41xf32>
    %117 = arith.addf %114, %116 : vector<12x41xf32>
    %cst_105 = arith.constant 0.000000e+00 : f32
    %118 = vector.broadcast %cst_105 : f32 to vector<12x41xf32>
    %119 = arith.cmpf oge, %117, %118 : vector<12x41xf32>
    %cst_106 = arith.constant 0.00999999977 : f32
    %120 = vector.broadcast %cst_106 : f32 to vector<12x41xf32>
    %121 = arith.mulf %120, %117 : vector<12x41xf32>
    %122 = arith.select %119, %117, %121 : vector<12x41xi1>, vector<12x41xf32>
    %c0_107 = arith.constant 0 : index
    %c0_108 = arith.constant 0 : index
    %123 = vector.load %arg6[%c0_107, %c0_108] : memref<41x20xf32, #tpu.memory_space<vmem>>, vector<41x20xf32>
    %cst_109 = arith.constant dense<0.000000e+00> : vector<12x20xf32>
    %124 = tpu.matmul %122, %123, %cst_109 {dimension_numbers = #tpu.dot_dimension_numbers<[1], [0], [0], [1], [0, 0, 1, 1], [], []>} : vector<12x41xf32>, vector<41x20xf32>, vector<12x20xf32> -> vector<12x20xf32>
    %c0_110 = arith.constant 0 : index
    %c0_111 = arith.constant 0 : index
    %125 = vector.load %arg7[%c0_110, %c0_111] : memref<4x12xf32, #tpu.memory_space<vmem>>, vector<4x12xf32>
    %cst_112 = arith.constant dense<0.000000e+00> : vector<4x20xf32>
    %126 = tpu.matmul %125, %124, %cst_112 {dimension_numbers = #tpu.dot_dimension_numbers<[1], [0], [0], [1], [0, 0, 1, 1], [], []>} : vector<4x12xf32>, vector<12x20xf32>, vector<4x20xf32> -> vector<4x20xf32>
    %c0_113 = arith.constant 0 : index
    %c0_114 = arith.constant 0 : index
    %127 = vector.load %arg8[%c0_113, %c0_114] : memref<4x1xf32, #tpu.memory_space<vmem>>, vector<4x1xf32>
    %128 = vector.broadcast %127 : vector<4x1xf32> to vector<4x20xf32>
    %129 = arith.addf %126, %128 : vector<4x20xf32>
    %cst_115 = arith.constant 0.000000e+00 : f32
    %130 = vector.broadcast %cst_115 : f32 to vector<4x20xf32>
    %131 = arith.cmpf oge, %129, %130 : vector<4x20xf32>
    %cst_116 = arith.constant 0.00999999977 : f32
    %132 = vector.broadcast %cst_116 : f32 to vector<4x20xf32>
    %133 = arith.mulf %132, %129 : vector<4x20xf32>
    %134 = arith.select %131, %129, %133 : vector<4x20xi1>, vector<4x20xf32>
    %c0_117 = arith.constant 0 : index
    %c0_118 = arith.constant 0 : index
    %135 = vector.load %arg9[%c0_117, %c0_118] : memref<20x1xf32, #tpu.memory_space<vmem>>, vector<20x1xf32>
    %cst_119 = arith.constant dense<0.000000e+00> : vector<4x1xf32>
    %136 = tpu.matmul %134, %135, %cst_119 {dimension_numbers = #tpu.dot_dimension_numbers<[1], [0], [0], [1], [0, 0, 1, 1], [], []>} : vector<4x20xf32>, vector<20x1xf32>, vector<4x1xf32> -> vector<4x1xf32>
    %c0_120 = arith.constant 0 : index
    %c0_121 = arith.constant 0 : index
    %137 = vector.load %arg10[%c0_120, %c0_121] : memref<32x4xf32, #tpu.memory_space<vmem>>, vector<32x4xf32>
    %cst_122 = arith.constant dense<0.000000e+00> : vector<32x1xf32>
    %138 = tpu.matmul %137, %136, %cst_122 {dimension_numbers = #tpu.dot_dimension_numbers<[1], [0], [0], [1], [0, 0, 1, 1], [], []>} : vector<32x4xf32>, vector<4x1xf32>, vector<32x1xf32> -> vector<32x1xf32>
    %c0_123 = arith.constant 0 : index
    %c0_124 = arith.constant 0 : index
    %139 = vector.load %arg11[%c0_123, %c0_124] : memref<32x1xf32, #tpu.memory_space<vmem>>, vector<32x1xf32>
    %140 = arith.addf %138, %139 : vector<32x1xf32>
    %cst_125 = arith.constant 0.000000e+00 : f32
    %141 = vector.broadcast %cst_125 : f32 to vector<32x1xf32>
    %142 = arith.maximumf %140, %141 : vector<32x1xf32>
    %c0_126 = arith.constant 0 : index
    %c0_127 = arith.constant 0 : index
    %143 = vector.load %arg12[%c0_126, %c0_127] : memref<3x32xf32, #tpu.memory_space<vmem>>, vector<3x32xf32>
    %cst_128 = arith.constant dense<0.000000e+00> : vector<3x1xf32>
    %144 = tpu.matmul %143, %142, %cst_128 {dimension_numbers = #tpu.dot_dimension_numbers<[1], [0], [0], [1], [0, 0, 1, 1], [], []>} : vector<3x32xf32>, vector<32x1xf32>, vector<3x1xf32> -> vector<3x1xf32>
    %c0_129 = arith.constant 0 : index
    %c0_130 = arith.constant 0 : index
    %145 = vector.load %arg13[%c0_129, %c0_130] : memref<3x1xf32, #tpu.memory_space<vmem>>, vector<3x1xf32>
    %146 = arith.addf %144, %145 : vector<3x1xf32>
    %c0_131 = arith.constant 0 : index
    %c1_132 = arith.constant 1 : index
    %147 = vector.load %arg14[%c0_131, %c1_132] : memref<3x2xf32, #tpu.memory_space<vmem>>, vector<3x1xf32>
    tpu.vector_store %arg14[%c0_131, %c1_132], %146 {strides = array<i32>} : memref<3x2xf32, #tpu.memory_space<vmem>>, vector<3x1xf32>,
    return
  }
}

</mosaic_0001>

<bundles_post_ra>
// kernel: forward.1
= control target key start
LH: loop header
LB: loop body
LE: loop exit
PB: predicated region body
PF: predicated region fallthrough
CT: control target
= control target key end

     0   :  { %vm835_vm3 = vcmask 588800   ;;  %s3908_s19 = smov 56   ;;  %s3909_s20 = smov 112   ;;  %vm912_vm12 = vcmask 457728   ;;  %vm990_vm13 = vcmask 1043456   ;;  %vm983_vm14 = vcmask 31744   ;;  %s6163_s1 = inlined_call_operand.vmem [shape: bf16[128,1312], index: 1, kind: input, shape index: {}]   ;;  %s6164_s0 = inlined_call_operand.vmem [shape: bf16[2,4,128], index: 0, kind: input, shape index: {}]   ;;  %s6165_s3 = inlined_call_operand.vmem [shape: f32[328,41], index: 3, kind: input, shape index: {}]   ;;  %s6166_s2 = inlined_call_operand.vmem [shape: f32[1,1312], index: 2, kind: input, shape index: {}]   ;;  %s6167_s4 = inlined_call_operand.vmem [shape: f32[4,12,4], index: 4, kind: input, shape index: {}]   ;;  %s6168_s5 = inlined_call_operand.vmem [shape: f32[12,1], index: 5, kind: input, shape index: {}]   ;;  %s6169_s6 = inlined_call_operand.vmem [shape: f32[41,20], index: 6, kind: input, shape index: {}]   ;;  %s6170_s8 = inlined_call_operand.vmem [shape: f32[4,1], index: 8, kind: input, shape index: {}]   ;;  %s6171_s7 = inlined_call_operand.vmem [shape: f32[4,12], index: 7, kind: input, shape index: {}]   ;;  %s6172_s9 = inlined_call_operand.vmem [shape: f32[20,1], index: 9, kind: input, shape index: {}]   ;;  %s6173_s10 = inlined_call_operand.vmem [shape: f32[32,4], index: 10, kind: input, shape index: {}]   ;;  %s6174_s11 = inlined_call_operand.vmem [shape: f32[32,1], index: 11, kind: input, shape index: {}]   ;;  %s6175_s12 = inlined_call_operand.vmem [shape: f32[3,32], index: 12, kind: input, shape index: {}]   ;;  %s6176_s13 = inlined_call_operand.vmem [shape: f32[3,1], index: 13, kind: input, shape index: {}]   ;;  %s6177_s14 = inlined_call_operand.vmem [shape: f32[3,2], index: 14, kind: output, shape index: {}]  }
   0x1   :  { %v3234_v0 = vld [vmem:[%s6163_s1 + $0x268] sm:$0xf]  ;;  %v3781_v1 = vld [vmem:[%s6163_s1 + $0x290] sm:$0xf0]  ;;  %v3776_v2 = vld [vmem:[%s6163_s1 + $0x26c] sm:$0xf] }
   0x2   :  { %v3235_v3 = vor.u32 %v3781_v1, %v3234_v0  ;;  %v3236_v4 = vld [vmem:[%s6163_s1 + $0x294] sm:$0xf0]  ;;  %v3242_v5 = vld [vmem:[%s6163_s1 + $0x270] sm:$0xf]  ;;  %v3782_v6 = vld [vmem:[%s6163_s1 + $0x298] sm:$0xf0] }
   0x3   :  { %v3239_v7 = vor.u32 %v3776_v2, %v3236_v4  ;;  %v3243_v8 = vor.u32 %v3782_v6, %v3242_v5  ;;  %v3777_v9 = vld [vmem:[%s6163_s1 + $0x274] sm:$0xf]  ;;  %v3244_v10 = vld [vmem:[%s6163_s1 + $0x29c] sm:$0xf0]  ;;  %v3190_v11 = vld [vmem:[%s6163_s1 + $0x210] sm:$0xf] }
   0x4   :  { %618 = vmatpush.bf16.msra.mxu0 %v3235_v3  ;;  %v3247_v12 = vor.u32 %v3777_v9, %v3244_v10  ;;  %v3770_v13 = vld [vmem:[%s6163_s1 + $0x238] sm:$0xf0]  ;;  %v3765_v14 = vld [vmem:[%s6163_s1 + $0x214] sm:$0xf]  ;;  %v3192_v15 = vld [vmem:[%s6163_s1 + $0x23c] sm:$0xf0] }
   0x5   :  { %631 = vmatpush.bf16.msra.mxu1 %v3239_v7  ;;  %644 = vmatpush.bf16.msra.mxu2 %v3243_v8  ;;  %v3191_v16 = vor.u32 %v3770_v13, %v3190_v11  ;;  %v3195_v17 = vor.u32 %v3765_v14, %v3192_v15  ;;  %v3198_v18 = vld [vmem:[%s6163_s1 + $0x218] sm:$0xf]  ;;  %v3771_v19 = vld [vmem:[%s6163_s1 + $0x240] sm:$0xf0]  ;;  %v3766_v20 = vld [vmem:[%s6163_s1 + $0x21c] sm:$0xf] }
   0x6   :  { %657 = vmatpush.bf16.msra.mxu3 %v3247_v12  ;;  %v3199_v21 = vor.u32 %v3771_v19, %v3198_v18  ;;  %v3200_v22 = vld [vmem:[%s6163_s1 + $0x244] sm:$0xf0]  ;;  %v3146_v23 = vld [vmem:[%s6163_s1 + $0x1b8] sm:$0xf]  ;;  %v3759_v24 = vld [vmem:[%s6163_s1 + $0x1e0] sm:$0xf0] }
   0x7   :  { %v3203_v25 = vor.u32 %v3766_v20, %v3200_v22  ;;  %v3754_v26 = vld [vmem:[%s6163_s1 + $0x1bc] sm:$0xf]  ;;  %v3148_v27 = vld [vmem:[%s6163_s1 + $0x1e4] sm:$0xf0]  ;;  %v3154_v28 = vld [vmem:[%s6163_s1 + $0x1c0] sm:$0xf]  ;;  %v3147_v29 = vor.u32 %v3759_v24, %v3146_v23 }
   0x8   :  { %619 = vmatpush.bf16.msra.mxu0 %v3191_v16  ;;  %v3760_v30 = vld [vmem:[%s6163_s1 + $0x1e8] sm:$0xf0]  ;;  %v3755_v31 = vld [vmem:[%s6163_s1 + $0x1c4] sm:$0xf]  ;;  %v3156_v32 = vld [vmem:[%s6163_s1 + $0x1ec] sm:$0xf0]  ;;  %v3151_v33 = vor.u32 %v3754_v26, %v3148_v27 }
   0x9   :  { %632 = vmatpush.bf16.msra.mxu1 %v3195_v17  ;;  %645 = vmatpush.bf16.msra.mxu2 %v3199_v21  ;;  %v3155_v34 = vor.u32 %v3760_v30, %v3154_v28  ;;  %v3102_v35 = vld [vmem:[%s6163_s1 + $0x160] sm:$0xf]  ;;  %v3748_v36 = vld [vmem:[%s6163_s1 + $0x188] sm:$0xf0]  ;;  %v3743_v37 = vld [vmem:[%s6163_s1 + $0x164] sm:$0xf]  ;;  %v3159_v38 = vor.u32 %v3755_v31, %v3156_v32 }
   0xa   :  { %658 = vmatpush.bf16.msra.mxu3 %v3203_v25  ;;  %v3104_v39 = vld [vmem:[%s6163_s1 + $0x18c] sm:$0xf0]  ;;  %v3110_v40 = vld [vmem:[%s6163_s1 + $0x168] sm:$0xf]  ;;  %v3749_v41 = vld [vmem:[%s6163_s1 + $0x190] sm:$0xf0]  ;;  %v3103_v44 = vor.u32 %v3748_v36, %v3102_v35 }
   0xb   :  { %v3744_v42 = vld [vmem:[%s6163_s1 + $0x16c] sm:$0xf]  ;;  %v3112_v43 = vld [vmem:[%s6163_s1 + $0x194] sm:$0xf0]  ;;  %v3107_v45 = vor.u32 %v3743_v37, %v3104_v39  ;;  %v3111_v46 = vor.u32 %v3749_v41, %v3110_v40  ;;  %v3058_v47 = vld [vmem:[%s6163_s1 + $0x108] sm:$0xf] }
   0xc   :  { %620 = vmatpush.bf16.msra.mxu0 %v3147_v29  ;;  %v3737_v48 = vld [vmem:[%s6163_s1 + $0x130] sm:$0xf0]  ;;  %v3732_v49 = vld [vmem:[%s6163_s1 + $0x10c] sm:$0xf]  ;;  %v3115_v50 = vor.u32 %v3744_v42, %v3112_v43  ;;  %v3060_v51 = vld [vmem:[%s6163_s1 + $0x134] sm:$0xf0] }
   0xd   :  { %633 = vmatpush.bf16.msra.mxu1 %v3151_v33  ;;  %646 = vmatpush.bf16.msra.mxu2 %v3155_v34  ;;  %v3066_v52 = vld [vmem:[%s6163_s1 + $0x110] sm:$0xf]  ;;  %v3738_v53 = vld [vmem:[%s6163_s1 + $0x138] sm:$0xf0]  ;;  %v3733_v54 = vld [vmem:[%s6163_s1 + $0x114] sm:$0xf]  ;;  %v3059_v56 = vor.u32 %v3737_v48, %v3058_v47  ;;  %v3063_v57 = vor.u32 %v3732_v49, %v3060_v51 }
   0xe   :  { %659 = vmatpush.bf16.msra.mxu3 %v3159_v38  ;;  %v3068_v55 = vld [vmem:[%s6163_s1 + $0x13c] sm:$0xf0]  ;;  %v3067_v58 = vor.u32 %v3738_v53, %v3066_v52  ;;  %v3014_v59 = vld [vmem:[%s6163_s1 + $0xb0] sm:$0xf]  ;;  %v3726_v60 = vld [vmem:[%s6163_s1 + $0xd8] sm:$0xf0] }
   0xf   :  { %v3721_v61 = vld [vmem:[%s6163_s1 + $0xb4] sm:$0xf]  ;;  %v3071_v62 = vor.u32 %v3733_v54, %v3068_v55  ;;  %v3016_v63 = vld [vmem:[%s6163_s1 + $0xdc] sm:$0xf0]  ;;  %v3022_v0 = vld [vmem:[%s6163_s1 + $0xb8] sm:$0xf]  ;;  %v3015_v4 = vor.u32 %v3726_v60, %v3014_v59 }
  0x10   :  { %621 = vmatpush.bf16.msra.mxu0 %v3103_v44  ;;  %v3727_v1 = vld [vmem:[%s6163_s1 + $0xe0] sm:$0xf0]  ;;  %v3722_v2 = vld [vmem:[%s6163_s1 + $0xbc] sm:$0xf]  ;;  %v3024_v3 = vld [vmem:[%s6163_s1 + $0xe4] sm:$0xf0]  ;;  %v3019_v5 = vor.u32 %v3721_v61, %v3016_v63 }
  0x11   :  { %634 = vmatpush.bf16.msra.mxu1 %v3107_v45  ;;  %647 = vmatpush.bf16.msra.mxu2 %v3111_v46  ;;  %v3023_v6 = vor.u32 %v3727_v1, %v3022_v0  ;;  %v2970_v7 = vld [vmem:[%s6163_s1 + $0x58] sm:$0xf]  ;;  %v3715_v8 = vld [vmem:[%s6163_s1 + $0x80] sm:$0xf0]  ;;  %v3710_v9 = vld [vmem:[%s6163_s1 + $0x5c] sm:$0xf]  ;;  %v3027_v10 = vor.u32 %v3722_v2, %v3024_v3 }
  0x12   :  { %660 = vmatpush.bf16.msra.mxu3 %v3115_v50  ;;  %v2972_v11 = vld [vmem:[%s6163_s1 + $0x84] sm:$0xf0]  ;;  %v2978_v12 = vld [vmem:[%s6163_s1 + $0x60] sm:$0xf]  ;;  %v3716_v13 = vld [vmem:[%s6163_s1 + $0x88] sm:$0xf0]  ;;  %v2971_v16 = vor.u32 %v3715_v8, %v2970_v7 }
  0x13   :  { %v3711_v14 = vld [vmem:[%s6163_s1 + $0x64] sm:$0xf]  ;;  %v2980_v15 = vld [vmem:[%s6163_s1 + $0x8c] sm:$0xf0]  ;;  %v2926_v17 = vld [vmem:[%s6163_s1] sm:$0xf]  ;;  %v2975_v19 = vor.u32 %v3710_v9, %v2972_v11  ;;  %v2979_v20 = vor.u32 %v3716_v13, %v2978_v12 }
  0x14   :  { %622 = vmatpush.bf16.msra.mxu0 %v3059_v56  ;;  %v3704_v18 = vld [vmem:[%s6163_s1 + $0x28] sm:$0xf0]  ;;  %v3699_v21 = vld [vmem:[%s6163_s1 + $0x4] sm:$0xf]  ;;  %v2928_v22 = vld [vmem:[%s6163_s1 + $0x2c] sm:$0xf0]  ;;  %v2983_v24 = vor.u32 %v3711_v14, %v2980_v15 }
  0x15   :  { %635 = vmatpush.bf16.msra.mxu1 %v3063_v57  ;;  %648 = vmatpush.bf16.msra.mxu2 %v3067_v58  ;;  %v2934_v23 = vld [vmem:[%s6163_s1 + $0x8] sm:$0xf]  ;;  %v3705_v25 = vld [vmem:[%s6163_s1 + $0x30] sm:$0xf0]  ;;  %v3700_v26 = vld [vmem:[%s6163_s1 + $0xc] sm:$0xf]  ;;  %v2927_v31 = vor.u32 %v3704_v18, %v2926_v17  ;;  %v2931_v35 = vor.u32 %v3699_v21, %v2928_v22 }
  0x16   :  { %661 = vmatpush.bf16.msra.mxu3 %v3071_v62  ;;  %v2936_v27 = vld [vmem:[%s6163_s1 + $0x34] sm:$0xf0]  ;;  %v3783_v29 = vld [vmem:[%s6163_s1 + $0x2a0] sm:$0xf0]  ;;  %v3778_v30 = vld [vmem:[%s6163_s1 + $0x27c] sm:$0xf]  ;;  %v2935_v36 = vor.u32 %v3705_v25, %v2934_v23 }
  0x17   :  { %v3250_v28 = vld [vmem:[%s6163_s1 + $0x278] sm:$0xf]  ;;  %v3252_v32 = vld [vmem:[%s6163_s1 + $0x2a4] sm:$0xf0]  ;;  %v3258_v33 = vld [vmem:[%s6163_s1 + $0x280] sm:$0xf]  ;;  %v2939_v37 = vor.u32 %v3700_v26, %v2936_v27 }
  0x18   :  { %623 = vmatpush.bf16.msra.mxu0 %v3015_v4  ;;  %v3784_v34 = vld [vmem:[%s6163_s1 + $0x2a8] sm:$0xf0]  ;;  %v3251_v38 = vor.u32 %v3783_v29, %v3250_v28  ;;  %v3255_v39 = vor.u32 %v3778_v30, %v3252_v32  ;;  %v3206_v41 = vld [vmem:[%s6163_s1 + $0x220] sm:$0xf]  ;;  %v3767_v43 = vld [vmem:[%s6163_s1 + $0x224] sm:$0xf] }
  0x19   :  { %636 = vmatpush.bf16.msra.mxu1 %v3019_v5  ;;  %649 = vmatpush.bf16.msra.mxu2 %v3023_v6  ;;  %v3259_v40 = vor.u32 %v3784_v34, %v3258_v33  ;;  %v3772_v42 = vld [vmem:[%s6163_s1 + $0x248] sm:$0xf0]  ;;  %v3208_v44 = vld [vmem:[%s6163_s1 + $0x24c] sm:$0xf0]  ;;  %v3214_v45 = vld [vmem:[%s6163_s1 + $0x228] sm:$0xf] }
  0x1a   :  { %662 = vmatpush.bf16.msra.mxu3 %v3027_v10  ;;  %v3773_v46 = vld [vmem:[%s6163_s1 + $0x250] sm:$0xf0]  ;;  %v4219_v47 = vld [vmem:[%s6164_s0] sm:$0x3]  ;;  %v3207_v48 = vor.u32 %v3772_v42, %v3206_v41  ;;  %v3162_v49 = vld [vmem:[%s6163_s1 + $0x1c8] sm:$0xf]  ;;  %v3211_v51 = vor.u32 %v3767_v43, %v3208_v44 }
  0x1b   :  { %v3779_v50 = vld [vmem:[%s6163_s1 + $0x284] sm:$0xf]  ;;  %v3215_v52 = vor.u32 %v3773_v46, %v3214_v45  ;;  %v3761_v53 = vld [vmem:[%s6163_s1 + $0x1f0] sm:$0xf0]  ;;  %v3756_v54 = vld [vmem:[%s6163_s1 + $0x1cc] sm:$0xf] }
  0x1c   :  { %624 = vmatpush.bf16.msra.mxu0 %v2971_v16  ;;  %v3260_v55 = vld [vmem:[%s6163_s1 + $0x2ac] sm:$0xf0]  ;;  %v3164_v56 = vld [vmem:[%s6163_s1 + $0x1f4] sm:$0xf0]  ;;  %v3762_v58 = vld [vmem:[%s6163_s1 + $0x1f8] sm:$0xf0]  ;;  %v3163_v62 = vor.u32 %v3761_v53, %v3162_v49 }
  0x1d   :  { %637 = vmatpush.bf16.msra.mxu1 %v2975_v19  ;;  %650 = vmatpush.bf16.msra.mxu2 %v2979_v20  ;;  %v3170_v57 = vld [vmem:[%s6163_s1 + $0x1d0] sm:$0xf]  ;;  %v3263_v59 = vor.u32 %v3779_v50, %v3260_v55  ;;  %v3768_v60 = vld [vmem:[%s6163_s1 + $0x22c] sm:$0xf]  ;;  %v3216_v61 = vld [vmem:[%s6163_s1 + $0x254] sm:$0xf0]  ;;  %v3167_v1 = vor.u32 %v3756_v54, %v3164_v56 }
  0x1e   :  { %663 = vmatpush.bf16.msra.mxu3 %v2983_v24  ;;  %v3118_v63 = vld [vmem:[%s6163_s1 + $0x170] sm:$0xf]  ;;  %v3219_v0 = vor.u32 %v3768_v60, %v3216_v61  ;;  %v3171_v2 = vor.u32 %v3762_v58, %v3170_v57  ;;  %v3750_v3 = vld [vmem:[%s6163_s1 + $0x198] sm:$0xf0]  ;;  %v3745_v4 = vld [vmem:[%s6163_s1 + $0x174] sm:$0xf] }
  0x1f   :  { %v3120_v5 = vld [vmem:[%s6163_s1 + $0x19c] sm:$0xf0]  ;;  %v3126_v6 = vld [vmem:[%s6163_s1 + $0x178] sm:$0xf]  ;;  %v3751_v7 = vld [vmem:[%s6163_s1 + $0x1a0] sm:$0xf0]  ;;  %v3119_v10 = vor.u32 %v3750_v3, %v3118_v63 }
  0x20   :  { %625 = vmatpush.bf16.msra.mxu0 %v2927_v31  ;;  %v3757_v8 = vld [vmem:[%s6163_s1 + $0x1d4] sm:$0xf]  ;;  %v3172_v9 = vld [vmem:[%s6163_s1 + $0x1fc] sm:$0xf0]  ;;  %v3074_v11 = vld [vmem:[%s6163_s1 + $0x118] sm:$0xf]  ;;  %v3123_v14 = vor.u32 %v3745_v4, %v3120_v5  ;;  %v3127_v15 = vor.u32 %v3751_v7, %v3126_v6 }
  0x21   :  { %638 = vmatpush.bf16.msra.mxu1 %v2931_v35  ;;  %651 = vmatpush.bf16.msra.mxu2 %v2935_v36  ;;  %v3739_v12 = vld [vmem:[%s6163_s1 + $0x140] sm:$0xf0]  ;;  %v3175_v13 = vor.u32 %v3757_v8, %v3172_v9  ;;  %v3734_v16 = vld [vmem:[%s6163_s1 + $0x11c] sm:$0xf]  ;;  %v3128_v18 = vld [vmem:[%s6163_s1 + $0x1a4] sm:$0xf0] }
  0x22   :  { %664 = vmatpush.bf16.msra.mxu3 %v2939_v37  ;;  %v3746_v17 = vld [vmem:[%s6163_s1 + $0x17c] sm:$0xf]  ;;  %v3076_v19 = vld [vmem:[%s6163_s1 + $0x144] sm:$0xf0]  ;;  %v3082_v20 = vld [vmem:[%s6163_s1 + $0x120] sm:$0xf]  ;;  %v3075_v22 = vor.u32 %v3739_v12, %v3074_v11 }
  0x23   :  { %626 = vmatmul.bf16.vlgmr.msra.gmra.mxu0 %v4219_v47  ;;  %v3740_v21 = vld [vmem:[%s6163_s1 + $0x148] sm:$0xf0]  ;;  %v3030_v23 = vld [vmem:[%s6163_s1 + $0xc0] sm:$0xf]  ;;  %v3131_v25 = vor.u32 %v3746_v17, %v3128_v18  ;;  %v3079_v26 = vor.u32 %v3734_v16, %v3076_v19  ;;  %v3723_v28 = vld [vmem:[%s6163_s1 + $0xc4] sm:$0xf] }
  0x24   :  { %670 = vmatpush.bf16.msrb.mxu0 %v3251_v38  ;;  %652 = vmatmul.bf16.vlgmr.msra.gmra.mxu2 %v4219_v47  ;;  %v3728_v24 = vld [vmem:[%s6163_s1 + $0xe8] sm:$0xf0]  ;;  %v3083_v27 = vor.u32 %v3740_v21, %v3082_v20  ;;  %v3735_v29 = vld [vmem:[%s6163_s1 + $0x124] sm:$0xf]  ;;  %v3084_v30 = vld [vmem:[%s6163_s1 + $0x14c] sm:$0xf0] }
  0x25   :  { %683 = vmatpush.bf16.msrb.mxu1 %v3255_v39  ;;  %696 = vmatpush.bf16.msrb.mxu2 %v3259_v40  ;;  %v3032_v31 = vld [vmem:[%s6163_s1 + $0xec] sm:$0xf0]  ;;  %v3038_v32 = vld [vmem:[%s6163_s1 + $0xc8] sm:$0xf]  ;;  %v3729_v33 = vld [vmem:[%s6163_s1 + $0xf0] sm:$0xf0]  ;;  %v3031_v34 = vor.u32 %v3728_v24, %v3030_v23  ;;  %v3087_v37 = vor.u32 %v3735_v29, %v3084_v30 }
  0x26   :  { %665 = vmatmul.bf16.vlgmr.msra.gmra.mxu3 %v4219_v47  ;;  %639 = vmatmul.bf16.vlgmr.msra.gmra.mxu1 %v4219_v47  ;;  %v2986_v35 = vld [vmem:[%s6163_s1 + $0x68] sm:$0xf]  ;;  %v3717_v36 = vld [vmem:[%s6163_s1 + $0x90] sm:$0xf0]  ;;  %v3035_v38 = vor.u32 %v3723_v28, %v3032_v31  ;;  %v3039_v39 = vor.u32 %v3729_v33, %v3038_v32  ;;  %v3712_v40 = vld [vmem:[%s6163_s1 + $0x6c] sm:$0xf] }
  0x27   :  { %709 = vmatpush.bf16.msrb.mxu3 %v3263_v59  ;;  %v3724_v41 = vld [vmem:[%s6163_s1 + $0xcc] sm:$0xf]  ;;  %v3040_v42 = vld [vmem:[%s6163_s1 + $0xf4] sm:$0xf0]  ;;  %v2994_v44 = vld [vmem:[%s6163_s1 + $0x70] sm:$0xf]  ;;  %v2987_v46 = vor.u32 %v3717_v36, %v2986_v35 }
  0x28   :  { %671 = vmatpush.bf16.msrb.mxu0 %v3207_v48  ;;  %v2988_v43 = vld [vmem:[%s6163_s1 + $0x94] sm:$0xf0]  ;;  %v3718_v45 = vld [vmem:[%s6163_s1 + $0x98] sm:$0xf0]  ;;  %v2942_v48 = vld [vmem:[%s6163_s1 + $0x10] sm:$0xf] }
  0x29   :  { %684 = vmatpush.bf16.msrb.mxu1 %v3211_v51  ;;  %697 = vmatpush.bf16.msrb.mxu2 %v3215_v52  ;;  %v3706_v49 = vld [vmem:[%s6163_s1 + $0x38] sm:$0xf0]  ;;  %v3701_v50 = vld [vmem:[%s6163_s1 + $0x14] sm:$0xf]  ;;  %v3043_v51 = vor.u32 %v3724_v41, %v3040_v42  ;;  %v2991_v52 = vor.u32 %v3712_v40, %v2988_v43  ;;  %v2995_v53 = vor.u32 %v3718_v45, %v2994_v44  ;;  %v2944_v54 = vld [vmem:[%s6163_s1 + $0x3c] sm:$0xf0] }
  0x2a   :  { %v3713_v55 = vld [vmem:[%s6163_s1 + $0x74] sm:$0xf]  ;;  %v2996_v56 = vld [vmem:[%s6163_s1 + $0x9c] sm:$0xf0]  ;;  %v2950_v57 = vld [vmem:[%s6163_s1 + $0x18] sm:$0xf]  ;;  %v2943_v63 = vor.u32 %v3706_v49, %v2942_v48 }
  0x2b   :  { %710 = vmatpush.bf16.msrb.mxu3 %v3219_v0  ;;  %v3707_v58 = vld [vmem:[%s6163_s1 + $0x40] sm:$0xf0]  ;;  %v3780_v59 = vld [vmem:[%s6163_s1 + $0x28c] sm:$0xf]  ;;  %v3268_v60 = vld [vmem:[%s6163_s1 + $0x2b4] sm:$0xf0]  ;;  %v2999_v0 = vor.u32 %v3713_v55, %v2996_v56 }
  0x2c   :  { %672 = vmatpush.bf16.msrb.mxu0 %v3163_v62  ;;  %v3266_v61 = vld [vmem:[%s6163_s1 + $0x288] sm:$0xf]  ;;  %v3785_v62 = vld [vmem:[%s6163_s1 + $0x2b0] sm:$0xf0]  ;;  %v3271_v3 = vor.u32 %v3780_v59, %v3268_v60  ;;  %v3702_v6 = vld [vmem:[%s6163_s1 + $0x1c] sm:$0xf] }
  0x2d   :  { %685 = vmatpush.bf16.msrb.mxu1 %v3167_v1  ;;  %698 = vmatpush.bf16.msrb.mxu2 %v3171_v2  ;;  %v2947_v1 = vor.u32 %v3701_v50, %v2944_v54  ;;  %v2951_v2 = vor.u32 %v3707_v58, %v2950_v57  ;;  %v3769_v4 = vld [vmem:[%s6163_s1 + $0x234] sm:$0xf]  ;;  %v3267_v5 = vor.u32 %v3785_v62, %v3266_v61  ;;  %v2952_v7 = vld [vmem:[%s6163_s1 + $0x44] sm:$0xf0]  ;;  %v3224_v8 = vld [vmem:[%s6163_s1 + $0x25c] sm:$0xf0] }
  0x2e   :  { %v3222_v9 = vld [vmem:[%s6163_s1 + $0x230] sm:$0xf]  ;;  %v3758_v11 = vld [vmem:[%s6163_s1 + $0x1dc] sm:$0xf]  ;;  %v2955_v12 = vor.u32 %v3702_v6, %v2952_v7  ;;  %v3230_v17 = vld [vmem:[%s6163_s1 + $0x238] sm:$0xf] }
  0x2f   :  { %711 = vmatpush.bf16.msrb.mxu3 %v3175_v13  ;;  %v3274_v13 = vld [vmem:[%s6163_s1 + $0x290] sm:$0xf]  ;;  %v3786_v16 = vld [vmem:[%s6163_s1 + $0x2b8] sm:$0xf0]  ;;  %v3775_v18 = vld [vmem:[%s6163_s1 + $0x260] sm:$0xf0] }
  0x30   :  { %673 = vmatpush.bf16.msrb.mxu0 %v3119_v10  ;;  %v3774_v10 = vld [vmem:[%s6163_s1 + $0x258] sm:$0xf0]  ;;  %v3180_v19 = vld [vmem:[%s6163_s1 + $0x204] sm:$0xf0]  ;;  %v3178_v20 = vld [vmem:[%s6163_s1 + $0x1d8] sm:$0xf] }
  0x31   :  { %686 = vmatpush.bf16.msrb.mxu1 %v3123_v14  ;;  %699 = vmatpush.bf16.msrb.mxu2 %v3127_v15  ;;  %v3227_v14 = vor.u32 %v3769_v4, %v3224_v8  ;;  %v3223_v15 = vor.u32 %v3774_v10, %v3222_v9  ;;  %v3763_v21 = vld [vmem:[%s6163_s1 + $0x200] sm:$0xf0]  ;;  %v4435_v23 = vld [vmem:[%s6165_s3 + $0x78] sm:$0xff]  ;;  %v3186_v28 = vld [vmem:[%s6163_s1 + $0x1e0] sm:$0xf]  ;;  %s3910_s23 = smov 40  }
  0x32   :  { %v3747_v24 = vld [vmem:[%s6163_s1 + $0x184] sm:$0xf]  ;;  %v3764_v29 = vld [vmem:[%s6163_s1 + $0x208] sm:$0xf0]  ;;  %v4449_v30 = vld [vmem:[%s6165_s3 + $0x70] sm:$0xff]  ;;  %vm1057_vm15 = vcmask 916480  }
  0x33   :  { %712 = vmatpush.bf16.msrb.mxu3 %v3131_v25  ;;  %v3231_v25 = vor.u32 %v3775_v18, %v3230_v17  ;;  %v3136_v31 = vld [vmem:[%s6163_s1 + $0x1ac] sm:$0xf0]  ;;  %v3134_v32 = vld [vmem:[%s6163_s1 + $0x180] sm:$0xf]  ;;  %v3752_v33 = vld [vmem:[%s6163_s1 + $0x1a8] sm:$0xf0]  ;;  %v3187_v36 = vor.u32 %v3764_v29, %v3186_v28 }
  0x34   :  { %674 = vmatpush.bf16.msrb.mxu0 %v3075_v22  ;;  %v3275_v22 = vor.u32 %v3786_v16, %v3274_v13  ;;  %v3736_v35 = vld [vmem:[%s6163_s1 + $0x12c] sm:$0xf]  ;;  %v3753_v40 = vld [vmem:[%s6163_s1 + $0x1b0] sm:$0xf0]  ;;  %v4480_v41 = vld [vmem:[%s6165_s3 + $0x60] sm:$0xff] }
  0x35   :  { %687 = vmatpush.bf16.msrb.mxu1 %v3079_v26  ;;  %700 = vmatpush.bf16.msrb.mxu2 %v3083_v27  ;;  %v3183_v26 = vor.u32 %v3758_v11, %v3180_v19  ;;  %v3179_v27 = vor.u32 %v3763_v21, %v3178_v20  ;;  %v3092_v42 = vld [vmem:[%s6163_s1 + $0x154] sm:$0xf0]  ;;  %v3090_v43 = vld [vmem:[%s6163_s1 + $0x128] sm:$0xf]  ;;  %v3741_v44 = vld [vmem:[%s6163_s1 + $0x150] sm:$0xf0] }
  0x36   :  { %v4495_v45 = vld [vmem:[%s6165_s3 + $0x58] sm:$0xff]  ;;  %v3095_v49 = vor.u32 %v3736_v35, %v3092_v42  ;;  %v3091_v50 = vor.u32 %v3741_v44, %v3090_v43  ;;  %v3048_v54 = vld [vmem:[%s6163_s1 + $0xfc] sm:$0xf0]  ;;  %v3046_v55 = vld [vmem:[%s6163_s1 + $0xd0] sm:$0xf] }
  0x37   :  { %713 = vmatpush.bf16.msrb.mxu3 %v3087_v37  ;;  %v3139_v37 = vor.u32 %v3747_v24, %v3136_v31  ;;  %v3730_v56 = vld [vmem:[%s6163_s1 + $0xf8] sm:$0xf0]  ;;  %v4525_v57 = vld [vmem:[%s6165_s3 + $0x48] sm:$0xff]  ;;  %v3054_v62 = vld [vmem:[%s6163_s1 + $0xd8] sm:$0xf] }
  0x38   :  { %675 = vmatpush.bf16.msrb.mxu0 %v3031_v34  ;;  %v4465_v34 = vld [vmem:[%s6165_s3 + $0x68] sm:$0xff]  ;;  %v3714_v58 = vld [vmem:[%s6163_s1 + $0x7c] sm:$0xf]  ;;  %v3047_v61 = vor.u32 %v3730_v56, %v3046_v55  ;;  %v3010_v9 = vld [vmem:[%s6163_s1 + $0x80] sm:$0xf] }
  0x39   :  { %688 = vmatpush.bf16.msrb.mxu1 %v3035_v38  ;;  %701 = vmatpush.bf16.msrb.mxu2 %v3039_v39  ;;  %v3135_v38 = vor.u32 %v3752_v33, %v3134_v32  ;;  %v3142_v39 = vld [vmem:[%s6163_s1 + $0x188] sm:$0xf]  ;;  %v4555_v4 = vld [vmem:[%s6165_s3 + $0x38] sm:$0xff]  ;;  %v3720_v10 = vld [vmem:[%s6163_s1 + $0xa8] sm:$0xf0] }
  0x3a   :  { %v3143_v48 = vor.u32 %v3753_v40, %v3142_v39  ;;  %v4570_v11 = vld [vmem:[%s6165_s3 + $0x30] sm:$0xff]  ;;  %v2958_v13 = vld [vmem:[%s6163_s1 + $0x20] sm:$0xf]  ;;  %v3011_v16 = vor.u32 %v3720_v10, %v3010_v9  ;;  %v2966_v20 = vld [vmem:[%s6163_s1 + $0x28] sm:$0xf] }
  0x3b   :  { %714 = vmatpush.bf16.msrb.mxu3 %v3043_v51  ;;  %v3098_v51 = vld [vmem:[%s6163_s1 + $0x130] sm:$0xf]  ;;  %v4591_v19 = vld [vmem:[%s6165_s3 + $0x20] sm:$0xff]  ;;  %v3709_v21 = vld [vmem:[%s6163_s1 + $0x50] sm:$0xf0] }
  0x3c   :  { %676 = vmatpush.bf16.msrb.mxu0 %v2987_v46  ;;  %v3725_v46 = vld [vmem:[%s6163_s1 + $0xd4] sm:$0xf]  ;;  %v4608_v24 = vld [vmem:[%s6165_s3 + $0x140] sm:$0xff]  ;;  %v4636_v29 = vld [vmem:[%s6165_s3 + $0xd8] sm:$0xff] }
  0x3d   :  { %689 = vmatpush.bf16.msrb.mxu1 %v2991_v52  ;;  %702 = vmatpush.bf16.msrb.mxu2 %v2995_v53  ;;  %v3742_v52 = vld [vmem:[%s6163_s1 + $0x158] sm:$0xf0]  ;;  %v4510_v53 = vld [vmem:[%s6165_s3 + $0x50] sm:$0xff]  ;;  %v3051_v60 = vor.u32 %v3725_v46, %v3048_v54  ;;  %v4629_v28 = vld [vmem:[%s6165_s3 + $0xe0] sm:$0xff] }
  0x3e   :  { %v3099_v59 = vor.u32 %v3742_v52, %v3098_v51  ;;  %v4644_v31 = vld [vmem:[%s6165_s3 + $0xd0] sm:$0xff]  ;;  %v4651_v32 = vld [vmem:[%s6165_s3 + $0xc8] sm:$0xff]  ;;  %v4665_v33 = vld [vmem:[%s6165_s3 + $0xb8] sm:$0xff] }
  0x3f   :  { %715 = vmatpush.bf16.msrb.mxu3 %v2999_v0  ;;  %v4540_v0 = vld [vmem:[%s6165_s3 + $0x40] sm:$0xff]  ;;  %v4679_v35 = vld [vmem:[%s6165_s3 + $0x18] sm:$0xff]  ;;  %v4702_v39 = vld [vmem:[%s6165_s3 + $0xa8] sm:$0xff] }
  0x40   :  { %677 = vmatpush.bf16.msrb.mxu0 %v2943_v63  ;;  %v3731_v63 = vld [vmem:[%s6163_s1 + $0x100] sm:$0xf0]  ;;  %v4707_v40 = vld [vmem:[%s6165_s3 + $0x130] sm:$0xff]  ;;  %v4716_v42 = vld [vmem:[%s6165_s3 + $0x8] sm:$0xff] }
  0x41   :  { %690 = vmatpush.bf16.msrb.mxu1 %v2947_v1  ;;  %703 = vmatpush.bf16.msrb.mxu2 %v2951_v2  ;;  %v3004_v1 = vld [vmem:[%s6163_s1 + $0xa4] sm:$0xf0]  ;;  %v3002_v2 = vld [vmem:[%s6163_s1 + $0x78] sm:$0xf]  ;;  %v3055_v6 = vor.u32 %v3731_v63, %v3054_v62  ;;  %v4721_v43 = vld [vmem:[%s6165_s3 + $0xa0] sm:$0xff] }
  0x42   :  { %v3007_v7 = vor.u32 %v3714_v58, %v3004_v1  ;;  %v4726_v44 = vld [vmem:[%s6165_s3 + $0x128] sm:$0xff]  ;;  %v4735_v46 = vld [vmem:[%s6165_s3] sm:$0xff]  ;;  %v4759_v51 = vld [vmem:[%s6165_s3 + $0x118] sm:$0xff] }
  0x43   :  { %678 = vmatmul.bf16.vlgmr.msrb.gmra.mxu0 %v4219_v47  ;;  %716 = vmatpush.bf16.msrb.mxu3 %v2955_v12  ;;  %v2960_v12 = vld [vmem:[%s6163_s1 + $0x4c] sm:$0xf0]  ;;  %v4768_v52 = vld [vmem:[%s6165_s3 + $0x88] sm:$0xff]  ;;  %v4778_v55 = vld [vmem:[%s6165_s3 + $0x80] sm:$0xff] }
  0x44   :  { %722 = vmatpush.bf16.msra.mxu0 %v3267_v5  ;;  %691 = vmatmul.bf16.vlgmr.msrb.gmra.mxu1 %v4219_v47  ;;  %v3703_v5 = vld [vmem:[%s6163_s1 + $0x24] sm:$0xf]  ;;  %v4773_v54 = vld [vmem:[%s6165_s3 + $0x110] sm:$0xff]  ;;  %v4785_v56 = vld [vmem:[%s6165_s3 + $0x108] sm:$0xff] }
  0x45   :  { %735 = vmatpush.bf16.msra.mxu1 %v3271_v3  ;;  %704 = vmatmul.bf16.vlgmr.msrb.gmra.mxu2 %v4219_v47  ;;  %v3719_v3 = vld [vmem:[%s6163_s1 + $0xa0] sm:$0xf0]  ;;  %v2963_v17 = vor.u32 %v3703_v5, %v2960_v12 }
  0x46   :  { %748 = vmatpush.bf16.msra.mxu2 %v3275_v22  ;;  %717 = vmatmul.bf16.vlgmr.msrb.gmra.mxu3 %v4219_v47  ;;  %v3003_v8 = vor.u32 %v3719_v3, %v3002_v2  ;;  %v4603_v22 = vld [vmem:[%s6165_s3 + $0xf8] sm:$0xff]  ;;  %v4794_v58 = vld [vmem:[%s6165_s3 + $0x100] sm:$0xff] }
  0x47   :  { %839 = vmatpush.msra.mxu3 %v4435_v23 }
  0x48   :  { %723 = vmatpush.bf16.msra.mxu0 %v3223_v15  ;;  %v4585_v15 = vld [vmem:[%s6165_s3 + $0x28] sm:$0xff] }
  0x49   :  { %736 = vmatpush.bf16.msra.mxu1 %v3227_v14  ;;  %840 = vmatpush.msra.mxu3 %v4449_v30  ;;  %v3708_v14 = vld [vmem:[%s6163_s1 + $0x48] sm:$0xf0] }
  0x4a   :  { %749 = vmatpush.bf16.msra.mxu2 %v3231_v25  ;;  %v2959_v18 = vor.u32 %v3708_v14, %v2958_v13  ;;  %v2967_v25 = vor.u32 %v3709_v21, %v2966_v20 }
  0x4b   :  { %841 = vmatpush.msra.mxu3 %v4465_v34 }
  0x4c   :  { %724 = vmatpush.bf16.msra.mxu0 %v3179_v27  ;;  %v4623_v27 = vld [vmem:[%s6165_s3 + $0xe8] sm:$0xff] }
  0x4d   :  { %737 = vmatpush.bf16.msra.mxu1 %v3183_v26  ;;  %842 = vmatpush.msra.mxu3 %v4480_v41  ;;  %v4615_v26 = vld [vmem:[%s6165_s3 + $0xf0] sm:$0xff] }
  0x4e   :  { %750 = vmatpush.bf16.msra.mxu2 %v3187_v36  ;;  %v4684_v36 = vld [vmem:[%s6165_s3 + $0xb0] sm:$0xff] }
  0x4f   :  { %843 = vmatpush.msra.mxu3 %v4495_v45 }
  0x50   :  { %725 = vmatpush.bf16.msra.mxu0 %v3135_v38  ;;  %v4697_v38 = vld [vmem:[%s6165_s3 + $0x10] sm:$0xff] }
  0x51   :  { %738 = vmatpush.bf16.msra.mxu1 %v3139_v37  ;;  %844 = vmatpush.msra.mxu3 %v4510_v53  ;;  %v4689_v37 = vld [vmem:[%s6165_s3 + $0x138] sm:$0xff] }
  0x52   :  { %751 = vmatpush.bf16.msra.mxu2 %v3143_v48  ;;  %v4740_v48 = vld [vmem:[%s6165_s3 + $0x98] sm:$0xff] }
  0x53   :  { %845 = vmatpush.msra.mxu3 %v4525_v57 }
  0x54   :  { %726 = vmatpush.bf16.msra.mxu0 %v3091_v50  ;;  %v4754_v50 = vld [vmem:[%s6165_s3 + $0x90] sm:$0xff] }
  0x55   :  { %739 = vmatpush.bf16.msra.mxu1 %v3095_v49  ;;  %846 = vmatpush.msra.mxu3 %v4540_v0  ;;  %v4745_v49 = vld [vmem:[%s6165_s3 + $0x120] sm:$0xff] }
  0x56   :  { %752 = vmatpush.bf16.msra.mxu2 %v3099_v59  ;;  %v4811_v59 = vld [vmem:[%s6166_s2] sm:$0xff] }
  0x57   :  { %847 = vmatpush.msra.mxu3 %v4555_v4  ;;  %v150_v5 = vperm.slane %v4811_v59, 2 }
  0x58   :  { %727 = vmatpush.bf16.msra.mxu0 %v3047_v61  ;;  %v149_v61 = vperm.slane %v4811_v59, 1 }
  0x59   :  { %740 = vmatpush.bf16.msra.mxu1 %v3051_v60  ;;  %848 = vmatpush.msra.mxu3 %v4570_v11  ;;  %v148_v60 = vperm.slane %v4811_v59, 0 }
  0x5a   :  { %753 = vmatpush.bf16.msra.mxu2 %v3055_v6 }
  0x5b   :  { %849 = vmatpush.msra.mxu3 %v4585_v15 }
  0x5c   :  { %728 = vmatpush.bf16.msra.mxu0 %v3003_v8 }
  0x5d   :  { %741 = vmatpush.bf16.msra.mxu1 %v3007_v7  ;;  %850 = vmatpush.msra.mxu3 %v4591_v19  ;;  %v151_v7 = vperm.slane %v4811_v59, 3 }
  0x5e   :  { %754 = vmatpush.bf16.msra.mxu2 %v3011_v16 }
  0x5f   :  { %851 = vmatpush.msra.mxu3 %v4679_v35 }
  0x60   :  { %729 = vmatpush.bf16.msra.mxu0 %v2959_v18 }
  0x61   :  { %742 = vmatpush.bf16.msra.mxu1 %v2963_v17  ;;  %852 = vmatpush.msra.mxu3 %v4697_v38 }
  0x62   :  { %755 = vmatpush.bf16.msra.mxu2 %v2967_v25 }
  0x63   :  { %730 = vmatmul.bf16.vlgmr.msra.gmra.mxu0 %v4219_v47  ;;  %853 = vmatpush.msra.mxu3 %v4716_v42 }
  0x64   :  { %859 = vmatpush.msrb.mxu0 %v4603_v22  ;;  %743 = vmatmul.bf16.vlgmr.msra.gmra.mxu1 %v4219_v47 }
  0x65   :  { %886 = vmatpush.msrb.mxu1 %v4608_v24  ;;  %756 = vmatmul.bf16.vlgmr.msra.gmra.mxu2 %v4219_v47  ;;  %v4658_v47 = vld [vmem:[%s6165_s3 + $0xc0] sm:$0xff] }
  0x66   :  { %860 = vmatpush.msrb.mxu0 %v4615_v26  ;;  %920 = vmatpush.msrb.mxu2 %v4435_v23 }
  0x67   :  { %887 = vmatpush.msrb.mxu1 %v4689_v37  ;;  %854 = vmatpush.msra.mxu3 %v4735_v46 }
  0x68   :  { %861 = vmatpush.msrb.mxu0 %v4623_v27  ;;  %921 = vmatpush.msrb.mxu2 %v4449_v30 }
  0x69   :  { %888 = vmatpush.msrb.mxu1 %v4707_v40  ;;  %940 = vmatpush.msrb.mxu3 %v4603_v22 }
  0x6a   :  { %862 = vmatpush.msrb.mxu0 %v4629_v28  ;;  %922 = vmatpush.msrb.mxu2 %v4465_v34 }
  0x6b   :  { %889 = vmatpush.msrb.mxu1 %v4726_v44  ;;  %941 = vmatpush.msrb.mxu3 %v4615_v26 }
  0x6c   :  { %863 = vmatpush.msrb.mxu0 %v4636_v29  ;;  %923 = vmatpush.msrb.mxu2 %v4480_v41 }
  0x6d   :  { %890 = vmatpush.msrb.mxu1 %v4745_v49  ;;  %942 = vmatpush.msrb.mxu3 %v4623_v27 }
  0x6e   :  { %864 = vmatpush.msrb.mxu0 %v4644_v31  ;;  %924 = vmatpush.msrb.mxu2 %v4495_v45 }
  0x6f   :  { %891 = vmatpush.msrb.mxu1 %v4759_v51  ;;  %943 = vmatpush.msrb.mxu3 %v4629_v28 }
  0x70   :  { %865 = vmatpush.msrb.mxu0 %v4651_v32  ;;  %925 = vmatpush.msrb.mxu2 %v4510_v53 }
  0x71   :  { %892 = vmatpush.msrb.mxu1 %v4773_v54  ;;  %944 = vmatpush.msrb.mxu3 %v4636_v29 }
  0x72   :  { %866 = vmatpush.msrb.mxu0 %v4658_v47  ;;  %926 = vmatpush.msrb.mxu2 %v4525_v57 }
  0x73   :  { %893 = vmatpush.msrb.mxu1 %v4785_v56  ;;  %945 = vmatpush.msrb.mxu3 %v4644_v31 }
  0x74   :  { %867 = vmatpush.msrb.mxu0 %v4665_v33  ;;  %927 = vmatpush.msrb.mxu2 %v4540_v0 }
  0x75   :  { %894 = vmatpush.msrb.mxu1 %v4794_v58  ;;  %946 = vmatpush.msrb.mxu3 %v4651_v32 }
  0x76   :  { %928 = vmatpush.msrb.mxu2 %v4555_v4  ;;  %868 = vmatpush.msrb.mxu0 %v4684_v36 }
  0x77   :  { %967 = vmatpush.msra.mxu1 %v4608_v24  ;;  %947 = vmatpush.msrb.mxu3 %v4658_v47 }
  0x78   :  { %929 = vmatpush.msrb.mxu2 %v4570_v11  ;;  %869 = vmatpush.msrb.mxu0 %v4702_v39 }
  0x79   :  { %968 = vmatpush.msra.mxu1 %v4689_v37  ;;  %948 = vmatpush.msrb.mxu3 %v4665_v33 }
  0x7a   :  { %930 = vmatpush.msrb.mxu2 %v4585_v15  ;;  %870 = vmatpush.msrb.mxu0 %v4721_v43 }
  0x7b   :  { %969 = vmatpush.msra.mxu1 %v4707_v40  ;;  %949 = vmatpush.msrb.mxu3 %v4684_v36 }
  0x7c   :  { %931 = vmatpush.msrb.mxu2 %v4591_v19  ;;  %871 = vmatpush.msrb.mxu0 %v4740_v48 }
  0x7d   :  { %970 = vmatpush.msra.mxu1 %v4726_v44  ;;  %950 = vmatpush.msrb.mxu3 %v4702_v39 }
  0x7e   :  { %932 = vmatpush.msrb.mxu2 %v4679_v35  ;;  %872 = vmatpush.msrb.mxu0 %v4754_v50 }
  0x7f   :  { %971 = vmatpush.msra.mxu1 %v4745_v49  ;;  %951 = vmatpush.msrb.mxu3 %v4721_v43 }
  0x80   :  { %933 = vmatpush.msrb.mxu2 %v4697_v38  ;;  %873 = vmatpush.msrb.mxu0 %v4768_v52 }
  0x81   :  { %972 = vmatpush.msra.mxu1 %v4759_v51  ;;  %952 = vmatpush.msrb.mxu3 %v4740_v48 }
  0x82   :  { %934 = vmatpush.msrb.mxu2 %v4716_v42  ;;  %874 = vmatpush.msrb.mxu0 %v4778_v55 }
  0x83   :  { %973 = vmatpush.msra.mxu1 %v4773_v54  ;;  %953 = vmatpush.msrb.mxu3 %v4754_v50 }
  0x84   :  { %935 = vmatpush.msrb.mxu2 %v4735_v46 }
  0x85   :  { %974 = vmatpush.msra.mxu1 %v4785_v56  ;;  %954 = vmatpush.msrb.mxu3 %v4768_v52 }
  0x87   :  { %975 = vmatpush.msra.mxu1 %v4794_v58  ;;  %955 = vmatpush.msrb.mxu3 %v4778_v55 }
  0xa0   :  { %v627_v62 = vpop.f32.mrf.mxu0 }
  0xa1   :  { %v628_v63 = vadd.f32 %v627_v62, %v148_v60 }
  0xa3   :  { %v640_v1 = vpop.f32.mrf.mxu1  ;;  %v772_v3 = vmul.f32 0.01, %v628_v63  ;;  %vm761_vm0 = vcmp.ge.f32.partialorder %v628_v63, 0.0 }
  0xa4   :  { %v641_v2 = vadd.f32 %v640_v1, %v149_v61  ;;  %v153_v1 = vperm.slane %v4811_v59, 5 }
  0xa5   :  { %v783_v8 = vsel %vm761_vm0, %v628_v63, %v772_v3  ;;  %v152_v63 = vperm.slane %v4811_v59, 4  ;;  %vm1172_vm0 = vcmask 326656  }
  0xa6   :  { %v773_v6 = vmul.f32 0.01, %v641_v2  ;;  %vm762_vm1 = vcmp.ge.f32.partialorder %v641_v2, 0.0  ;;  %855 = vmatmul.f32.vlgmr.msra.gmra.mxu3 %v783_v8  ;;  %v154_v8 = vperm.slane %v4811_v59, 6 }
  0xa7   :  { %v653_v9 = vpop.f32.mrf.mxu2  ;;  %1064 = vmatpush.msra.mxu3 %v4435_v23 }
  0xa8   :  { %v784_v10 = vsel %vm762_vm1, %v641_v2, %v773_v6  ;;  %v654_v12 = vadd.f32 %v653_v9, %v150_v5  ;;  %v629_v16 = vpop.f32.mrf.mxu0  ;;  %vm1310_vm1 = vcmask 1040384  }
  0xa9   :  { %v666_v13 = vpop.f32.mrf.mxu3  ;;  %875 = vmatmul.f32.vlgmr.msrb.gmra.mxu0 %v784_v10  ;;  %1065 = vmatpush.msra.mxu3 %v4449_v30 }
  0xaa   :  { %v667_v14 = vadd.f32 %v666_v13, %v151_v7  ;;  %vm763_vm2 = vcmp.ge.f32.partialorder %v654_v12, 0.0  ;;  %v774_v17 = vmul.f32 0.01, %v654_v12 }
  0xab   :  { %v642_v18 = vpop.f32.mrf.mxu1  ;;  %1066 = vmatpush.msra.mxu3 %v4465_v34 }
  0xac   :  { %v775_v20 = vmul.f32 0.01, %v667_v14  ;;  %vm764_vm4 = vcmp.ge.f32.partialorder %v667_v14, 0.0  ;;  %v785_v21 = vsel %vm763_vm2, %v654_v12, %v774_v17  ;;  %v155_v17 = vperm.slane %v4811_v59, 7 }
  0xad   :  { %3276 = vmatmul.msk.f32.vlgmr.msrb.gmra.mxu1 %vm835_vm3, %v785_v21  ;;  %1067 = vmatpush.msra.mxu3 %v4480_v41 }
  0xae   :  { %v786_v25 = vsel %vm764_vm4, %v667_v14, %v775_v20  ;;  %1084 = vmatpush.msrb.mxu1 %v4603_v22  ;;  %vm1303_vm4 = vcmask 334848  }
  0xaf   :  { %v3880_v60 = vpack.i.bf16 %v786_v25, %v785_v21  ;;  %v655_v61 = vpop.f32.mrf.mxu2  ;;  %1068 = vmatpush.msra.mxu3 %v4495_v45 }
  0xb0   :  { %1085 = vmatpush.msrb.mxu1 %v4615_v26 }
  0xb1   :  { %v668_v62 = vpop.f32.mrf.mxu3  ;;  %3881 = vrot.lane.b32.xlu0 %v3880_v60, %s3908_s19  ;;  %1069 = vmatpush.msra.mxu3 %v4510_v53 }
  0xb2   :  { %1086 = vmatpush.msrb.mxu1 %v4623_v27 }
  0xb3   :  { %1070 = vmatpush.msra.mxu3 %v4525_v57 }
  0xb4   :  { %1087 = vmatpush.msrb.mxu1 %v4629_v28 }
  0xb5   :  { %1071 = vmatpush.msra.mxu3 %v4540_v0 }
  0xb6   :  { %1088 = vmatpush.msrb.mxu1 %v4636_v29 }
  0xb7   :  { %1072 = vmatpush.msra.mxu3 %v4555_v4 }
  0xb8   :  { %1089 = vmatpush.msrb.mxu1 %v4644_v31 }
  0xb9   :  { %1073 = vmatpush.msra.mxu3 %v4570_v11 }
  0xba   :  { %1090 = vmatpush.msrb.mxu1 %v4651_v32 }
  0xbb   :  { %1074 = vmatpush.msra.mxu3 %v4585_v15 }
  0xbc   :  { %1091 = vmatpush.msrb.mxu1 %v4658_v47 }
  0xbd   :  { %1075 = vmatpush.msra.mxu3 %v4591_v19 }
  0xbe   :  { %1092 = vmatpush.msrb.mxu1 %v4665_v33 }
  0xbf   :  { %1076 = vmatpush.msra.mxu3 %v4679_v35 }
  0xc0   :  { %v679_v2 = vpop.f32.mrf.mxu0  ;;  %1093 = vmatpush.msrb.mxu1 %v4684_v36 }
  0xc1   :  { %v680_v3 = vadd.f32 %v679_v2, %v152_v63  ;;  %v692_v5 = vpop.f32.mrf.mxu1  ;;  %1077 = vmatpush.msra.mxu3 %v4697_v38  ;;  %v145_v2 = vld [vmem:[%s6166_s2 + $0x8] sm:$0x7] }
  0xc2   :  { %v693_v6 = vadd.f32 %v692_v5, %v153_v1  ;;  %1094 = vmatpush.msrb.mxu1 %v4702_v39  ;;  %v156_v5 = vperm.slane %v145_v2, 0 }
  0xc3   :  { %vm765_vm5 = vcmp.ge.f32.partialorder %v680_v3, 0.0  ;;  %v776_v7 = vmul.f32 0.01, %v680_v3  ;;  %1078 = vmatpush.msra.mxu3 %v4716_v42 }
  0xc4   :  { %vm766_vm6 = vcmp.ge.f32.partialorder %v693_v6, 0.0  ;;  %v777_v9 = vmul.f32 0.01, %v693_v6  ;;  %1095 = vmatpush.msrb.mxu1 %v4721_v43 }
  0xc5   :  { %v787_v10 = vsel %vm765_vm5, %v680_v3, %v776_v7  ;;  %1079 = vmatpush.msra.mxu3 %v4735_v46  ;;  %v157_v3 = vperm.slane %v145_v2, 1 }
  0xc6   :  { %v788_v12 = vsel %vm766_vm6, %v693_v6, %v777_v9  ;;  %908 = vrot.lane.b32.xlu0 %v787_v10, %s3908_s19  ;;  %1096 = vmatpush.msrb.mxu1 %v4740_v48  ;;  %vm1344_vm6 = vcmask 97280  }
  0xc7   :  { %910 = vrot.lane.b32.xlu1 %v788_v12, %s3908_s19 }
  0xc8   :  { %v705_v13 = vpop.f32.mrf.mxu2  ;;  %v681_v16 = vpop.f32.mrf.mxu0  ;;  %1097 = vmatpush.msrb.mxu1 %v4754_v50 }
  0xc9   :  { %v706_v14 = vadd.f32 %v705_v13, %v154_v8  ;;  %v694_v18 = vpop.f32.mrf.mxu1  ;;  %v718_v21 = vpop.f32.mrf.mxu3 }
  0xca   :  { %v719_v60 = vadd.f32 %v718_v21, %v155_v17  ;;  %1098 = vmatpush.msrb.mxu1 %v4768_v52  ;;  %v158_v17 = vperm.slane %v145_v2, 2 }
  0xcb   :  { %v778_v20 = vmul.f32 0.01, %v706_v14  ;;  %vm767_vm7 = vcmp.ge.f32.partialorder %v706_v14, 0.0 }
  0xcc   :  { %vm768_vm8 = vcmp.ge.f32.partialorder %v719_v60, 0.0  ;;  %v779_v62 = vmul.f32 0.01, %v719_v60  ;;  %1099 = vmatpush.msrb.mxu1 %v4778_v55 }
  0xcd   :  { %v789_v25 = vsel %vm767_vm7, %v706_v14, %v778_v20 }
  0xce   :  { %v3885_v61 = vpack.i.bf16 %v789_v25, %v788_v12  ;;  %v790_v63 = vsel %vm768_vm8, %v719_v60, %v779_v62  ;;  %vm1377_vm8 = vcmask 162816  }
  0xcf   :  { %1055 = vrot.lane.b32.xlu2 %v790_v63, %s3909_s20 }
  0xd0   :  { %v707_v59 = vpop.f32.mrf.mxu2  ;;  %3886 = vrot.lane.b32.xlu1 %v3885_v61, %s3909_s20 }
  0xd1   :  { %v720_v1 = vpop.f32.mrf.mxu3 }
  0xe0   :  { %v731_v7 = vpop.f32.mrf.mxu0 }
  0xe1   :  { %v744_v6 = vpop.f32.mrf.mxu1  ;;  %v732_v9 = vadd.f32 %v731_v7, %v156_v5 }
  0xe2   :  { %v745_v8 = vadd.f32 %v744_v6, %v157_v3 }
  0xe3   :  { %vm769_vm9 = vcmp.ge.f32.partialorder %v732_v9, 0.0  ;;  %v780_v12 = vmul.f32 0.01, %v732_v9 }
  0xe4   :  { %v781_v10 = vmul.f32 0.01, %v745_v8  ;;  %vm770_vm10 = vcmp.ge.f32.partialorder %v745_v8, 0.0 }
  0xe5   :  { %v791_v14 = vsel %vm769_vm9, %v732_v9, %v780_v12  ;;  %v899_v9 = vld [vmem:[%s6167_s4] sm:$0xff]  ;;  %v900_v12 = vld [vmem:[%s6167_s4 + $0x8] sm:$0xf] }
  0xe6   :  { %v792_v13 = vsel %vm770_vm10, %v745_v8, %v781_v10  ;;  %v3890_v16 = vpack.i.bf16 %v791_v14, %v790_v63  ;;  %vm1462_vm10 = vcmask 261120  }
  0xe7   :  { %1168 = vrot.lane.b32.xlu0 %v792_v13, %s3910_s23 }
  0xe8   :  { %3891 = vrot.lane.b32.xlu2 %v3890_v16, %s3910_s23  ;;  %v733_v18 = vpop.f32.mrf.mxu0  ;;  %v757_v21 = vpop.f32.mrf.mxu2 }
  0xe9   :  { %v746_v20 = vpop.f32.mrf.mxu1  ;;  %v758_v25 = vadd.f32 %v757_v21, %v158_v17 }
  0xeb   :  { %v782_v60 = vmul.f32 0.01, %v758_v25  ;;  %vm771_vm11 = vcmp.ge.f32.partialorder %v758_v25, 0.0 }
  0xed   :  { %v793_v61 = vsel %vm771_vm11, %v758_v25, %v782_v60 }
  0xee   :  { %1170 = vrot.lane.b32.xlu1 %v793_v61, %s3910_s23 }
  0xf0   :  { %v759_v62 = vpop.f32.mrf.mxu2 }
 0x123   :  { %v3882_v59 = vpop.permute.xlu0 %3881 }
 0x124   :  { %v3884_v1 = vunpack.i.h.bf16 %v3882_v59  ;;  %v3883_v3 = vunpack.i.l.bf16 %v3882_v59 }
 0x126   :  { %v913_v5 = vsel %vm912_vm12, %v3883_v3, %v3884_v1  ;;  %v876_v63 = vpop.f32.mrf.mxu0  ;;  %v3279_v3 = vld [vmem:[%s6167_s4 + $0x18] sm:$0xf] }
 0x127   :  { %936 = vmatmul.f32.vlgmr.msrb.gmra.mxu2 %v913_v5 }
 0x129   :  { %v856_v2 = vpop.f32.mrf.mxu3  ;;  %v1056_v18 = vpop.permute.xlu2 %1055 }
 0x12a   :  { %v896_v6 = vpop.f32.mrf.mxu1  ;;  %v877_v7 = vadd.f32 %v876_v63, %v856_v2 }
 0x12c   :  { %v897_v8 = vadd.f32 %v896_v6, %v877_v7 }
 0x12e   :  { %3283 = vmatpush.msk.msra.mxu2 %vm990_vm13, %v897_v8 }
 0x12f   :  { %3284 = vmatmul.msk.f32.vlgmr.msra.gmra.mxu2 %vm983_vm14, %v899_v9 }
 0x130   :  { %1111 = vmatpush.msrb.mxu2 %v4608_v24 }
 0x132   :  { %1112 = vmatpush.msrb.mxu2 %v4689_v37 }
 0x134   :  { %1113 = vmatpush.msrb.mxu2 %v4707_v40 }
 0x136   :  { %1114 = vmatpush.msrb.mxu2 %v4726_v44 }
 0x137   :  { %3285 = vmatmul.msk.f32.gmra.mxu2 %vm983_vm14, %v900_v12 }
 0x138   :  { %v909_v10 = vpop.permute.xlu0 %908  ;;  %1115 = vmatpush.msrb.mxu2 %v4745_v49 }
 0x139   :  { %v911_v13 = vpop.permute.xlu1 %910  ;;  %v914_v14 = vsel %vm912_vm12, %v3884_v1, %v909_v10 }
 0x13a   :  { %v915_v16 = vsel %vm912_vm12, %v909_v10, %v911_v13  ;;  %956 = vmatmul.f32.vlgmr.msrb.gmra.mxu3 %v914_v14  ;;  %1116 = vmatpush.msrb.mxu2 %v4759_v51 }
 0x13b   :  { %3277 = vmatmul.msk.f32.vlgmr.msra.gmra.mxu1 %vm835_vm3, %v915_v16  ;;  %1227 = vmatpush.msrb.mxu3 %v4608_v24 }
 0x13c   :  { %1117 = vmatpush.msrb.mxu2 %v4773_v54 }
 0x13d   :  { %1228 = vmatpush.msrb.mxu3 %v4689_v37 }
 0x13e   :  { %1118 = vmatpush.msrb.mxu2 %v4785_v56 }
 0x13f   :  { %1229 = vmatpush.msrb.mxu3 %v4707_v40 }
 0x140   :  { %1119 = vmatpush.msrb.mxu2 %v4794_v58 }
 0x141   :  { %1230 = vmatpush.msrb.mxu3 %v4726_v44  ;;  %3286 = vmatmul.msk.f32.vlgmr.msrb.gmra.mxu2 %vm835_vm3, %v1056_v18 }
 0x142   :  { %v3887_v17 = vpop.permute.xlu1 %3886 }
 0x143   :  { %v3889_v20 = vunpack.i.h.bf16 %v3887_v17  ;;  %v3888_v21 = vunpack.i.l.bf16 %v3887_v17  ;;  %1231 = vmatpush.msrb.mxu3 %v4745_v49 }
 0x145   :  { %v1058_v24 = vsel %vm1057_vm15, %v3888_v21, %v3889_v20  ;;  %v1059_v25 = vsel %vm1057_vm15, %v3889_v20, %v1056_v18  ;;  %1232 = vmatpush.msrb.mxu3 %v4759_v51  ;;  %v1338_v20 = vld [vmem:[%s6170_s8] sm:$0xf] }
 0x146   :  { %1080 = vmatmul.f32.vlgmr.msra.gmra.mxu3 %v1058_v24  ;;  %1100 = vmatmul.f32.vlgmr.msrb.gmra.mxu1 %v1059_v25  ;;  %v1337_v25 = vld [vmem:[%s6171_s7] sm:$0xf] }
 0x147   :  { %1233 = vmatpush.msrb.mxu3 %v4773_v54  ;;  %v3278_v54 = vld [vmem:[%s6167_s4 + $0x10] sm:$0xff] }
 0x149   :  { %1234 = vmatpush.msrb.mxu3 %v4785_v56 }
 0x14b   :  { %1235 = vmatpush.msrb.mxu3 %v4794_v58 }
 0x159   :  { %v1169_v37 = vpop.permute.xlu0 %1168 }
 0x160   :  { %v1171_v40 = vpop.permute.xlu1 %1170 }
 0x161   :  { %v1175_v44 = vsel %vm1172_vm0, %v1169_v37, %v1171_v40  ;;  %v1375_v40 = vld [vmem:[%s6172_s9 + $0x8] sm:$0xff] }
 0x162   :  { %3292 = vmatmul.msk.f32.vlgmr.msrb.gmra.mxu3 %vm835_vm3, %v1175_v44  ;;  %v1374_v44 = vld [vmem:[%s6172_s9] sm:$0xff] }
 0x1aa   :  { %v937_v60 = vpop.f32.mrf.mxu2 }
 0x1b2   :  { %v1043_v61 = vpop.f32.mrf.mxu2 }
 0x1b8   :  { %v977_v59 = vpop.f32.mrf.mxu1 }
 0x1ba   :  { %v1046_v51 = vpop.f32.mrf.mxu2 }
 0x1bd   :  { %v957_v49 = vpop.f32.mrf.mxu3 }
 0x1be   :  { %v958_v62 = vadd.f32 %v957_v49, %v937_v60  ;;  %v3864_v60 = vld [vmem:[%s6163_s1 + $0x26c] sm:$0xf]  ;;  %v3853_v49 = vld [vmem:[%s6163_s1 + $0x214] sm:$0xf] }
 0x1c0   :  { %v978_v1 = vadd.f32 %v977_v59, %v958_v62  ;;  %v3580_v59 = vld [vmem:[%s6163_s1 + $0x23c] sm:$0xf0] }
 0x1c2   :  { %3280 = vmatpush.msk.msra.mxu0 %vm990_vm13, %v978_v1  ;;  %v3583_v1 = vor.u32 %v3853_v49, %v3580_v59  ;;  %v3792_v49 = vld [vmem:[%s6163_s1 + $0x28] sm:$0xf0]  ;;  %v3638_v59 = vld [vmem:[%s6163_s1 + $0x278] sm:$0xf] }
 0x1c3   :  { %3281 = vmatmul.msk.f32.vlgmr.msra.gmra.mxu0 %vm983_vm14, %v3278_v54  ;;  %v1101_v56 = vpop.f32.mrf.mxu1  ;;  %v3869_v54 = vld [vmem:[%s6163_s1 + $0x290] sm:$0xf0] }
 0x1c4   :  { %1200 = vmatpush.msrb.mxu0 %v4603_v22  ;;  %v1121_v63 = vpop.f32.mrf.mxu2  ;;  %v3287_v22 = vld [vmem:[%s6167_s4 + $0x20] sm:$0xff] }
 0x1c6   :  { %1201 = vmatpush.msrb.mxu0 %v4615_v26  ;;  %v3288_v26 = vld [vmem:[%s6167_s4 + $0x28] sm:$0xf] }
 0x1c8   :  { %1202 = vmatpush.msrb.mxu0 %v4623_v27 }
 0x1c9   :  { %v1081_v58 = vpop.f32.mrf.mxu3 }
 0x1ca   :  { %v1102_v5 = vadd.f32 %v1101_v56, %v1081_v58  ;;  %1203 = vmatpush.msrb.mxu0 %v4629_v28  ;;  %v1278_v28 = vld [vmem:[%s6168_s5 + $0x8] sm:$0xf]  ;;  %v3842_v56 = vld [vmem:[%s6163_s1 + $0x1bc] sm:$0xf] }
 0x1cb   :  { %3282 = vmatmul.msk.f32.gmra.mxu0 %vm983_vm14, %v3279_v3  ;;  %v3536_v58 = vld [vmem:[%s6163_s1 + $0x1e4] sm:$0xf0] }
 0x1cc   :  { %v1122_v2 = vadd.f32 %v1121_v63, %v1102_v5  ;;  %1204 = vmatpush.msrb.mxu0 %v4636_v29  ;;  %v1277_v29 = vld [vmem:[%s6168_s5] sm:$0xff]  ;;  %v3539_v5 = vor.u32 %v3842_v56, %v3536_v58  ;;  %v3420_v56 = vld [vmem:[%s6163_s1 + $0xec] sm:$0xf0] }
 0x1cd   :  { %v3831_v63 = vld [vmem:[%s6163_s1 + $0x164] sm:$0xf] }
 0x1ce   :  { %3289 = vmatpush.msk.msra.mxu2 %vm990_vm13, %v1122_v2  ;;  %1205 = vmatpush.msrb.mxu0 %v4644_v31  ;;  %v3911_v31 = vmov 0   ;;  %v3492_v2 = vld [vmem:[%s6163_s1 + $0x18c] sm:$0xf0] }
 0x1cf   :  { %3290 = vmatmul.msk.f32.vlgmr.msra.gmra.mxu2 %vm983_vm14, %v3287_v22  ;;  %3896 = vset.pattern.permute.xlu0 %v3911_v31  ;;  %v3495_v22 = vor.u32 %v3831_v63, %v3492_v2  ;;  %v3860_v63 = vld [vmem:[%s6163_s1 + $0x248] sm:$0xf0]  ;;  %v3870_v2 = vld [vmem:[%s6163_s1 + $0x298] sm:$0xf0] }
 0x1d0   :  { %1180 = vmatpush.msrb.mxu2 %v4435_v23  ;;  %1206 = vmatpush.msrb.mxu0 %v4651_v32  ;;  %v3892_v23 = vpop.permute.xlu2 %3891 }
 0x1d1   :  { %3895 = vset.pattern.permute.xlu2 %v3911_v31  ;;  %1286 = vperm.xlu0 %3896, %v1278_v28   ;;  %v3798_v28 = vld [vmem:[%s6163_s1 + $0x5c] sm:$0xf] }
 0x1d2   :  { %1181 = vmatpush.msrb.mxu2 %v4449_v30  ;;  %1207 = vmatpush.msrb.mxu0 %v4658_v47  ;;  %v3894_v30 = vunpack.i.h.bf16 %v3892_v23 }
 0x1d3   :  { %1281 = vperm.xlu2 %3895, %v1277_v29   ;;  %3897 = vset.pattern.permute.xlu1 %v3911_v31  ;;  %v3360_v29 = vld [vmem:[%s6163_s1 + $0x84] sm:$0xf0] }
 0x1d4   :  { %1182 = vmatpush.msrb.mxu2 %v4465_v34  ;;  %1208 = vmatpush.msrb.mxu0 %v4665_v33  ;;  %v1174_v34 = vsel %vm1172_vm0, %v3894_v30, %v1169_v37  ;;  %v1376_v37 = vld [vmem:[%s6172_s9 + $0x10] sm:$0xf]  ;;  %v3363_v31 = vor.u32 %v3798_v28, %v3360_v29  ;;  %v3868_v29 = vld [vmem:[%s6163_s1 + $0x28c] sm:$0xf] }
 0x1d5   :  { %1341 = vperm.xlu1 %3897, %v1338_v20   ;;  %v3508_v20 = vld [vmem:[%s6163_s1 + $0x19c] sm:$0xf0] }
 0x1d6   :  { %1183 = vmatpush.msrb.mxu2 %v4480_v41  ;;  %1209 = vmatpush.msrb.mxu0 %v4684_v36  ;;  %v3893_v41 = vunpack.i.l.bf16 %v3892_v23  ;;  %v3448_v23 = vld [vmem:[%s6163_s1 + $0x134] sm:$0xf0] }
 0x1d7   :  { %3291 = vmatmul.msk.f32.gmra.mxu2 %vm983_vm14, %v3288_v26  ;;  %v3820_v26 = vld [vmem:[%s6163_s1 + $0x10c] sm:$0xf] }
 0x1d8   :  { %1184 = vmatpush.msrb.mxu2 %v4495_v45  ;;  %1210 = vmatpush.msrb.mxu0 %v4702_v39  ;;  %v1173_v45 = vsel %vm1172_vm0, %v3893_v41, %v3894_v30  ;;  %v1302_v39 = vld [vmem:[%s6169_s6 + $0x28] sm:$0x1]  ;;  %v3451_v30 = vor.u32 %v3820_v26, %v3448_v23  ;;  %v3404_v41 = vld [vmem:[%s6163_s1 + $0xdc] sm:$0xf0]  ;;  %v3800_v26 = vld [vmem:[%s6163_s1 + $0x6c] sm:$0xf] }
 0x1d9   :  { %v3376_v23 = vld [vmem:[%s6163_s1 + $0x94] sm:$0xf0] }
 0x1da   :  { %1185 = vmatpush.msrb.mxu2 %v4510_v53  ;;  %1211 = vmatpush.msrb.mxu0 %v4721_v43  ;;  %v3294_v43 = vld [vmem:[%s6167_s4 + $0x38] sm:$0xf] }
 0x1dc   :  { %1186 = vmatpush.msrb.mxu2 %v4525_v57  ;;  %1212 = vmatpush.msrb.mxu0 %v4740_v48  ;;  %v1299_v48 = vld [vmem:[%s6169_s6 + $0x10] sm:$0xff] }
 0x1de   :  { %1187 = vmatpush.msrb.mxu2 %v4540_v0  ;;  %1213 = vmatpush.msrb.mxu0 %v4754_v50  ;;  %v1298_v50 = vld [vmem:[%s6169_s6 + $0x8] sm:$0xff] }
 0x1e0   :  { %1188 = vmatpush.msrb.mxu2 %v4555_v4  ;;  %1214 = vmatpush.msrb.mxu0 %v4768_v52  ;;  %v1297_v52 = vld [vmem:[%s6169_s6] sm:$0xff] }
 0x1e2   :  { %1189 = vmatpush.msrb.mxu2 %v4570_v11  ;;  %1215 = vmatpush.msrb.mxu0 %v4778_v55 }
 0x1e3   :  { %1216 = vmatmul.f32.vlgmr.msrb.gmra.mxu0 %v1174_v34  ;;  %v3809_v34 = vld [vmem:[%s6163_s1 + $0xb4] sm:$0xf] }
 0x1e4   :  { %1190 = vmatpush.msrb.mxu2 %v4585_v15 }
 0x1e6   :  { %1191 = vmatpush.msrb.mxu2 %v4591_v19 }
 0x1e8   :  { %1192 = vmatpush.msrb.mxu2 %v4679_v35  ;;  %v1237_v35 = vpop.f32.mrf.mxu3 }
 0x1ea   :  { %1193 = vmatpush.msrb.mxu2 %v4697_v38  ;;  %v3293_v38 = vld [vmem:[%s6167_s4 + $0x30] sm:$0xff] }
 0x1ec   :  { %1194 = vmatpush.msrb.mxu2 %v4716_v42  ;;  %v1301_v42 = vld [vmem:[%s6169_s6 + $0x20] sm:$0xff] }
 0x1ee   :  { %1195 = vmatpush.msrb.mxu2 %v4735_v46  ;;  %v1300_v46 = vld [vmem:[%s6169_s6 + $0x18] sm:$0xff] }
 0x1ef   :  { %1196 = vmatmul.f32.vlgmr.msrb.gmra.mxu2 %v1173_v45  ;;  %v3407_v45 = vor.u32 %v3809_v34, %v3404_v41  ;;  %v1404_v34 = vld [vmem:[%s6173_s10] sm:$0xff]  ;;  %v3586_v41 = vld [vmem:[%s6163_s1 + $0x218] sm:$0xf] }
 0x1f0   :  { %3303 = vmatpush.msk.msra.mxu2 %vm990_vm13, %v1376_v37 }
 0x1f2   :  { %1398 = vmatpush.msra.mxu2 %v1375_v40  ;;  %v3822_v40 = vld [vmem:[%s6163_s1 + $0x11c] sm:$0xf] }
 0x1f4   :  { %1399 = vmatpush.msra.mxu2 %v1374_v44  ;;  %v3464_v44 = vld [vmem:[%s6163_s1 + $0x144] sm:$0xf0] }
 0x22d   :  { %v1282_v6 = vpop.permute.xlu2 %1281 }
 0x240   :  { %v1011_v53 = vpop.f32.mrf.mxu0 }
 0x241   :  { %v1044_v57 = vadd.f32 %v1043_v61, %v1011_v53  ;;  %v3624_v61 = vld [vmem:[%s6163_s1 + $0x294] sm:$0xf0] }
 0x242   :  { %v3627_v62 = vor.u32 %v3864_v60, %v3624_v61  ;;  %v3467_v60 = vor.u32 %v3822_v40, %v3464_v44  ;;  %v3314_v61 = vld [vmem:[%s6163_s1] sm:$0xf]  ;;  %v3374_v44 = vld [vmem:[%s6163_s1 + $0x68] sm:$0xf] }
 0x243   :  { %v1287_v13 = vpop.permute.xlu0 %1286 }
 0x244   :  { %2073 = vmatpush.bf16.msrb.mxu2 %v3627_v62  ;;  %v3315_v62 = vor.u32 %v3792_v49, %v3314_v61  ;;  %v3410_v61 = vld [vmem:[%s6163_s1 + $0xb8] sm:$0xf]  ;;  %v3815_v49 = vld [vmem:[%s6163_s1 + $0xe0] sm:$0xf0] }
 0x247   :  { %v1342_v53 = vpop.permute.xlu1 %1341 }
 0x248   :  { %v1014_v11 = vpop.f32.mrf.mxu0  ;;  %2074 = vmatpush.bf16.msrb.mxu2 %v3583_v1  ;;  %v3871_v1 = vld [vmem:[%s6163_s1 + $0x2a0] sm:$0xf0] }
 0x249   :  { %v1047_v15 = vadd.f32 %v1046_v51, %v1014_v11  ;;  %v3622_v51 = vld [vmem:[%s6163_s1 + $0x268] sm:$0xf] }
 0x24a   :  { %v3623_v3 = vor.u32 %v3869_v54, %v3622_v51  ;;  %v3639_v51 = vor.u32 %v3871_v1, %v3638_v59  ;;  %v3811_v54 = vld [vmem:[%s6163_s1 + $0xc4] sm:$0xf]  ;;  %v3824_v59 = vld [vmem:[%s6163_s1 + $0x12c] sm:$0xf]  ;;  %v3480_v1 = vld [vmem:[%s6163_s1 + $0x154] sm:$0xf0] }
 0x24b   :  { %v3423_v58 = vor.u32 %v3811_v54, %v3420_v56  ;;  %v3411_v54 = vor.u32 %v3815_v49, %v3410_v61  ;;  %v3330_v56 = vld [vmem:[%s6163_s1 + $0x10] sm:$0xf]  ;;  %v1409_v61 = vld [vmem:[%s6174_s11 + $0x8] sm:$0xff] }
 0x24c   :  { %2075 = vmatpush.bf16.msrb.mxu2 %v3539_v5  ;;  %v3594_v5 = vld [vmem:[%s6163_s1 + $0x220] sm:$0xf] }
 0x250   :  { %2076 = vmatpush.bf16.msrb.mxu2 %v3495_v22  ;;  %v3595_v22 = vor.u32 %v3860_v63, %v3594_v5  ;;  %v3804_v5 = vld [vmem:[%s6163_s1 + $0x88] sm:$0xf0] }
 0x252   :  { %v1153_v0 = vpop.f32.mrf.mxu2 }
 0x253   :  { %v1159_v4 = vadd.f32 %v1153_v0, %v1044_v57 }
 0x254   :  { %2077 = vmatpush.bf16.msrb.mxu2 %v3451_v30  ;;  %v3379_v30 = vor.u32 %v3800_v26, %v3376_v23  ;;  %v1407_v23 = vld [vmem:[%s6173_s10 + $0x18] sm:$0xff] }
 0x258   :  { %2078 = vmatpush.bf16.msrb.mxu2 %v3407_v45 }
 0x25a   :  { %v1156_v27 = vpop.f32.mrf.mxu2 }
 0x25b   :  { %v1160_v19 = vadd.f32 %v1156_v27, %v1047_v15  ;;  %v3578_v15 = vld [vmem:[%s6163_s1 + $0x210] sm:$0xf]  ;;  %v3858_v27 = vld [vmem:[%s6163_s1 + $0x238] sm:$0xf0] }
 0x25c   :  { %2079 = vmatpush.bf16.msrb.mxu2 %v3363_v31  ;;  %v3656_v31 = vld [vmem:[%s6163_s1 + $0x2b4] sm:$0xf0] }
 0x260   :  { %v1217_v32 = vpop.f32.mrf.mxu0 }
 0x272   :  { %v1197_v47 = vpop.f32.mrf.mxu2 }
 0x273   :  { %v1218_v33 = vadd.f32 %v1217_v32, %v1197_v47  ;;  %v3534_v32 = vld [vmem:[%s6163_s1 + $0x1b8] sm:$0xf]  ;;  %v3847_v47 = vld [vmem:[%s6163_s1 + $0x1e0] sm:$0xf0] }
 0x275   :  { %v1238_v36 = vadd.f32 %v1237_v35, %v1218_v33  ;;  %v3535_v33 = vor.u32 %v3847_v47, %v3534_v32  ;;  %v3787_v35 = vld [vmem:[%s6163_s1 + $0x4] sm:$0xf]  ;;  %v3659_v47 = vor.u32 %v3868_v29, %v3656_v31  ;;  %v3348_v31 = vld [vmem:[%s6163_s1 + $0x4c] sm:$0xf0] }
 0x276   :  { %v3791_v29 = vld [vmem:[%s6163_s1 + $0x24] sm:$0xf] }
 0x277   :  { %3295 = vmatpush.msk.msra.mxu1 %vm990_vm13, %v1238_v36  ;;  %v3316_v36 = vld [vmem:[%s6163_s1 + $0x2c] sm:$0xf0] }
 0x278   :  { %3296 = vmatmul.msk.f32.vlgmr.msra.gmra.mxu1 %vm983_vm14, %v3293_v38  ;;  %v3319_v38 = vor.u32 %v3787_v35, %v3316_v36  ;;  %v3838_v35 = vld [vmem:[%s6163_s1 + $0x198] sm:$0xf0]  ;;  %v3542_v36 = vld [vmem:[%s6163_s1 + $0x1c0] sm:$0xf] }
 0x279   :  { %3298 = vmatpush.msk.msrb.mxu1 %vm1310_vm1, %v1302_v39  ;;  %v3866_v39 = vld [vmem:[%s6163_s1 + $0x27c] sm:$0xf] }
 0x27a   :  { %2080 = vmatpush.bf16.msrb.mxu2 %v3319_v38  ;;  %v3848_v38 = vld [vmem:[%s6163_s1 + $0x1e8] sm:$0xf0] }
 0x27b   :  { %1325 = vmatpush.msrb.mxu1 %v1301_v42  ;;  %v3640_v42 = vld [vmem:[%s6163_s1 + $0x2a4] sm:$0xf0] }
 0x27d   :  { %1326 = vmatpush.msrb.mxu1 %v1300_v46  ;;  %v3490_v46 = vld [vmem:[%s6163_s1 + $0x160] sm:$0xf] }
 0x27f   :  { %1327 = vmatpush.msrb.mxu1 %v1299_v48  ;;  %v3836_v48 = vld [vmem:[%s6163_s1 + $0x188] sm:$0xf0] }
 0x280   :  { %3297 = vmatmul.msk.f32.gmra.mxu1 %vm983_vm14, %v3294_v43  ;;  %v3643_v43 = vor.u32 %v3866_v39, %v3640_v42  ;;  %v3857_v42 = vld [vmem:[%s6163_s1 + $0x234] sm:$0xf] }
 0x281   :  { %1328 = vmatpush.msrb.mxu1 %v1298_v50  ;;  %v3491_v50 = vor.u32 %v3836_v48, %v3490_v46  ;;  %v1405_v48 = vld [vmem:[%s6173_s10 + $0x8] sm:$0xff] }
 0x283   :  { %1329 = vmatpush.msrb.mxu1 %v1297_v52  ;;  %v3855_v52 = vld [vmem:[%s6163_s1 + $0x224] sm:$0xf] }
 0x285   :  { %2060 = vmatpush.bf16.msra.mxu1 %v3623_v3  ;;  %v3630_v3 = vld [vmem:[%s6163_s1 + $0x270] sm:$0xf] }
 0x286   :  { %v3631_v45 = vor.u32 %v3870_v2, %v3630_v3  ;;  %v3366_v3 = vld [vmem:[%s6163_s1 + $0x60] sm:$0xf]  ;;  %v3813_v2 = vld [vmem:[%s6163_s1 + $0xd4] sm:$0xf] }
 0x2f5   :  { %v1269_v55 = vpop.f32.mrf.mxu1 }
 0x2f6   :  { %v1275_v7 = vadd.f32 %v1269_v55, %v1159_v4  ;;  %v3596_v55 = vld [vmem:[%s6163_s1 + $0x24c] sm:$0xf0] }
 0x2f8   :  { %v1289_v8 = vadd.f32 %v1282_v6, %v1275_v7  ;;  %v3599_v6 = vor.u32 %v3855_v52, %v3596_v55  ;;  %v3446_v7 = vld [vmem:[%s6163_s1 + $0x108] sm:$0xf]  ;;  %v3462_v52 = vld [vmem:[%s6163_s1 + $0x118] sm:$0xf]  ;;  %v3827_v55 = vld [vmem:[%s6163_s1 + $0x140] sm:$0xf0] }
 0x2fa   :  { %vm1291_vm2 = vcmp.ge.f32.partialorder %v1289_v8, 0.0  ;;  %v1293_v9 = vmul.f32 0.01, %v1289_v8 }
 0x2fc   :  { %v1295_v10 = vsel %vm1291_vm2, %v1289_v8, %v1293_v9  ;;  %v3825_v8 = vld [vmem:[%s6163_s1 + $0x130] sm:$0xf0] }
 0x2fd   :  { %v1272_v12 = vpop.f32.mrf.mxu1  ;;  %3299 = vmatmul.msk.f32.vlgmr.msrb.gmra.mxu1 %vm1303_vm4, %v1295_v10  ;;  %v3447_v9 = vor.u32 %v3825_v8, %v3446_v7  ;;  %v3844_v10 = vld [vmem:[%s6163_s1 + $0x1cc] sm:$0xf]  ;;  %v3837_v7 = vld [vmem:[%s6163_s1 + $0x190] sm:$0xf0]  ;;  %v3463_v8 = vor.u32 %v3827_v55, %v3462_v52 }
 0x2fe   :  { %v1276_v14 = vadd.f32 %v1272_v12, %v1160_v19  ;;  %v3579_v19 = vor.u32 %v3858_v27, %v3578_v15  ;;  %v3552_v12 = vld [vmem:[%s6163_s1 + $0x1f4] sm:$0xf0]  ;;  %v5193_v15 = vld [vmem:[%s6164_s0 + $0x2] sm:$0x3]  ;;  %v3789_v27 = vld [vmem:[%s6163_s1 + $0x14] sm:$0xf] }
 0x2ff   :  { %v3817_v52 = vld [vmem:[%s6163_s1 + $0xf0] sm:$0xf0] }
 0x300   :  { %v1290_v16 = vadd.f32 %v1287_v13, %v1276_v14  ;;  %2061 = vmatpush.bf16.msra.mxu1 %v3579_v19  ;;  %v3555_v13 = vor.u32 %v3844_v10, %v3552_v12  ;;  %v3402_v14 = vld [vmem:[%s6163_s1 + $0xb0] sm:$0xf]  ;;  %v3332_v19 = vld [vmem:[%s6163_s1 + $0x3c] sm:$0xf0]  ;;  %v3568_v10 = vld [vmem:[%s6163_s1 + $0x204] sm:$0xf0] }
 0x301   :  { %v3335_v28 = vor.u32 %v3789_v27, %v3332_v19  ;;  %v3602_v19 = vld [vmem:[%s6163_s1 + $0x228] sm:$0xf] }
 0x302   :  { %v1294_v17 = vmul.f32 0.01, %v1290_v16  ;;  %vm1292_vm5 = vcmp.ge.f32.partialorder %v1290_v16, 0.0 }
 0x304   :  { %v1296_v18 = vsel %vm1292_vm5, %v1290_v16, %v1294_v17  ;;  %2062 = vmatpush.bf16.msra.mxu1 %v3535_v33  ;;  %v3814_v16 = vld [vmem:[%s6163_s1 + $0xd8] sm:$0xf0]  ;;  %v3506_v33 = vld [vmem:[%s6163_s1 + $0x170] sm:$0xf] }
 0x305   :  { %3300 = vmatmul.msk.f32.gmra.mxu1 %vm1303_vm4, %v1296_v18  ;;  %v3403_v17 = vor.u32 %v3814_v16, %v3402_v14  ;;  %v3833_v18 = vld [vmem:[%s6163_s1 + $0x174] sm:$0xf]  ;;  %v3507_v39 = vor.u32 %v3838_v35, %v3506_v33  ;;  %v3418_v14 = vld [vmem:[%s6163_s1 + $0xc0] sm:$0xf]  ;;  %v3816_v16 = vld [vmem:[%s6163_s1 + $0xe8] sm:$0xf0] }
 0x306   :  { %v3558_v33 = vld [vmem:[%s6163_s1 + $0x1d0] sm:$0xf]  ;;  %v3850_v35 = vld [vmem:[%s6163_s1 + $0x1f8] sm:$0xf0] }
 0x308   :  { %2063 = vmatpush.bf16.msra.mxu1 %v3491_v50  ;;  %v3543_v50 = vor.u32 %v3848_v38, %v3542_v36  ;;  %v3559_v36 = vor.u32 %v3850_v35, %v3558_v33  ;;  %v3514_v38 = vld [vmem:[%s6163_s1 + $0x178] sm:$0xf] }
 0x30c   :  { %2064 = vmatpush.bf16.msra.mxu1 %v3447_v9  ;;  %v3846_v9 = vld [vmem:[%s6163_s1 + $0x1dc] sm:$0xf] }
 0x30d   :  { %v3571_v12 = vor.u32 %v3846_v9, %v3568_v10  ;;  %v3338_v9 = vld [vmem:[%s6163_s1 + $0x18] sm:$0xf]  ;;  %v3795_v10 = vld [vmem:[%s6163_s1 + $0x40] sm:$0xf0] }
 0x310   :  { %2065 = vmatpush.bf16.msra.mxu1 %v3403_v17  ;;  %v3454_v17 = vld [vmem:[%s6163_s1 + $0x110] sm:$0xf] }
 0x37a   :  { %v1331_v21 = vpop.f32.mrf.mxu1 }
 0x382   :  { %v1334_v24 = vpop.f32.mrf.mxu1 }
 0x383   :  { %3301 = vmatpush.msk.msra.mxu3 %vm990_vm13, %v1334_v24  ;;  %v3358_v24 = vld [vmem:[%s6163_s1 + $0x58] sm:$0xf] }
 0x385   :  { %1366 = vmatpush.msra.mxu3 %v1331_v21  ;;  %v3511_v21 = vor.u32 %v3833_v18, %v3508_v20  ;;  %v3826_v18 = vld [vmem:[%s6163_s1 + $0x138] sm:$0xf0]  ;;  %v3419_v20 = vor.u32 %v3816_v16, %v3418_v14 }
 0x386   :  { %3302 = vmatmul.msk.f32.vlgmr.msra.gmra.mxu3 %vm1344_vm6, %v1337_v25  ;;  %v3803_v25 = vld [vmem:[%s6163_s1 + $0x80] sm:$0xf0]  ;;  %v3455_v40 = vor.u32 %v3826_v18, %v3454_v17 }
 0x387   :  { %v3359_v37 = vor.u32 %v3803_v25, %v3358_v24  ;;  %v3524_v24 = vld [vmem:[%s6163_s1 + $0x1ac] sm:$0xf0] }
 0x389   :  { %2066 = vmatpush.bf16.msra.mxu1 %v3359_v37  ;;  %v1406_v37 = vld [vmem:[%s6173_s10 + $0x10] sm:$0xff] }
 0x38d   :  { %2067 = vmatpush.bf16.msra.mxu1 %v3315_v62 }
 0x390   :  { %2068 = vmatmul.bf16.vlgmr.msra.gmra.mxu1 %v5193_v15 }
 0x391   :  { %2112 = vmatpush.bf16.msrb.mxu1 %v3639_v51  ;;  %v3483_v51 = vor.u32 %v3824_v59, %v3480_v1 }
 0x395   :  { %2113 = vmatpush.bf16.msrb.mxu1 %v3595_v22  ;;  %v3436_v22 = vld [vmem:[%s6163_s1 + $0xfc] sm:$0xf0] }
 0x396   :  { %v3439_v26 = vor.u32 %v3813_v2, %v3436_v22  ;;  %v3865_v2 = vld [vmem:[%s6163_s1 + $0x274] sm:$0xf]  ;;  %v3632_v22 = vld [vmem:[%s6163_s1 + $0x29c] sm:$0xf0] }
 0x409   :  { %v1368_v57 = vpop.f32.mrf.mxu3 }
 0x40a   :  { %v1369_v0 = vadd.f32 %v1368_v57, %v1342_v53  ;;  %v3859_v53 = vld [vmem:[%s6163_s1 + $0x240] sm:$0xf0]  ;;  %v3550_v57 = vld [vmem:[%s6163_s1 + $0x1c8] sm:$0xf] }
 0x40b   :  { %v3587_v32 = vor.u32 %v3859_v53, %v3586_v41  ;;  %v3793_v41 = vld [vmem:[%s6163_s1 + $0x30] sm:$0xf0]  ;;  %v3872_v53 = vld [vmem:[%s6163_s1 + $0x2a8] sm:$0xf0] }
 0x40c   :  { %vm1371_vm7 = vcmp.ge.f32.partialorder %v1369_v0, 0.0  ;;  %v1372_v4 = vmul.f32 0.01, %v1369_v0 }
 0x40d   :  { %v5384_v14 = vpop.f32.mrf.mxu1 }
 0x40e   :  { %v1373_v11 = vsel %vm1371_vm7, %v1369_v0, %v1372_v4  ;;  %v3849_v0 = vld [vmem:[%s6163_s1 + $0x1f0] sm:$0xf0] }
 0x40f   :  { %3304 = vmatmul.msk.f32.vlgmr.msra.gmra.mxu2 %vm1377_vm8, %v1373_v11  ;;  %v3551_v11 = vor.u32 %v3849_v0, %v3550_v57  ;;  %v3802_v57 = vld [vmem:[%s6163_s1 + $0x7c] sm:$0xf]  ;;  %v3392_v0 = vld [vmem:[%s6163_s1 + $0xa4] sm:$0xf0] }
 0x410   :  { %2125 = vmatpush.bf16.msra.mxu2 %v3643_v43  ;;  %v3612_v43 = vld [vmem:[%s6163_s1 + $0x25c] sm:$0xf0] }
 0x411   :  { %2114 = vmatpush.bf16.msrb.mxu1 %v3551_v11  ;;  %v3615_v46 = vor.u32 %v3857_v42, %v3612_v43  ;;  %v3470_v43 = vld [vmem:[%s6163_s1 + $0x120] sm:$0xf] }
 0x414   :  { %2126 = vmatpush.bf16.msra.mxu2 %v3599_v6  ;;  %v3498_v6 = vld [vmem:[%s6163_s1 + $0x168] sm:$0xf] }
 0x415   :  { %2115 = vmatpush.bf16.msrb.mxu1 %v3507_v39  ;;  %v3839_v39 = vld [vmem:[%s6163_s1 + $0x1a0] sm:$0xf0]  ;;  %v2071_v18 = vpop.f32.mrf.mxu1 }
 0x416   :  { %v3515_v42 = vor.u32 %v3839_v39, %v3514_v38  ;;  %v3412_v18 = vld [vmem:[%s6163_s1 + $0xe4] sm:$0xf0] }
 0x417   :  { %2081 = vmatmul.bf16.vlgmr.msrb.gmra.mxu2 %v5193_v15 }
 0x418   :  { %2127 = vmatpush.bf16.msra.mxu2 %v3555_v13  ;;  %v3499_v13 = vor.u32 %v3837_v7, %v3498_v6  ;;  %v3382_v6 = vld [vmem:[%s6163_s1 + $0x70] sm:$0xf]  ;;  %v3806_v7 = vld [vmem:[%s6163_s1 + $0x98] sm:$0xf0] }
 0x419   :  { %2116 = vmatpush.bf16.msrb.mxu1 %v3463_v8  ;;  %v3383_v8 = vor.u32 %v3806_v7, %v3382_v6  ;;  %v3566_v6 = vld [vmem:[%s6163_s1 + $0x1d8] sm:$0xf]  ;;  %v3851_v7 = vld [vmem:[%s6163_s1 + $0x200] sm:$0xf0] }
 0x41c   :  { %2128 = vmatpush.bf16.msra.mxu2 %v3511_v21  ;;  %v3835_v21 = vld [vmem:[%s6163_s1 + $0x184] sm:$0xf] }
 0x41d   :  { %2117 = vmatpush.bf16.msrb.mxu1 %v3419_v20  ;;  %v3527_v25 = vor.u32 %v3835_v21, %v3524_v24  ;;  %v5391_v24 = vld [vmem:[%s6166_s2] sm:$0xff] }
 0x420   :  { %2129 = vmatpush.bf16.msra.mxu2 %v3467_v60  ;;  %v3805_v60 = vld [vmem:[%s6163_s1 + $0x90] sm:$0xf0] }
 0x421   :  { %v3375_v62 = vor.u32 %v3805_v60, %v3374_v44 }
 0x423   :  { %2118 = vmatpush.bf16.msrb.mxu1 %v3375_v62 }
 0x424   :  { %2130 = vmatpush.bf16.msra.mxu2 %v3423_v58  ;;  %v3794_v58 = vld [vmem:[%s6163_s1 + $0x38] sm:$0xf0] }
 0x425   :  { %v3331_v63 = vor.u32 %v3794_v58, %v3330_v56 }
 0x427   :  { %2119 = vmatpush.bf16.msrb.mxu1 %v3331_v63 }
 0x428   :  { %2131 = vmatpush.bf16.msra.mxu2 %v3379_v30  ;;  %v3367_v30 = vor.u32 %v3804_v5, %v3366_v3 }
 0x42a   :  { %2120 = vmatmul.bf16.vlgmr.msrb.gmra.mxu1 %v5193_v15 }
 0x42c   :  { %2132 = vmatpush.bf16.msra.mxu2 %v3335_v28  ;;  %v3861_v28 = vld [vmem:[%s6163_s1 + $0x250] sm:$0xf0] }
 0x42f   :  { %2133 = vmatmul.bf16.vlgmr.msra.gmra.mxu2 %v5193_v15 }
 0x430   :  { %2177 = vmatpush.bf16.msrb.mxu2 %v3659_v47  ;;  %v3603_v47 = vor.u32 %v3861_v28, %v3602_v19  ;;  %v3843_v28 = vld [vmem:[%s6163_s1 + $0x1c4] sm:$0xf] }
 0x434   :  { %2178 = vmatpush.bf16.msrb.mxu2 %v3615_v46  ;;  %v3828_v46 = vld [vmem:[%s6163_s1 + $0x148] sm:$0xf0] }
 0x438   :  { %2179 = vmatpush.bf16.msrb.mxu2 %v3571_v12  ;;  %v3339_v12 = vor.u32 %v3795_v10, %v3338_v9  ;;  %v3567_v9 = vor.u32 %v3851_v7, %v3566_v6  ;;  %v3874_v10 = vld [vmem:[%s6163_s1 + $0x2b8] sm:$0xf0]  ;;  %v3796_v6 = vld [vmem:[%s6163_s1 + $0x48] sm:$0xf0]  ;;  %v3442_v7 = vld [vmem:[%s6163_s1 + $0xd8] sm:$0xf] }
 0x43c   :  { %2180 = vmatpush.bf16.msrb.mxu2 %v3527_v25  ;;  %v1594_v25 = vperm.slane %v5391_v24, 4 }
 0x440   :  { %2181 = vmatpush.bf16.msrb.mxu2 %v3483_v51  ;;  %v1408_v51 = vld [vmem:[%s6174_s11] sm:$0xff] }
 0x444   :  { %2182 = vmatpush.bf16.msrb.mxu2 %v3439_v26  ;;  %v1592_v26 = vperm.slane %v5391_v24, 2 }
 0x492   :  { %v1401_v4 = vpop.f32.mrf.mxu2 }
 0x493   :  { %3305 = vmatpush.msk.msra.mxu0 %vm990_vm13, %v1401_v4  ;;  %v3395_v4 = vor.u32 %v3802_v57, %v3392_v0  ;;  %v3854_v57 = vld [vmem:[%s6163_s1 + $0x21c] sm:$0xf]  ;;  %v3588_v0 = vld [vmem:[%s6163_s1 + $0x244] sm:$0xf0] }
 0x494   :  { %3306 = vmatmul.msk.f32.vlgmr.msra.gmra.mxu0 %vm983_vm14, %v1404_v34  ;;  %v3322_v34 = vld [vmem:[%s6163_s1 + $0x8] sm:$0xf]  ;;  %v3591_v19 = vor.u32 %v3854_v57, %v3588_v0  ;;  %v3841_v57 = vld [vmem:[%s6163_s1 + $0x1b0] sm:$0xf0] }
 0x495   :  { %2086 = vmatpush.bf16.msrb.mxu0 %v3631_v45  ;;  %v3646_v45 = vld [vmem:[%s6163_s1 + $0x280] sm:$0xf]  ;;  %v3323_v11 = vor.u32 %v3793_v41, %v3322_v34  ;;  %2183 = vmatpush.bf16.msrb.mxu2 %v3395_v4  ;;  %v3635_v41 = vor.u32 %v3865_v2, %v3632_v22  ;;  %v1596_v22 = vperm.slane %v5391_v24, 6  ;;  %v5540_v0 = vld [vmem:[%s6166_s2 + $0x8] sm:$0x7] }
 0x496   :  { %v3647_v27 = vor.u32 %v3872_v53, %v3646_v45 }
 0x499   :  { %2087 = vmatpush.bf16.msrb.mxu0 %v3587_v32  ;;  %v3351_v32 = vor.u32 %v3791_v29, %v3348_v31  ;;  %v3544_v31 = vld [vmem:[%s6163_s1 + $0x1ec] sm:$0xf0] }
 0x49a   :  { %v5386_v16 = vpop.f32.mrf.mxu2  ;;  %v3547_v35 = vor.u32 %v3843_v28, %v3544_v31 }
 0x49b   :  { %2184 = vmatpush.bf16.msrb.mxu2 %v3351_v32  ;;  %v3654_v32 = vld [vmem:[%s6163_s1 + $0x288] sm:$0xf] }
 0x49c   :  { %3307 = vmatmul.msk.f32.gmra.mxu0 %vm983_vm14, %v1405_v48  ;;  %v3471_v48 = vor.u32 %v3828_v46, %v3470_v43  ;;  %v3610_v43 = vld [vmem:[%s6163_s1 + $0x230] sm:$0xf]  ;;  %v3862_v46 = vld [vmem:[%s6163_s1 + $0x258] sm:$0xf0] }
 0x49d   :  { %2088 = vmatpush.bf16.msrb.mxu0 %v3543_v50  ;;  %v3426_v50 = vld [vmem:[%s6163_s1 + $0xc8] sm:$0xf] }
 0x49e   :  { %2185 = vmatmul.bf16.vlgmr.msrb.gmra.mxu2 %v5193_v15  ;;  %v3427_v55 = vor.u32 %v3817_v52, %v3426_v50  ;;  %v3821_v52 = vld [vmem:[%s6163_s1 + $0x114] sm:$0xf] }
 0x4a1   :  { %2089 = vmatpush.bf16.msrb.mxu0 %v3499_v13 }
 0x4a2   :  { %v2084_v20 = vpop.f32.mrf.mxu2 }
 0x4a4   :  { %3308 = vmatmul.msk.f32.gmra.mxu0 %vm983_vm14, %v1406_v37  ;;  %v1410_v37 = vld [vmem:[%s6174_s11 + $0x10] sm:$0xff] }
 0x4a5   :  { %2090 = vmatpush.bf16.msrb.mxu0 %v3455_v40  ;;  %v1411_v40 = vld [vmem:[%s6174_s11 + $0x18] sm:$0xff] }
 0x4a7   :  { %v2121_v44 = vpop.f32.mrf.mxu1 }
 0x4a8   :  { %v2122_v62 = vadd.f32 %v2121_v44, %v1594_v25  ;;  %v3840_v25 = vld [vmem:[%s6163_s1 + $0x1a8] sm:$0xf0]  ;;  %v3863_v44 = vld [vmem:[%s6163_s1 + $0x260] sm:$0xf0] }
 0x4a9   :  { %2091 = vmatpush.bf16.msrb.mxu0 %v3411_v54 }
 0x4aa   :  { %v2218_v54 = vmul.f32 0.01, %v2122_v62  ;;  %vm2207_vm9 = vcmp.ge.f32.partialorder %v2122_v62, 0.0 }
 0x4ac   :  { %3309 = vmatmul.msk.f32.gmra.mxu0 %vm983_vm14, %v1407_v23  ;;  %v2229_v3 = vsel %vm2207_vm9, %v2122_v62, %v2218_v54  ;;  %v3829_v54 = vld [vmem:[%s6163_s1 + $0x150] sm:$0xf0] }
 0x4ad   :  { %2092 = vmatpush.bf16.msrb.mxu0 %v3367_v30  ;;  %2349 = vrot.lane.b32.xlu1 %v2229_v3, %s3908_s19  ;;  %v3852_v3 = vld [vmem:[%s6163_s1 + $0x208] sm:$0xf0] }
 0x4af   :  { %v2123_v34 = vpop.f32.mrf.mxu1 }
 0x4b0   :  { %v3530_v34 = vld [vmem:[%s6163_s1 + $0x188] sm:$0xf] }
 0x4b1   :  { %2093 = vmatpush.bf16.msrb.mxu0 %v3323_v11  ;;  %v1460_v11 = vld [vmem:[%s6175_s12] sm:$0x7] }
 0x4b2   :  { %v5400_v60 = vpop.f32.mrf.mxu2 }
 0x4b4   :  { %2094 = vmatmul.bf16.vlgmr.msrb.gmra.mxu0 %v5193_v15 }
 0x4b5   :  { %2138 = vmatpush.bf16.msra.mxu0 %v3647_v27 }
 0x4b9   :  { %2139 = vmatpush.bf16.msra.mxu0 %v3603_v47  ;;  %v3873_v47 = vld [vmem:[%s6163_s1 + $0x2b0] sm:$0xf0] }
 0x4ba   :  { %v2136_v30 = vpop.f32.mrf.mxu2  ;;  %v3655_v33 = vor.u32 %v3873_v47, %v3654_v32  ;;  %v3390_v32 = vld [vmem:[%s6163_s1 + $0x78] sm:$0xf]  ;;  %v3807_v47 = vld [vmem:[%s6163_s1 + $0xa0] sm:$0xf0] }
 0x4bb   :  { %v3434_v30 = vld [vmem:[%s6163_s1 + $0xd0] sm:$0xf] }
 0x4bc   :  { %2164 = vmatpush.bf16.msra.mxu1 %v3655_v33  ;;  %v3486_v33 = vld [vmem:[%s6163_s1 + $0x130] sm:$0xf] }
 0x4bd   :  { %2140 = vmatpush.bf16.msra.mxu0 %v3559_v36  ;;  %v3832_v36 = vld [vmem:[%s6163_s1 + $0x16c] sm:$0xf] }
 0x4c1   :  { %2141 = vmatpush.bf16.msra.mxu0 %v3515_v42  ;;  %v3500_v42 = vld [vmem:[%s6163_s1 + $0x194] sm:$0xf0] }
 0x4c2   :  { %v3503_v50 = vor.u32 %v3832_v36, %v3500_v42  ;;  %v3604_v36 = vld [vmem:[%s6163_s1 + $0x254] sm:$0xf0]  ;;  %v3391_v42 = vor.u32 %v3807_v47, %v3390_v32 }
 0x4c3   :  { %v5709_v47 = vld [vmem:[%s6165_s3 + $0xb8] sm:$0xff] }
 0x4c5   :  { %2142 = vmatpush.bf16.msra.mxu0 %v3471_v48  ;;  %v3611_v48 = vor.u32 %v3862_v46, %v3610_v43  ;;  %v3830_v43 = vld [vmem:[%s6163_s1 + $0x158] sm:$0xf0] }
 0x4c6   :  { %v3487_v46 = vor.u32 %v3830_v43, %v3486_v33  ;;  %v5714_v33 = vld [vmem:[%s6165_s3 + $0x128] sm:$0xff]  ;;  %v5737_v43 = vld [vmem:[%s6165_s3 + $0x120] sm:$0xff] }
 0x4c7   :  { %2165 = vmatpush.bf16.msra.mxu1 %v3611_v48 }
 0x4c9   :  { %2143 = vmatpush.bf16.msra.mxu0 %v3427_v55  ;;  %v3456_v55 = vld [vmem:[%s6163_s1 + $0x13c] sm:$0xf0] }
 0x4cb   :  { %2166 = vmatpush.bf16.msra.mxu1 %v3567_v9 }
 0x4cd   :  { %2144 = vmatpush.bf16.msra.mxu0 %v3383_v8  ;;  %v3662_v8 = vld [vmem:[%s6163_s1 + $0x290] sm:$0xf] }
 0x4d1   :  { %2145 = vmatpush.bf16.msra.mxu0 %v3339_v12  ;;  %v3663_v12 = vor.u32 %v3874_v10, %v3662_v8  ;;  %v3819_v8 = vld [vmem:[%s6163_s1 + $0x100] sm:$0xf0] }
 0x4d4   :  { %2146 = vmatmul.bf16.vlgmr.msra.gmra.mxu0 %v5193_v15 }
 0x4d5   :  { %2190 = vmatpush.bf16.msrb.mxu0 %v3663_v12  ;;  %v3845_v12 = vld [vmem:[%s6163_s1 + $0x1d4] sm:$0xf] }
 0x511   :  { %v1444_v13 = vpop.f32.mrf.mxu0 }
 0x512   :  { %v1445_v5 = vadd.f32 %v1444_v13, %v1408_v51  ;;  %v3459_v13 = vor.u32 %v3821_v52, %v3456_v55  ;;  %v3478_v51 = vld [vmem:[%s6163_s1 + $0x128] sm:$0xf]  ;;  %v3346_v52 = vld [vmem:[%s6163_s1 + $0x20] sm:$0xf] }
 0x514   :  { %v1456_v53 = vmax.f32 %v1445_v5, 0.0 }
 0x519   :  { %v1447_v17 = vpop.f32.mrf.mxu0 }
 0x51a   :  { %v1448_v56 = vadd.f32 %v1447_v17, %v1409_v61  ;;  %v3810_v17 = vld [vmem:[%s6163_s1 + $0xbc] sm:$0xf] }
 0x51b   :  { %v3415_v62 = vor.u32 %v3810_v17, %v3412_v18  ;;  %v3347_v17 = vor.u32 %v3796_v6, %v3346_v52  ;;  %v3443_v18 = vor.u32 %v3819_v8, %v3442_v7  ;;  %v5750_v52 = vld [vmem:[%s6165_s3 + $0xa8] sm:$0xff]  ;;  %v5761_v6 = vld [vmem:[%s6165_s3 + $0x58] sm:$0xff]  ;;  %v5768_v7 = vld [vmem:[%s6165_s3 + $0xa0] sm:$0xff] }
 0x51c   :  { %v1457_v23 = vmax.f32 %v1448_v56, 0.0  ;;  %v3574_v56 = vld [vmem:[%s6163_s1 + $0x1e0] sm:$0xf]  ;;  %v5773_v8 = vld [vmem:[%s6165_s3 + $0x110] sm:$0xff] }
 0x51d   :  { %v3575_v5 = vor.u32 %v3852_v3, %v3574_v56  ;;  %v5620_v56 = vld [vmem:[%s6165_s3 + $0xe8] sm:$0xff]  ;;  %v3823_v3 = vld [vmem:[%s6163_s1 + $0x124] sm:$0xf] }
 0x521   :  { %v1450_v21 = vpop.f32.mrf.mxu0  ;;  %v5445_v39 = vpop.f32.mrf.mxu2 }
 0x522   :  { %v1451_v59 = vadd.f32 %v1450_v21, %v1410_v37  ;;  %v3522_v21 = vld [vmem:[%s6163_s1 + $0x180] sm:$0xf]  ;;  %v3618_v37 = vld [vmem:[%s6163_s1 + $0x238] sm:$0xf] }
 0x523   :  { %v3619_v61 = vor.u32 %v3863_v44, %v3618_v37  ;;  %v5595_v37 = vld [vmem:[%s6165_s3 + $0xf8] sm:$0xff] }
 0x524   :  { %v1458_v63 = vmax.f32 %v1451_v59, 0.0  ;;  %v3799_v59 = vld [vmem:[%s6163_s1 + $0x64] sm:$0xf] }
 0x525   :  { %2191 = vmatpush.bf16.msrb.mxu0 %v3619_v61  ;;  %v3834_v61 = vld [vmem:[%s6163_s1 + $0x17c] sm:$0xf] }
 0x529   :  { %v1453_v49 = vpop.f32.mrf.mxu0  ;;  %v2188_v20 = vpop.f32.mrf.mxu2  ;;  %2192 = vmatpush.bf16.msrb.mxu0 %v3575_v5  ;;  %v3472_v5 = vld [vmem:[%s6163_s1 + $0x14c] sm:$0xf0] }
 0x52a   :  { %v1454_v1 = vadd.f32 %v1453_v49, %v1411_v40  ;;  %v3523_v40 = vor.u32 %v3840_v25, %v3522_v21  ;;  %v1595_v49 = vperm.slane %v5391_v24, 5  ;;  %v3398_v21 = vld [vmem:[%s6163_s1 + $0x80] sm:$0xf] }
 0x52c   :  { %v1459_v58 = vmax.f32 %v1454_v1, 0.0  ;;  %v3368_v1 = vld [vmem:[%s6163_s1 + $0x8c] sm:$0xf0]  ;;  %2167 = vmatpush.bf16.msra.mxu1 %v3523_v40 }
 0x52d   :  { %v3371_v2 = vor.u32 %v3799_v59, %v3368_v1  ;;  %v3354_v59 = vld [vmem:[%s6163_s1 + $0x28] sm:$0xf]  ;;  %v3797_v1 = vld [vmem:[%s6163_s1 + $0x50] sm:$0xf0] }
 0x52e   :  { %1478 = vmatpush.msrb.mxu3 %v1459_v58  ;;  %v3479_v58 = vor.u32 %v3829_v54, %v3478_v51  ;;  %v5614_v51 = vld [vmem:[%s6165_s3 + $0xf0] sm:$0xff] }
 0x530   :  { %1479 = vmatpush.msrb.mxu3 %v1458_v63  ;;  %v2135_v63 = vadd.f32 %v5400_v60, %v1595_v49  ;;  %2168 = vmatpush.bf16.msra.mxu1 %v3479_v58  ;;  %v3818_v60 = vld [vmem:[%s6163_s1 + $0xf8] sm:$0xf0]  ;;  %v3516_v49 = vld [vmem:[%s6163_s1 + $0x1a4] sm:$0xf0] }
 0x531   :  { %v2095_v45 = vpop.f32.mrf.mxu0  ;;  %v3519_v54 = vor.u32 %v3834_v61, %v3516_v49  ;;  %v5867_v61 = vld [vmem:[%s6165_s3 + $0x20] sm:$0xff]  ;;  %v5875_v49 = vld [vmem:[%s6165_s3 + $0x18] sm:$0xff] }
 0x532   :  { %1480 = vmatpush.msrb.mxu3 %v1457_v23  ;;  %v2096_v4 = vadd.f32 %v2095_v45, %v1592_v26  ;;  %v3788_v26 = vld [vmem:[%s6163_s1 + $0xc] sm:$0xf]  ;;  %v3324_v23 = vld [vmem:[%s6163_s1 + $0x34] sm:$0xf0]  ;;  %v3648_v45 = vld [vmem:[%s6163_s1 + $0x2ac] sm:$0xf0] }
 0x533   :  { %vm2208_vm2 = vcmp.ge.f32.partialorder %v2135_v63, 0.0 }
 0x534   :  { %1481 = vmatpush.msrb.mxu3 %v1456_v53  ;;  %vm2205_vm11 = vcmp.ge.f32.partialorder %v2096_v4, 0.0  ;;  %v2216_v27 = vmul.f32 0.01, %v2096_v4  ;;  %v3435_v53 = vor.u32 %v3818_v60, %v3434_v30  ;;  %v3428_v30 = vld [vmem:[%s6163_s1 + $0xf4] sm:$0xf0] }
 0x535   :  { %3310 = vmatmul.msk.f32.vlgmr.msrb.gmra.mxu3 %vm1462_vm10, %v1460_v11  ;;  %v2219_v11 = vmul.f32 0.01, %v2135_v63  ;;  %v5650_v60 = vld [vmem:[%s6165_s3 + $0x78] sm:$0xff] }
 0x536   :  { %2099 = vmatpush.bf16.msra.mxu3 %v3635_v41  ;;  %v5428_v29 = vsel %vm2205_vm11, %v2096_v4, %v2216_v27  ;;  %v3867_v41 = vld [vmem:[%s6163_s1 + $0x284] sm:$0xf]  ;;  %v3531_v4 = vor.u32 %v3841_v57, %v3530_v34  ;;  %v3327_v27 = vor.u32 %v3788_v26, %v3324_v23  ;;  %2169 = vmatpush.bf16.msra.mxu1 %v3435_v53  ;;  %v5639_v26 = vld [vmem:[%s6165_s3 + $0xd8] sm:$0xff]  ;;  %v3812_v23 = vld [vmem:[%s6163_s1 + $0xcc] sm:$0xf] }
 0x537   :  { %2345 = vrot.lane.b32.xlu0 %v5428_v29, %s3908_s19  ;;  %v3651_v31 = vor.u32 %v3867_v41, %v3648_v45  ;;  %v5656_v34 = vld [vmem:[%s6165_s3 + $0xd0] sm:$0xff]  ;;  %v5661_v41 = vld [vmem:[%s6165_s3 + $0x140] sm:$0xff]  ;;  %v2711_v45 = vld [vmem:[%s6168_s5 + $0x8] sm:$0xf]  ;;  %v3431_v53 = vor.u32 %v3812_v23, %v3428_v30  ;;  %v1593_v30 = vperm.slane %v5391_v24, 3 }
 0x538   :  { %2193 = vmatpush.bf16.msrb.mxu0 %v3531_v4  ;;  %2327 = vmatpush.msra.mxu2 %v5661_v41  ;;  %v5673_v57 = vld [vmem:[%s6165_s3 + $0xc8] sm:$0xff]  ;;  %v5678_v4 = vld [vmem:[%s6165_s3 + $0x138] sm:$0xff] }
 0x539   :  { %v2097_v38 = vpop.f32.mrf.mxu0 }
 0x53a   :  { %2100 = vmatpush.bf16.msra.mxu3 %v3591_v19  ;;  %v3856_v19 = vld [vmem:[%s6163_s1 + $0x22c] sm:$0xf]  ;;  %v1599_v38 = vperm.slane %v5540_v0, 1  ;;  %2170 = vmatpush.bf16.msra.mxu1 %v3391_v42  ;;  %v5732_v42 = vld [vmem:[%s6165_s3 + $0xb0] sm:$0xff] }
 0x53b   :  { %v3607_v55 = vor.u32 %v3856_v19, %v3604_v36  ;;  %v5689_v19 = vld [vmem:[%s6165_s3 + $0x70] sm:$0xff]  ;;  %2328 = vmatpush.msra.mxu2 %v5678_v4  ;;  %v3340_v36 = vld [vmem:[%s6163_s1 + $0x44] sm:$0xf0] }
 0x53c   :  { %2194 = vmatpush.bf16.msrb.mxu0 %v3487_v46  ;;  %v2187_v10 = vadd.f32 %v5445_v39, %v1599_v38  ;;  %v3808_v39 = vld [vmem:[%s6163_s1 + $0xa8] sm:$0xf0]  ;;  %v5743_v46 = vld [vmem:[%s6165_s3 + $0x60] sm:$0xff] }
 0x53d   :  { %v5725_v38 = vld [vmem:[%s6165_s3 + $0x68] sm:$0xff] }
 0x53e   :  { %2101 = vmatpush.bf16.msra.mxu3 %v3547_v35  ;;  %2171 = vmatpush.bf16.msra.mxu1 %v3347_v17  ;;  %v2223_v44 = vmul.f32 0.01, %v2187_v10  ;;  %vm2212_vm7 = vcmp.ge.f32.partialorder %v2187_v10, 0.0  ;;  %v5804_v17 = vld [vmem:[%s6165_s3 + $0x90] sm:$0xff] }
 0x540   :  { %2195 = vmatpush.bf16.msrb.mxu0 %v3443_v18  ;;  %v2234_v58 = vsel %vm2212_vm7, %v2187_v10, %v2223_v44  ;;  %v5786_v10 = vld [vmem:[%s6165_s3 + $0x98] sm:$0xff]  ;;  %v5809_v18 = vld [vmem:[%s6165_s3 + $0x100] sm:$0xff]  ;;  %v5859_v44 = vld [vmem:[%s6165_s3 + $0x28] sm:$0xff] }
 0x541   :  { %2172 = vmatmul.bf16.vlgmr.msra.gmra.mxu1 %v5193_v15 }
 0x542   :  { %2102 = vmatpush.bf16.msra.mxu3 %v3503_v50  ;;  %v5562_v50 = vsel %vm2208_vm2, %v2135_v63, %v2219_v11  ;;  %2300 = vmatpush.msrb.mxu1 %v5595_v37  ;;  %v3355_v63 = vor.u32 %v3797_v1, %v3354_v59  ;;  %v3801_v11 = vld [vmem:[%s6163_s1 + $0x74] sm:$0xf]  ;;  %v1590_v59 = vperm.slane %v5391_v24, 0  ;;  %vm1486_vm2 = vcmask 2048  }
 0x544   :  { %2301 = vmatpush.msrb.mxu1 %v5614_v51 }
 0x546   :  { %2103 = vmatpush.bf16.msra.mxu3 %v3459_v13  ;;  %v3560_v13 = vld [vmem:[%s6163_s1 + $0x1fc] sm:$0xf0]  ;;  %2302 = vmatpush.msrb.mxu1 %v5620_v56 }
 0x547   :  { %v3563_v25 = vor.u32 %v3845_v12, %v3560_v13  ;;  %v5791_v12 = vld [vmem:[%s6165_s3 + $0x108] sm:$0xff] }
 0x548   :  { %v5798_v13 = vld [vmem:[%s6165_s3 + $0x48] sm:$0xff] }
 0x54a   :  { %2104 = vmatpush.bf16.msra.mxu3 %v3415_v62  ;;  %v3399_v62 = vor.u32 %v3808_v39, %v3398_v21  ;;  %v5825_v21 = vld [vmem:[%s6165_s3 + $0x80] sm:$0xff] }
 0x54b   :  { %v5830_v39 = vld [vmem:[%s6165_s3 + $0x40] sm:$0xff] }
 0x54c   :  { %2196 = vmatpush.bf16.msrb.mxu0 %v3399_v62  ;;  %v5883_v62 = vld [vmem:[%s6165_s3 + $0x10] sm:$0xff] }
 0x54e   :  { %2105 = vmatpush.bf16.msra.mxu3 %v3371_v2  ;;  %v5632_v2 = vld [vmem:[%s6165_s3 + $0xe0] sm:$0xff] }
 0x54f   :  { %2303 = vmatpush.msrb.mxu1 %v5632_v2 }
 0x550   :  { %2197 = vmatpush.bf16.msrb.mxu0 %v3355_v63  ;;  %v1461_v63 = vld [vmem:[%s6176_s13] sm:$0x7] }
 0x551   :  { %v2147_v28 = vpop.f32.mrf.mxu0  ;;  %2304 = vmatpush.msrb.mxu1 %v5639_v26 }
 0x552   :  { %v2148_v35 = vadd.f32 %v2147_v28, %v1596_v22  ;;  %2106 = vmatpush.bf16.msra.mxu3 %v3327_v27  ;;  %v3475_v22 = vor.u32 %v3823_v3, %v3472_v5  ;;  %v3384_v27 = vld [vmem:[%s6163_s1 + $0x9c] sm:$0xf0]  ;;  %v2070_v3 = vadd.f32 %v5384_v14, %v1590_v59  ;;  %v1597_v59 = vperm.slane %v5391_v24, 7 }
 0x553   :  { %2305 = vmatpush.msrb.mxu1 %v5656_v34  ;;  %2198 = vmatmul.bf16.vlgmr.msrb.gmra.mxu0 %v5193_v15  ;;  %v5696_v28 = vld [vmem:[%s6165_s3 + $0xc0] sm:$0xff]  ;;  %v3387_v32 = vor.u32 %v3801_v11, %v3384_v27 }
 0x554   :  { %vm2209_vm5 = vcmp.ge.f32.partialorder %v2148_v35, 0.0  ;;  %v2220_v48 = vmul.f32 0.01, %v2148_v35  ;;  %2360 = vmatpush.msra.mxu0 %v5650_v60  ;;  %v2214_v5 = vmul.f32 0.01, %v2070_v3  ;;  %vm2203_vm11 = vcmp.ge.f32.partialorder %v2070_v3, 0.0 }
 0x555   :  { %2107 = vmatmul.bf16.vlgmr.msra.gmra.mxu3 %v5193_v15  ;;  %2306 = vmatpush.msrb.mxu1 %v5673_v57 }
 0x556   :  { %2151 = vmatpush.bf16.msrb.mxu3 %v3651_v31  ;;  %v2231_v9 = vsel %vm2209_vm5, %v2148_v35, %v2220_v48  ;;  %v5701_v31 = vld [vmem:[%s6165_s3 + $0x130] sm:$0xff]  ;;  %2361 = vmatpush.msra.mxu0 %v5689_v19  ;;  %v3790_v35 = vld [vmem:[%s6163_s1 + $0x1c] sm:$0xf]  ;;  %v2225_v14 = vsel %vm2203_vm11, %v2070_v3, %v2214_v5  ;;  %v1600_v3 = vperm.slane %v5540_v0, 2 }
 0x557   :  { %v3898_v20 = vpack.i.bf16 %v2231_v9, %v5562_v50  ;;  %2307 = vmatpush.msrb.mxu1 %v5696_v28  ;;  %2329 = vmatpush.msra.mxu2 %v5701_v31  ;;  %v3343_v48 = vor.u32 %v3790_v35, %v3340_v36  ;;  %v5779_v9 = vld [vmem:[%s6165_s3 + $0x50] sm:$0xff] }
 0x558   :  { %2362 = vmatpush.msra.mxu0 %v5725_v38 }
 0x559   :  { %3899 = vrot.lane.b32.xlu1 %v3898_v20, %s3909_s20  ;;  %v2149_v40 = vpop.f32.mrf.mxu0  ;;  %2308 = vmatpush.msrb.mxu1 %v5709_v47  ;;  %v5815_v20 = vld [vmem:[%s6165_s3 + $0x88] sm:$0xff] }
 0x55a   :  { %2152 = vmatpush.bf16.msrb.mxu3 %v3607_v55  ;;  %2330 = vmatpush.msra.mxu2 %v5714_v33  ;;  %v5755_v55 = vld [vmem:[%s6165_s3 + $0x118] sm:$0xff] }
 0x55b   :  { %2309 = vmatpush.msrb.mxu1 %v5732_v42  ;;  %2363 = vmatpush.msra.mxu0 %v5743_v46 }
 0x55c   :  { %2331 = vmatpush.msra.mxu2 %v5737_v43 }
 0x55d   :  { %2310 = vmatpush.msrb.mxu1 %v5750_v52  ;;  %2364 = vmatpush.msra.mxu0 %v5761_v6 }
 0x55e   :  { %2153 = vmatpush.bf16.msrb.mxu3 %v3563_v25  ;;  %2332 = vmatpush.msra.mxu2 %v5755_v55  ;;  %v5841_v25 = vld [vmem:[%s6165_s3 + $0x38] sm:$0xff] }
 0x55f   :  { %2311 = vmatpush.msrb.mxu1 %v5768_v7  ;;  %2365 = vmatpush.msra.mxu0 %v5779_v9 }
 0x560   :  { %2333 = vmatpush.msra.mxu2 %v5773_v8 }
 0x561   :  { %2603 = vrot.lane.b32.xlu1 %v2234_v58, %s3910_s23  ;;  %2312 = vmatpush.msrb.mxu1 %v5786_v10  ;;  %v5900_v58 = vld [vmem:[%s6165_s3] sm:$0xff] }
 0x562   :  { %2154 = vmatpush.bf16.msrb.mxu3 %v3519_v54  ;;  %2334 = vmatpush.msra.mxu2 %v5791_v12  ;;  %v5892_v54 = vld [vmem:[%s6165_s3 + $0x8] sm:$0xff] }
 0x563   :  { %2366 = vmatpush.msra.mxu0 %v5798_v13  ;;  %2313 = vmatpush.msrb.mxu1 %v5804_v17 }
 0x564   :  { %2335 = vmatpush.msra.mxu2 %v5809_v18 }
 0x565   :  { %3664 = vmatmul.msk.f32.vlgmr.msra.gmra.mxu2 %vm835_vm3, %v5428_v29  ;;  %2314 = vmatpush.msrb.mxu1 %v5815_v20  ;;  %v5850_v29 = vld [vmem:[%s6165_s3 + $0x30] sm:$0xff] }
 0x566   :  { %2155 = vmatpush.bf16.msrb.mxu3 %v3475_v22  ;;  %2367 = vmatpush.msra.mxu0 %v5830_v39 }
 0x567   :  { %2315 = vmatpush.msrb.mxu1 %v5825_v21  ;;  %2407 = vmatpush.msrb.mxu2 %v5661_v41 }
 0x568   :  { %2368 = vmatpush.msra.mxu0 %v5841_v25 }
 0x569   :  { %2719 = vperm.xlu1 %3897, %v2711_v45   ;;  %2408 = vmatpush.msrb.mxu2 %v5678_v4 }
 0x56a   :  { %2156 = vmatpush.bf16.msrb.mxu3 %v3431_v53  ;;  %2369 = vmatpush.msra.mxu0 %v5850_v29 }
 0x56b   :  { %2409 = vmatpush.msrb.mxu2 %v5701_v31 }
 0x56c   :  { %2370 = vmatpush.msra.mxu0 %v5859_v44 }
 0x56d   :  { %2410 = vmatpush.msrb.mxu2 %v5714_v33 }
 0x56e   :  { %2157 = vmatpush.bf16.msrb.mxu3 %v3387_v32  ;;  %2371 = vmatpush.msra.mxu0 %v5867_v61 }
 0x56f   :  { %2411 = vmatpush.msrb.mxu2 %v5737_v43 }
 0x570   :  { %2372 = vmatpush.msra.mxu0 %v5875_v49 }
 0x571   :  { %2412 = vmatpush.msrb.mxu2 %v5755_v55 }
 0x572   :  { %2158 = vmatpush.bf16.msrb.mxu3 %v3343_v48  ;;  %2373 = vmatpush.msra.mxu0 %v5883_v62 }
 0x573   :  { %2413 = vmatpush.msrb.mxu2 %v5773_v8 }
 0x574   :  { %2374 = vmatpush.msra.mxu0 %v5892_v54 }
 0x575   :  { %2159 = vmatmul.bf16.vlgmr.msrb.gmra.mxu3 %v5193_v15  ;;  %v1591_v15 = vperm.slane %v5391_v24, 1  ;;  %2414 = vmatpush.msrb.mxu2 %v5791_v12 }
 0x576   :  { %2280 = vmatpush.msra.mxu3 %v5650_v60  ;;  %2375 = vmatpush.msra.mxu0 %v5900_v58 }
 0x577   :  { %v2083_v40 = vadd.f32 %v5386_v16, %v1591_v15  ;;  %2415 = vmatpush.msrb.mxu2 %v5809_v18 }
 0x578   :  { %2281 = vmatpush.msra.mxu3 %v5689_v19 }
 0x579   :  { %v2215_v16 = vmul.f32 0.01, %v2083_v40  ;;  %vm2204_vm9 = vcmp.ge.f32.partialorder %v2083_v40, 0.0  ;;  %2547 = vmatpush.msra.mxu2 %v5661_v41 }
 0x57a   :  { %2282 = vmatpush.msra.mxu3 %v5725_v38 }
 0x57b   :  { %v2226_v1 = vsel %vm2204_vm9, %v2083_v40, %v2215_v16  ;;  %2548 = vmatpush.msra.mxu2 %v5678_v4  ;;  %v1598_v40 = vperm.slane %v5540_v0, 0  ;;  %v2710_v0 = vld [vmem:[%s6168_s5] sm:$0xff] }
 0x57c   :  { %2283 = vmatpush.msra.mxu3 %v5743_v46  ;;  %2316 = vmatmul.f32.vlgmr.msrb.gmra.mxu1 %v2226_v1 }
 0x57d   :  { %2549 = vmatpush.msra.mxu2 %v5701_v31 }
 0x57e   :  { %2284 = vmatpush.msra.mxu3 %v5761_v6 }
 0x57f   :  { %2550 = vmatpush.msra.mxu2 %v5714_v33 }
 0x580   :  { %2285 = vmatpush.msra.mxu3 %v5779_v9 }
 0x581   :  { %2551 = vmatpush.msra.mxu2 %v5737_v43 }
 0x582   :  { %2286 = vmatpush.msra.mxu3 %v5798_v13 }
 0x583   :  { %2552 = vmatpush.msra.mxu2 %v5755_v55 }
 0x584   :  { %2287 = vmatpush.msra.mxu3 %v5830_v39 }
 0x585   :  { %2553 = vmatpush.msra.mxu2 %v5773_v8 }
 0x586   :  { %2288 = vmatpush.msra.mxu3 %v5841_v25 }
 0x587   :  { %2554 = vmatpush.msra.mxu2 %v5791_v12 }
 0x588   :  { %2289 = vmatpush.msra.mxu3 %v5850_v29 }
 0x589   :  { %2555 = vmatpush.msra.mxu2 %v5809_v18 }
 0x58a   :  { %2290 = vmatpush.msra.mxu3 %v5859_v44 }
 0x58c   :  { %2291 = vmatpush.msra.mxu3 %v5867_v61 }
 0x58e   :  { %2292 = vmatpush.msra.mxu3 %v5875_v49 }
 0x590   :  { %2293 = vmatpush.msra.mxu3 %v5883_v62 }
 0x592   :  { %2294 = vmatpush.msra.mxu3 %v5892_v54 }
 0x594   :  { %2295 = vmatpush.msra.mxu3 %v5900_v58 }
 0x595   :  { %2296 = vmatmul.f32.vlgmr.msra.gmra.mxu3 %v2225_v14 }
 0x596   :  { %2380 = vmatpush.msrb.mxu3 %v5595_v37 }
 0x598   :  { %2381 = vmatpush.msrb.mxu3 %v5614_v51 }
 0x59a   :  { %2382 = vmatpush.msrb.mxu3 %v5620_v56 }
 0x59c   :  { %2383 = vmatpush.msrb.mxu3 %v5632_v2 }
 0x59e   :  { %2384 = vmatpush.msrb.mxu3 %v5639_v26 }
 0x5a0   :  { %2385 = vmatpush.msrb.mxu3 %v5656_v34 }
 0x5a2   :  { %2386 = vmatpush.msrb.mxu3 %v5673_v57 }
 0x5a4   :  { %2387 = vmatpush.msrb.mxu3 %v5696_v28 }
 0x5a6   :  { %2388 = vmatpush.msrb.mxu3 %v5709_v47 }
 0x5a8   :  { %2389 = vmatpush.msrb.mxu3 %v5732_v42 }
 0x5aa   :  { %2390 = vmatpush.msrb.mxu3 %v5750_v52 }
 0x5ac   :  { %2391 = vmatpush.msrb.mxu3 %v5768_v7 }
 0x5ae   :  { %2392 = vmatpush.msrb.mxu3 %v5786_v10 }
 0x5b0   :  { %2393 = vmatpush.msrb.mxu3 %v5804_v17 }
 0x5b2   :  { %2394 = vmatpush.msrb.mxu3 %v5815_v20 }
 0x5b4   :  { %2395 = vmatpush.msrb.mxu3 %v5825_v21 }
 0x5b6   :  { %2500 = vmatpush.msra.mxu3 %v5650_v60 }
 0x5b8   :  { %2501 = vmatpush.msra.mxu3 %v5689_v19  ;;  %v1483_v22 = vpop.f32.mrf.mxu3 }
 0x5b9   :  { %v1484_v23 = vadd.f32 %v1483_v22, %v1461_v63 }
 0x5ba   :  { %2502 = vmatpush.msra.mxu3 %v5725_v38 }
 0x5bb   :  { %1487 = vst.msk [vmem:[%s6177_s14] sm:$0x7] %vm1486_vm2, %v1484_v23 }
 0x5bc   :  { %2503 = vmatpush.msra.mxu3 %v5743_v46 }
 0x5be   :  { %2504 = vmatpush.msra.mxu3 %v5761_v6  ;;  %v2173_v45 = vpop.f32.mrf.mxu1 }
 0x5bf   :  { %v2174_v16 = vadd.f32 %v2173_v45, %v1598_v40  ;;  %v2346_v40 = vpop.permute.xlu0 %2345 }
 0x5c0   :  { %2505 = vmatpush.msra.mxu3 %v5779_v9 }
 0x5c1   :  { %v2222_v1 = vmul.f32 0.01, %v2174_v16  ;;  %vm2211_vm7 = vcmp.ge.f32.partialorder %v2174_v16, 0.0 }
 0x5c2   :  { %2506 = vmatpush.msra.mxu3 %v5798_v13 }
 0x5c3   :  { %v2233_v22 = vsel %vm2211_vm7, %v2174_v16, %v2222_v1 }
 0x5c4   :  { %2507 = vmatpush.msra.mxu3 %v5830_v39 }
 0x5c6   :  { %2508 = vmatpush.msra.mxu3 %v5841_v25  ;;  %v2175_v35 = vpop.f32.mrf.mxu1 }
 0x5c8   :  { %2509 = vmatpush.msra.mxu3 %v5850_v29 }
 0x5ca   :  { %2510 = vmatpush.msra.mxu3 %v5859_v44 }
 0x5cc   :  { %2511 = vmatpush.msra.mxu3 %v5867_v61 }
 0x5ce   :  { %2512 = vmatpush.msra.mxu3 %v5875_v49 }
 0x5d0   :  { %2513 = vmatpush.msra.mxu3 %v5883_v62  ;;  %v2199_v48 = vpop.f32.mrf.mxu0 }
 0x5d1   :  { %v2200_v23 = vadd.f32 %v2199_v48, %v1600_v3 }
 0x5d2   :  { %2514 = vmatpush.msra.mxu3 %v5892_v54 }
 0x5d3   :  { %vm2213_vm11 = vcmp.ge.f32.partialorder %v2200_v23, 0.0 }
 0x5d4   :  { %2515 = vmatpush.msra.mxu3 %v5900_v58 }
 0x5d8   :  { %v2108_v53 = vpop.f32.mrf.mxu3  ;;  %v2201_v15 = vpop.f32.mrf.mxu0 }
 0x5d9   :  { %v2109_v11 = vadd.f32 %v2108_v53, %v1593_v30  ;;  %v2350_v15 = vpop.permute.xlu1 %2349 }
 0x5db   :  { %v2217_v27 = vmul.f32 0.01, %v2109_v11  ;;  %vm2206_vm5 = vcmp.ge.f32.partialorder %v2109_v11, 0.0 }
 0x5dd   :  { %v2228_v32 = vsel %vm2206_vm5, %v2109_v11, %v2217_v27  ;;  %v2769_v11 = vld [vmem:[%s6170_s8] sm:$0xf] }
 0x5de   :  { %2347 = vrot.lane.b32.xlu2 %v2228_v32, %s3908_s19 }
 0x5e0   :  { %v2110_v36 = vpop.f32.mrf.mxu3 }
 0x5e1   :  { %v3900_v3 = vpop.permute.xlu1 %3899 }
 0x5e6   :  { %2351 = vrot.lane.b32.xlu2 %v5562_v50, %s3908_s19  ;;  %v2224_v50 = vmul.f32 0.01, %v2200_v23 }
 0x5e8   :  { %v2235_v24 = vsel %vm2213_vm11, %v2200_v23, %v2224_v50  ;;  %v2337_v36 = vpop.f32.mrf.mxu2  ;;  %v3675_v50 = vld [vmem:[%s6167_s4 + $0x20] sm:$0xff] }
 0x5f8   :  { %v2160_v5 = vpop.f32.mrf.mxu3 }
 0x5f9   :  { %v2161_v14 = vadd.f32 %v2160_v5, %v1597_v59  ;;  %v2317_v32 = vpop.f32.mrf.mxu1  ;;  %v3902_v5 = vunpack.i.h.bf16 %v3900_v3 }
 0x5fb   :  { %v2221_v63 = vmul.f32 0.01, %v2161_v14  ;;  %vm2210_vm9 = vcmp.ge.f32.partialorder %v2161_v14, 0.0 }
 0x5fd   :  { %v2232_v30 = vsel %vm2210_vm9, %v2161_v14, %v2221_v63  ;;  %v3901_v14 = vunpack.i.l.bf16 %v3900_v3 }
 0x5fe   :  { %v3903_v53 = vpack.i.bf16 %v2233_v22, %v2232_v30  ;;  %2492 = vrot.lane.b32.xlu2 %v2232_v30, %s3909_s20 }
 0x5ff   :  { %v2494_v63 = vsel %vm1057_vm15, %v3901_v14, %v3902_v5 }
 0x600   :  { %3904 = vrot.lane.b32.xlu0 %v3903_v53, %s3910_s23  ;;  %v2162_v45 = vpop.f32.mrf.mxu3 }
 0x601   :  { %v3676_v45 = vld [vmem:[%s6167_s4 + $0x28] sm:$0xf] }
 0x606   :  { %2605 = vrot.lane.b32.xlu2 %v2235_v24, %s3910_s23  ;;  %v2733_v24 = vld [vmem:[%s6169_s6 + $0x18] sm:$0xff] }
 0x608   :  { %2714 = vperm.xlu0 %3896, %v2710_v0   ;;  %v2732_v0 = vld [vmem:[%s6169_s6 + $0x10] sm:$0xff] }
 0x60e   :  { %2772 = vperm.xlu2 %3895, %v2769_v11   ;;  %v2731_v11 = vld [vmem:[%s6169_s6 + $0x8] sm:$0xff] }
 0x618   :  { %v2297_v27 = vpop.f32.mrf.mxu3 }
 0x619   :  { %v2318_v35 = vadd.f32 %v2317_v32, %v2297_v27  ;;  %v2730_v27 = vld [vmem:[%s6169_s6] sm:$0xff] }
 0x61b   :  { %v2338_v48 = vadd.f32 %v2337_v36, %v2318_v35 }
 0x61d   :  { %3671 = vmatpush.msk.msrb.mxu0 %vm990_vm13, %v2338_v48 }
 0x638   :  { %v2348_v16 = vpop.permute.xlu2 %2347 }
 0x639   :  { %v2353_v59 = vsel %vm912_vm12, %v2346_v40, %v2348_v16  ;;  %v2354_v1 = vsel %vm912_vm12, %v2348_v16, %v2350_v15 }
 0x63a   :  { %2376 = vmatmul.f32.vlgmr.msra.gmra.mxu0 %v2353_v59  ;;  %2396 = vmatmul.f32.vlgmr.msrb.gmra.mxu3 %v2354_v1 }
 0x63b   :  { %2661 = vmatpush.msrb.mxu3 %v5661_v41 }
 0x63d   :  { %2662 = vmatpush.msrb.mxu3 %v5678_v4  ;;  %v6005_v4 = vpop.permute.xlu1 %2603 }
 0x63f   :  { %2663 = vmatpush.msrb.mxu3 %v5701_v31 }
 0x640   :  { %v2352_v22 = vpop.permute.xlu2 %2351 }
 0x641   :  { %v2355_v23 = vsel %vm912_vm12, %v2350_v15, %v2352_v22  ;;  %2664 = vmatpush.msrb.mxu3 %v5714_v33  ;;  %v2340_v33 = vld [vmem:[%s6167_s4] sm:$0xff] }
 0x642   :  { %3665 = vmatmul.msk.f32.vlgmr.msrb.gmra.mxu2 %vm835_vm3, %v2355_v23  ;;  %2516 = vmatmul.f32.vlgmr.msra.gmra.mxu3 %v2494_v63  ;;  %v2768_v23 = vld [vmem:[%s6171_s7] sm:$0xf] }
 0x643   :  { %2614 = vmatpush.msrb.mxu2 %v5650_v60  ;;  %2665 = vmatpush.msrb.mxu3 %v5737_v43 }
 0x644   :  { %3672 = vmatmul.msk.f32.vlgmr.msrb.gmra.mxu0 %vm983_vm14, %v2340_v33 }
 0x645   :  { %2615 = vmatpush.msrb.mxu2 %v5689_v19  ;;  %2666 = vmatpush.msrb.mxu3 %v5755_v55  ;;  %v2720_v1 = vpop.permute.xlu1 %2719 }
 0x647   :  { %2616 = vmatpush.msrb.mxu2 %v5725_v38  ;;  %2667 = vmatpush.msrb.mxu3 %v5773_v8  ;;  %v2341_v38 = vld [vmem:[%s6167_s4 + $0x8] sm:$0xf] }
 0x649   :  { %2617 = vmatpush.msrb.mxu2 %v5743_v46  ;;  %2668 = vmatpush.msrb.mxu3 %v5791_v12 }
 0x64b   :  { %2618 = vmatpush.msrb.mxu2 %v5761_v6  ;;  %2669 = vmatpush.msrb.mxu3 %v5809_v18  ;;  %v3666_v18 = vld [vmem:[%s6167_s4 + $0x10] sm:$0xff] }
 0x64c   :  { %3673 = vmatmul.msk.f32.gmra.mxu0 %vm983_vm14, %v2341_v38 }
 0x64d   :  { %2619 = vmatpush.msrb.mxu2 %v5779_v9 }
 0x64f   :  { %2620 = vmatpush.msrb.mxu2 %v5798_v13 }
 0x651   :  { %2621 = vmatpush.msrb.mxu2 %v5830_v39 }
 0x653   :  { %2622 = vmatpush.msrb.mxu2 %v5841_v25  ;;  %v3667_v25 = vld [vmem:[%s6167_s4 + $0x18] sm:$0xf] }
 0x655   :  { %2623 = vmatpush.msrb.mxu2 %v5850_v29 }
 0x657   :  { %2624 = vmatpush.msrb.mxu2 %v5859_v44 }
 0x658   :  { %v2493_v60 = vpop.permute.xlu2 %2492 }
 0x659   :  { %v2495_v41 = vsel %vm1057_vm15, %v3902_v5, %v2493_v60  ;;  %3674 = vmatmul.msk.f32.vlgmr.msra.gmra.mxu2 %vm835_vm3, %v2493_v60  ;;  %v2806_v60 = vld [vmem:[%s6172_s9 + $0x10] sm:$0xf] }
 0x65a   :  { %2625 = vmatpush.msrb.mxu2 %v5867_v61 }
 0x65c   :  { %2626 = vmatpush.msrb.mxu2 %v5875_v49 }
 0x65e   :  { %2627 = vmatpush.msrb.mxu2 %v5883_v62 }
 0x660   :  { %v2606_v19 = vpop.permute.xlu2 %2605  ;;  %2628 = vmatpush.msrb.mxu2 %v5892_v54 }
 0x661   :  { %v2609_v31 = vsel %vm1172_vm0, %v6005_v4, %v2606_v19 }
 0x662   :  { %3680 = vmatmul.msk.f32.vlgmr.msrb.gmra.mxu3 %vm835_vm3, %v2609_v31  ;;  %2629 = vmatpush.msrb.mxu2 %v5900_v58 }
 0x664   :  { %3691 = vmatpush.msk.msra.mxu2 %vm990_vm13, %v2806_v60 }
 0x668   :  { %v2773_v19 = vpop.permute.xlu2 %2772 }
 0x672   :  { %v6021_v46 = vpop.permute.xlu0 %3904 }
 0x673   :  { %v3907_v6 = vunpack.i.h.bf16 %v6021_v46  ;;  %v3906_v8 = vunpack.i.l.bf16 %v6021_v46  ;;  %v2833_v46 = vld [vmem:[%s6173_s10] sm:$0xff] }
 0x675   :  { %v2607_v39 = vsel %vm1172_vm0, %v3906_v8, %v3907_v6  ;;  %v2835_v8 = vld [vmem:[%s6173_s10 + $0x10] sm:$0xff] }
 0x676   :  { %2630 = vmatmul.f32.vlgmr.msrb.gmra.mxu2 %v2607_v39  ;;  %v2839_v39 = vld [vmem:[%s6174_s11 + $0x10] sm:$0xff] }
 0x67a   :  { %v2715_v36 = vpop.permute.xlu0 %2714 }
 0x6b7   :  { %v2377_v55 = vpop.f32.mrf.mxu0 }
 0x6bd   :  { %v2397_v43 = vpop.f32.mrf.mxu3 }
 0x6be   :  { %v2398_v9 = vadd.f32 %v2397_v43, %v2377_v55 }
 0x6c1   :  { %v2480_v29 = vpop.f32.mrf.mxu0 }
 0x6c5   :  { %v2417_v12 = vpop.f32.mrf.mxu2  ;;  %v2517_v62 = vpop.f32.mrf.mxu3 }
 0x6c6   :  { %v2418_v13 = vadd.f32 %v2417_v12, %v2398_v9  ;;  %v2836_v9 = vld [vmem:[%s6173_s10 + $0x18] sm:$0xff] }
 0x6c8   :  { %3668 = vmatpush.msk.msra.mxu1 %vm990_vm13, %v2418_v13 }
 0x6c9   :  { %3669 = vmatmul.msk.f32.vlgmr.msra.gmra.mxu1 %vm983_vm14, %v3666_v18 }
 0x6ca   :  { %2520 = vmatpush.msrb.mxu1 %v5595_v37 }
 0x6cc   :  { %2521 = vmatpush.msrb.mxu1 %v5614_v51 }
 0x6ce   :  { %2522 = vmatpush.msrb.mxu1 %v5620_v56 }
 0x6d0   :  { %2523 = vmatpush.msrb.mxu1 %v5632_v2 }
 0x6d1   :  { %3670 = vmatmul.msk.f32.gmra.mxu1 %vm983_vm14, %v3667_v25  ;;  %v2840_v25 = vld [vmem:[%s6174_s11 + $0x18] sm:$0xff] }
 0x6d2   :  { %2524 = vmatpush.msrb.mxu1 %v5639_v26 }
 0x6d4   :  { %2525 = vmatpush.msrb.mxu1 %v5656_v34 }
 0x6d6   :  { %2526 = vmatpush.msrb.mxu1 %v5673_v57 }
 0x6d8   :  { %2527 = vmatpush.msrb.mxu1 %v5696_v28 }
 0x6da   :  { %2528 = vmatpush.msrb.mxu1 %v5709_v47 }
 0x6dc   :  { %2529 = vmatpush.msrb.mxu1 %v5732_v42  ;;  %v2557_v30 = vpop.f32.mrf.mxu2 }
 0x6de   :  { %2530 = vmatpush.msrb.mxu1 %v5750_v52 }
 0x6e0   :  { %2531 = vmatpush.msrb.mxu1 %v5768_v7 }
 0x6e2   :  { %2532 = vmatpush.msrb.mxu1 %v5786_v10 }
 0x6e4   :  { %2533 = vmatpush.msrb.mxu1 %v5804_v17 }
 0x6e6   :  { %2534 = vmatpush.msrb.mxu1 %v5815_v20 }
 0x6e8   :  { %2535 = vmatpush.msrb.mxu1 %v5825_v21 }
 0x6e9   :  { %2536 = vmatmul.f32.vlgmr.msrb.gmra.mxu1 %v2495_v41  ;;  %v2805_v41 = vld [vmem:[%s6172_s9 + $0x8] sm:$0xff] }
 0x6ea   :  { %2827 = vmatpush.msra.mxu2 %v2805_v41 }
 0x746   :  { %v2448_v44 = vpop.f32.mrf.mxu1 }
 0x747   :  { %v2481_v61 = vadd.f32 %v2480_v29, %v2448_v44  ;;  %v2838_v29 = vld [vmem:[%s6174_s11 + $0x8] sm:$0xff] }
 0x74e   :  { %v2451_v49 = vpop.f32.mrf.mxu1 }
 0x766   :  { %v2537_v54 = vpop.f32.mrf.mxu1 }
 0x767   :  { %v2538_v58 = vadd.f32 %v2537_v54, %v2517_v62  ;;  %v2837_v62 = vld [vmem:[%s6174_s11] sm:$0xff]  ;;  %s3912_s11 = smov 1  }
 0x769   :  { %v2558_v53 = vadd.f32 %v2557_v30, %v2538_v58 }
 0x76b   :  { %3677 = vmatpush.msk.msra.mxu0 %vm990_vm13, %v2558_v53 }
 0x76c   :  { %3678 = vmatmul.msk.f32.vlgmr.msra.gmra.mxu0 %vm983_vm14, %v3675_v50 }
 0x76d   :  { %2634 = vmatpush.msrb.mxu0 %v5595_v37  ;;  %v2608_v37 = vsel %vm1172_vm0, %v3907_v6, %v6005_v4  ;;  %v2804_v4 = vld [vmem:[%s6172_s9] sm:$0xff]  ;;  %v2834_v6 = vld [vmem:[%s6173_s10 + $0x8] sm:$0xff] }
 0x76e   :  { %2828 = vmatpush.msra.mxu2 %v2804_v4 }
 0x76f   :  { %2635 = vmatpush.msrb.mxu0 %v5614_v51  ;;  %v2483_v51 = vpop.f32.mrf.mxu0 }
 0x771   :  { %2636 = vmatpush.msrb.mxu0 %v5620_v56 }
 0x773   :  { %2637 = vmatpush.msrb.mxu0 %v5632_v2 }
 0x774   :  { %3679 = vmatmul.msk.f32.gmra.mxu0 %vm983_vm14, %v3676_v45 }
 0x775   :  { %2638 = vmatpush.msrb.mxu0 %v5639_v26  ;;  %v2484_v26 = vadd.f32 %v2483_v51, %v2451_v49  ;;  %v2890_v51 = vld [vmem:[%s6176_s13] sm:$0x7] }
 0x777   :  { %2639 = vmatpush.msrb.mxu0 %v5656_v34 }
 0x779   :  { %2640 = vmatpush.msrb.mxu0 %v5673_v57 }
 0x77b   :  { %2641 = vmatpush.msrb.mxu0 %v5696_v28  ;;  %v2631_v28 = vpop.f32.mrf.mxu2 }
 0x77d   :  { %2642 = vmatpush.msrb.mxu0 %v5709_v47 }
 0x77f   :  { %2643 = vmatpush.msrb.mxu0 %v5732_v42 }
 0x781   :  { %2644 = vmatpush.msrb.mxu0 %v5750_v52  ;;  %v2671_v52 = vpop.f32.mrf.mxu3 }
 0x783   :  { %2645 = vmatpush.msrb.mxu0 %v5768_v7 }
 0x785   :  { %2646 = vmatpush.msrb.mxu0 %v5786_v10  ;;  %v3681_v10 = vld [vmem:[%s6167_s4 + $0x30] sm:$0xff] }
 0x787   :  { %2647 = vmatpush.msrb.mxu0 %v5804_v17  ;;  %v2735_v17 = vld [vmem:[%s6169_s6 + $0x28] sm:$0x1] }
 0x789   :  { %2648 = vmatpush.msrb.mxu0 %v5815_v20  ;;  %v2734_v20 = vld [vmem:[%s6169_s6 + $0x20] sm:$0xff] }
 0x78b   :  { %2649 = vmatpush.msrb.mxu0 %v5825_v21  ;;  %v3682_v21 = vld [vmem:[%s6167_s4 + $0x38] sm:$0xf] }
 0x78c   :  { %2650 = vmatmul.f32.vlgmr.msrb.gmra.mxu0 %v2608_v37  ;;  %v2889_v37 = vld [vmem:[%s6175_s12] sm:$0x7] }
 0x7e9   :  { %v2588_v56 = vpop.f32.mrf.mxu0 }
 0x7ea   :  { %v2594_v2 = vadd.f32 %v2588_v56, %v2481_v61 }
 0x7f1   :  { %v2591_v34 = vpop.f32.mrf.mxu0 }
 0x7f2   :  { %v2595_v57 = vadd.f32 %v2591_v34, %v2484_v26 }
 0x809   :  { %v2651_v47 = vpop.f32.mrf.mxu0 }
 0x80a   :  { %v2652_v42 = vadd.f32 %v2651_v47, %v2631_v28 }
 0x80c   :  { %v2672_v7 = vadd.f32 %v2671_v52, %v2652_v42 }
 0x80e   :  { %3683 = vmatpush.msk.msra.mxu1 %vm990_vm13, %v2672_v7 }
 0x80f   :  { %3684 = vmatmul.msk.f32.vlgmr.msra.gmra.mxu1 %vm983_vm14, %v3681_v10 }
 0x810   :  { %3686 = vmatpush.msk.msrb.mxu1 %vm1310_vm1, %v2735_v17 }
 0x812   :  { %2756 = vmatpush.msrb.mxu1 %v2734_v20 }
 0x814   :  { %2757 = vmatpush.msrb.mxu1 %v2733_v24 }
 0x816   :  { %2758 = vmatpush.msrb.mxu1 %v2732_v0 }
 0x817   :  { %3685 = vmatmul.msk.f32.gmra.mxu1 %vm983_vm14, %v3682_v21 }
 0x818   :  { %2759 = vmatpush.msrb.mxu1 %v2731_v11 }
 0x81a   :  { %2760 = vmatpush.msrb.mxu1 %v2730_v27 }
 0x88c   :  { %v2702_v32 = vpop.f32.mrf.mxu1 }
 0x88d   :  { %v2708_v35 = vadd.f32 %v2702_v32, %v2594_v2 }
 0x88f   :  { %v2722_v48 = vadd.f32 %v2715_v36, %v2708_v35 }
 0x891   :  { %vm2724_vm3 = vcmp.ge.f32.partialorder %v2722_v48, 0.0  ;;  %v2726_v15 = vmul.f32 0.01, %v2722_v48 }
 0x893   :  { %v2728_v40 = vsel %vm2724_vm3, %v2722_v48, %v2726_v15 }
 0x894   :  { %v2705_v16 = vpop.f32.mrf.mxu1  ;;  %3687 = vmatmul.msk.f32.vlgmr.msrb.gmra.mxu1 %vm1303_vm4, %v2728_v40 }
 0x895   :  { %v2709_v59 = vadd.f32 %v2705_v16, %v2595_v57 }
 0x897   :  { %v2723_v3 = vadd.f32 %v2720_v1, %v2709_v59 }
 0x899   :  { %v2727_v5 = vmul.f32 0.01, %v2723_v3  ;;  %vm2725_vm12 = vcmp.ge.f32.partialorder %v2723_v3, 0.0 }
 0x89b   :  { %v2729_v14 = vsel %vm2725_vm12, %v2723_v3, %v2727_v5 }
 0x89c   :  { %3688 = vmatmul.msk.f32.gmra.mxu1 %vm1303_vm4, %v2729_v14 }
 0x911   :  { %v2762_v63 = vpop.f32.mrf.mxu1 }
 0x919   :  { %v2765_v22 = vpop.f32.mrf.mxu1 }
 0x91a   :  { %3689 = vmatpush.msk.msra.mxu3 %vm990_vm13, %v2765_v22 }
 0x91c   :  { %2796 = vmatpush.msra.mxu3 %v2762_v63 }
 0x91d   :  { %3690 = vmatmul.msk.f32.vlgmr.msra.gmra.mxu3 %vm1344_vm6, %v2768_v23 }
 0x9a0   :  { %v2798_v31 = vpop.f32.mrf.mxu3 }
 0x9a1   :  { %v2799_v33 = vadd.f32 %v2798_v31, %v2773_v19 }
 0x9a3   :  { %vm2801_vm15 = vcmp.ge.f32.partialorder %v2799_v33, 0.0  ;;  %v2802_v38 = vmul.f32 0.01, %v2799_v33 }
 0x9a5   :  { %v2803_v43 = vsel %vm2801_vm15, %v2799_v33, %v2802_v38 }
 0x9a6   :  { %3692 = vmatmul.msk.f32.vlgmr.msra.gmra.mxu2 %vm1377_vm8, %v2803_v43 }
 0xa29   :  { %v2830_v55 = vpop.f32.mrf.mxu2 }
 0xa2a   :  { %3693 = vmatpush.msk.msra.mxu0 %vm990_vm13, %v2830_v55  ;;  %vm2918_vm13 = vcmask 10248  }
 0xa2b   :  { %3694 = vmatmul.msk.f32.vlgmr.msra.gmra.mxu0 %vm983_vm14, %v2833_v46 }
 0xa33   :  { %3695 = vmatmul.msk.f32.gmra.mxu0 %vm983_vm14, %v2834_v6 }
 0xa3b   :  { %3696 = vmatmul.msk.f32.gmra.mxu0 %vm983_vm14, %v2835_v8 }
 0xa43   :  { %3697 = vmatmul.msk.f32.gmra.mxu0 %vm983_vm14, %v2836_v9 }
 0xaa8   :  { %v2873_v12 = vpop.f32.mrf.mxu0 }
 0xaa9   :  { %v2874_v30 = vadd.f32 %v2873_v12, %v2837_v62 }
 0xaab   :  { %v2885_v45 = vmax.f32 %v2874_v30, 0.0 }
 0xab0   :  { %v2876_v13 = vpop.f32.mrf.mxu0 }
 0xab1   :  { %v2877_v54 = vadd.f32 %v2876_v13, %v2838_v29 }
 0xab3   :  { %v2886_v50 = vmax.f32 %v2877_v54, 0.0 }
 0xab8   :  { %v2879_v18 = vpop.f32.mrf.mxu0 }
 0xab9   :  { %v2880_v61 = vadd.f32 %v2879_v18, %v2839_v39 }
 0xabb   :  { %v2887_v53 = vmax.f32 %v2880_v61, 0.0 }
 0xac0   :  { %v2882_v44 = vpop.f32.mrf.mxu0 }
 0xac1   :  { %v2883_v49 = vadd.f32 %v2882_v44, %v2840_v25 }
 0xac3   :  { %v2888_v58 = vmax.f32 %v2883_v49, 0.0 }
 0xac5   :  { %2906 = vmatpush.msrb.mxu3 %v2888_v58 }
 0xac7   :  { %2907 = vmatpush.msrb.mxu3 %v2887_v53 }
 0xac9   :  { %2908 = vmatpush.msrb.mxu3 %v2886_v50 }
 0xacb   :  { %2909 = vmatpush.msrb.mxu3 %v2885_v45 }
 0xacc   :  { %3698 = vmatmul.msk.f32.vlgmr.msrb.gmra.mxu3 %vm1462_vm10, %v2889_v37 }
 0xb4f   :  { %v2911_v56 = vpop.f32.mrf.mxu3 }
 0xb50   :  { %v2912_v2 = vadd.f32 %v2911_v56, %v2890_v51 }
 0xb52   :  { %2915 = vrot.lane.b32.xlu0 %v2912_v2, %s3912_s11 }
 0xbc4   :  { %v2916_v26 = vpop.permute.xlu0 %2915 }
 0xbc5   :  { %2919 = vst.msk [vmem:[%s6177_s14] sm:$0x7] %vm2918_vm13, %v2916_v26 }

</bundles_post_ra>
